<compile_context>
chip_gen: v6e
topology: v6e:2x2x1
jax: 0.10.0
libtpu: 0.0.40
codegen_flags: <defaults>
</compile_context>

<pallas_src>
import functools

import jax
import jax.numpy as jnp
from jax.experimental import pallas as pl
from jax.experimental.pallas import tpu as pltpu

NUM_SCALES = 12          # 12 per-scale nn.Linear(768, 512) layers
IN_DIM = 768
OUT_DIM = 512
B = 2                    # batch
N = 8                    # tokens per scale (axis reduced by AdaIN_trans.mu)
G = 3                    # scales per grid step  -> grid = 4 (even, v7x-friendly)


def multi_scale_kernel(x_ref, w_ref, b_ref, o_ref):
    # x_ref: (G, B, N, IN_DIM)            fp32 activations for G scales
    # w_ref: (G, IN_DIM, OUT_DIM)         bf16 weights, already (in, out)
    # b_ref: (NUM_SCALES, 1, OUT_DIM)     fp32 biases, fully VMEM-resident
    # o_ref: (G, B, OUT_DIM)              fp32 output slab for this group
    x = x_ref[...].astype(jnp.float32)                   # (G, B, N, IN)
    # AdaIN_trans.mu: sum over the token axis / num_tokens
    mu = jnp.sum(x, axis=2) * (1.0 / N)                  # (G, B, IN), fp32
    mu_bf = mu.astype(jnp.bfloat16)                      # native bf16 MXU pass
    out = jnp.einsum("gbi,gio->gbo", mu_bf, w_ref[...],
                     preferred_element_type=jnp.float32)  # (G, B, OUT), fp32 acc
    g0 = pl.multiple_of(pl.program_id(0) * G, G)
    bias = b_ref[pl.ds(g0, G), :, :]                     # (G, 1, OUT) slice of resident bias
    o_ref[...] = (out + bias).astype(o_ref.dtype)


@jax.jit
def multi_scale_forward(data, weights_bf16, biases):
    """data: (NUM_SCALES, B, N, IN_DIM) fp32 (already stacked by the caller);
    weights_bf16: (NUM_SCALES, IN_DIM, OUT_DIM) bf16 (nn.Linear weight.T per scale);
    biases: (NUM_SCALES, OUT_DIM) fp32.
    Returns (B, NUM_SCALES, OUT_DIM), matching torch.stack(data_prompt, 1)."""
    biases3 = biases.reshape(NUM_SCALES, 1, OUT_DIM)

    cost = pl.CostEstimate(
        flops=2 * B * IN_DIM * OUT_DIM * NUM_SCALES,        # ~1.9e7
        bytes_accessed=(NUM_SCALES * IN_DIM * OUT_DIM * 2   # bf16 weights
                        + NUM_SCALES * B * N * IN_DIM * 4   # activations
                        + NUM_SCALES * OUT_DIM * 4          # bias
                        + NUM_SCALES * B * OUT_DIM * 4),    # output
        transcendentals=0,
    )

    out = pl.pallas_call(
        multi_scale_kernel,
        out_shape=jax.ShapeDtypeStruct((NUM_SCALES, B, OUT_DIM), jnp.float32),
        grid=(NUM_SCALES // G,),
        in_specs=[
            pl.BlockSpec((G, B, N, IN_DIM), lambda i: (i, 0, 0, 0)),
            pl.BlockSpec((G, IN_DIM, OUT_DIM), lambda i: (i, 0, 0)),
            # bias: one resident block for the whole grid (no per-step DMAs)
            pl.BlockSpec((NUM_SCALES, 1, OUT_DIM), lambda i: (0, 0, 0)),
        ],
        out_specs=pl.BlockSpec((G, B, OUT_DIM), lambda i: (i, 0, 0)),
        compiler_params=pltpu.CompilerParams(
            dimension_semantics=("parallel",)),
        cost_estimate=cost,
    )(data, weights_bf16, biases3)

    # torch.stack(..., dim=1): (B, NUM_SCALES, OUT_DIM). Under jit this tiny
    # transpose fuses with downstream consumers.
    return jnp.transpose(out, (1, 0, 2))


if __name__ == "__main__":
    key = jax.random.PRNGKey(0)
    kd, kw, kb = jax.random.split(key, 3)

    # 12 multi-scale feature maps, each (B, N, 768) — stacked once by the caller.
    data_all = jax.random.normal(kd, (NUM_SCALES, B, N, IN_DIM), jnp.float32)
    # Per-scale Linear(768 -> 512) params stored as (in, out) for x @ W + b.
    # NOTE: real nn.Linear stores weight as (out, in); transpose when porting.
    weights_f32 = 0.02 * jax.random.normal(kw, (NUM_SCALES, IN_DIM, OUT_DIM),
                                           jnp.float32)
    biases = 0.01 * jax.random.normal(kb, (NUM_SCALES, OUT_DIM), jnp.float32)
    weights_bf16 = weights_f32.astype(jnp.bfloat16)

    out = multi_scale_forward(data_all, weights_bf16, biases)
    out = jax.block_until_ready(out)

    # Reference 1: same bf16-weight numerics as the kernel (tight tolerance).
    mu_ref = jnp.mean(data_all, axis=2)                                # (12, B, 768)
    mu_bf = mu_ref.astype(jnp.bfloat16)
    ref_bf = jnp.einsum("sbc,sco->sbo", mu_bf, weights_bf16,
                        preferred_element_type=jnp.float32) + biases[:, None, :]
    ref_bf = jnp.transpose(ref_bf, (1, 0, 2))                          # (B, 12, 512)
    # Reference 2: original fp32 semantics (loose tolerance — bf16 weight cast).
    ref_f32 = jnp.einsum("sbc,sco->sbo", mu_ref, weights_f32) + biases[:, None, :]
    ref_f32 = jnp.transpose(ref_f32, (1, 0, 2))

    assert out.shape == (B, NUM_SCALES, OUT_DIM), out.shape
    assert bool(jnp.all(jnp.isfinite(out)))
    assert bool(jnp.allclose(out, ref_bf, rtol=2e-3, atol=2e-3)), \
        float(jnp.max(jnp.abs(out - ref_bf)))
    assert bool(jnp.allclose(out, ref_f32, rtol=5e-2, atol=5e-2)), \
        float(jnp.max(jnp.abs(out - ref_f32)))
    print("KERNEL_OK")
</pallas_src>

<mosaic_0001>
module attributes {stable_mosaic.version = 11 : i64} {
  func.func @multi_scale_kernel(%arg0: i32, %arg1: memref<3x2x8x768xf32, #tpu.memory_space<vmem>>, %arg2: memref<3x768x512xbf16, #tpu.memory_space<vmem>>, %arg3: memref<12x1x512xf32, #tpu.memory_space<vmem>>, %arg4: memref<3x2x512xf32, #tpu.memory_space<vmem>>) attributes {dimension_semantics = [#tpu.dimension_semantics<parallel>], iteration_bounds = array<i64: 4>, scalar_prefetch = 0 : i64, scratch_operands = 0 : i64, tpu.core_type = #tpu.core_type<tc>, window_params = [{transform_indices = @transform_0, window_bounds = array<i64: 3, 2, 8, 768>}, {transform_indices = @transform_1, window_bounds = array<i64: 3, 768, 512>}, {pipeline_mode = #tpu.pipeline_mode<synchronous>, transform_indices = @transform_2, window_bounds = array<i64: 12, 1, 512>}, {transform_indices = @transform_3, window_bounds = array<i64: 3, 2, 512>}]} {
    %c0 = arith.constant 0 : index
    %c0_0 = arith.constant 0 : index
    %c0_1 = arith.constant 0 : index
    %c0_2 = arith.constant 0 : index
    %0 = vector.load %arg1[%c0, %c0_0, %c0_1, %c0_2] : memref<3x2x8x768xf32, #tpu.memory_space<vmem>>, vector<3x2x8x768xf32>
    %cst = arith.constant dense<0.000000e+00> : vector<3x2x768xf32>
    %1 = vector.multi_reduction <add>, %0, %cst [2] : vector<3x2x8x768xf32> to vector<3x2x768xf32>
    %cst_3 = arith.constant 1.250000e-01 : f32
    %2 = vector.broadcast %cst_3 : f32 to vector<3x2x768xf32>
    %3 = arith.mulf %1, %2 : vector<3x2x768xf32>
    %4 = arith.truncf %3 : vector<3x2x768xf32> to vector<3x2x768xbf16>
    %c0_4 = arith.constant 0 : index
    %c0_5 = arith.constant 0 : index
    %c0_6 = arith.constant 0 : index
    %5 = vector.load %arg2[%c0_4, %c0_5, %c0_6] : memref<3x768x512xbf16, #tpu.memory_space<vmem>>, vector<3x768x512xbf16>
    "tpu.trace_start"() <{level = 10 : i32, message = "gbi,gio->gbo"}> : () -> ()
    %cst_7 = arith.constant dense<0.000000e+00> : vector<3x2x512xf32>
    %6 = tpu.matmul %4, %5, %cst_7 {dimension_numbers = #tpu.dot_dimension_numbers<[2], [1], [1], [2], [0, 0, 0, 1, 1, 2], [0], [0]>} : vector<3x2x768xbf16>, vector<3x768x512xbf16>, vector<3x2x512xf32> -> vector<3x2x512xf32>
    "tpu.trace_stop"() : () -> ()
    %c3_i32 = arith.constant 3 : i32
    %7 = arith.muli %arg0, %c3_i32 : i32
    %8 = tpu.assume_multiple %7, 3 : i32
    %9 = arith.index_cast %8 : i32 to index
    %c0_8 = arith.constant 0 : index
    %c0_9 = arith.constant 0 : index
    %10 = vector.load %arg3[%9, %c0_8, %c0_9] : memref<12x1x512xf32, #tpu.memory_space<vmem>>, vector<3x1x512xf32>
    %11 = vector.broadcast %10 : vector<3x1x512xf32> to vector<3x2x512xf32>
    %12 = arith.addf %6, %11 : vector<3x2x512xf32>
    %c0_10 = arith.constant 0 : index
    %c0_11 = arith.constant 0 : index
    %c0_12 = arith.constant 0 : index
    %13 = vector.load %arg4[%c0_10, %c0_11, %c0_12] : memref<3x2x512xf32, #tpu.memory_space<vmem>>, vector<3x2x512xf32>
    tpu.vector_store %arg4[%c0_10, %c0_11, %c0_12], %12 {strides = array<i32>} : memref<3x2x512xf32, #tpu.memory_space<vmem>>, vector<3x2x512xf32>,
    return
  }
  func.func @transform_0(%arg0: i32) -> (i32, i32, i32, i32) {
    %c0_i32 = arith.constant 0 : i32
    %c0_i32_0 = arith.constant 0 : i32
    %c0_i32_1 = arith.constant 0 : i32
    %c0_i32_2 = arith.constant 0 : i32
    return %arg0, %c0_i32, %c0_i32_0, %c0_i32_1 : i32, i32, i32, i32
  }
  func.func @transform_1(%arg0: i32) -> (i32, i32, i32) {
    %c0_i32 = arith.constant 0 : i32
    %c0_i32_0 = arith.constant 0 : i32
    %c0_i32_1 = arith.constant 0 : i32
    return %arg0, %c0_i32, %c0_i32_0 : i32, i32, i32
  }
  func.func @transform_2(%arg0: i32) -> (i32, i32, i32) {
    %c0_i32 = arith.constant 0 : i32
    %c0_i32_0 = arith.constant 0 : i32
    %c0_i32_1 = arith.constant 0 : i32
    %c0_i32_2 = arith.constant 0 : i32
    return %c0_i32, %c0_i32_0, %c0_i32_1 : i32, i32, i32
  }
  func.func @transform_3(%arg0: i32) -> (i32, i32, i32) {
    %c0_i32 = arith.constant 0 : i32
    %c0_i32_0 = arith.constant 0 : i32
    %c0_i32_1 = arith.constant 0 : i32
    return %arg0, %c0_i32, %c0_i32_0 : i32, i32, i32
  }
}

</mosaic_0001>

<bundles_post_ra>
// kernel: multi_scale_forward.1
= control target key start
LH: loop header
LB: loop body
LE: loop exit
PB: predicated region body
PF: predicated region fallthrough
CT: control target
= control target key end

     0   :  { %8 = vsyncpa [#allocation3], 0  ;;  %s7809_s0 = inlined_call_operand.hbm [shape: f32[12,2,8,768], index: 0, kind: input, shape index: {}]   ;;  %s7810_s1 = inlined_call_operand.hbm [shape: bf16[12,768,512], index: 1, kind: input, shape index: {}]   ;;  %s7811_s2 = inlined_call_operand.vmem [shape: f32[12,1,512], index: 2, kind: input, shape index: {}]   ;;  %s7812_s3 = inlined_call_operand.hbm [shape: f32[12,2,512], index: 3, kind: output, shape index: {}]  }
   0x1   :  { %10 = vsyncpa [#allocation3 + $0x1], 0 }
   0x2   :  { %11 = vsyncpa [#allocation6], 0 }
   0x3   :  { %13 = vsyncpa [#allocation6 + $0x1], 0 }
   0x4   :  { %14 = vsyncpa [#allocation4], 0 }
   0x5   :  { %16 = vsyncpa [#allocation4 + $0x1], 0  ;;  %s6808_s12 = smov 0   ;;  %s6810_s13 = smov 0  }
   0x6   :  { %s6812_s14 = smov 0   ;;  %s6814_s15 = smov 0  }
   0x7 LB: > { %s6829_s16 = sadd.s32 4294967295, %s6776_s15   ;;  %s5130_s17 = sadd.s32 4294967294, %s6776_s15   ;;  %s6776_s15 = sphi %s6814_s15, %s7827_s15   ;;  %s6772_s14 = sphi %s6812_s14, %s7826_s14   ;;  %s6768_s13 = sphi %s6810_s13, %s7825_s13   ;;  %s6764_s12 = sphi %s6808_s12, %s7824_s12  }
   0x8   : > { %s6833_s18 = sadd.s32 1, %s6776_s15   ;;  %s29_s19 = sadd.s32 1, %s6772_s14 }
   0x9   : > { %s26_s20 = ssub.s32 %s6776_s15, %s6833_s18  ;;  %p36_p0 = scmp.ne.s32.totalorder %s6772_s14, %s6768_s13 }
   0xa   : > { %p27_p1 = scmp.eq.s32.totalorder %s26_s20, 0  ;;  %p37_p2 = scmp.eq.s32.totalorder %s6776_s15, 0 }
   0xb   : > { %p42_p3 = scmp.ne.s32.totalorder %s6768_s13, %s6764_s12  ;;  %p43_p4 = scmp.eq.s32.totalorder %s6829_s16, 0 }
   0xc   : > { %s6845_s21 = scalar_select %p27_p1, %s6772_s14, %s29_s19  }
   0xd   : > { %p38_p5 = por %p37_p2, %p36_p0  ;;  %p6847_p6 = por %p43_p4, %p42_p3 }
   0xe   : > { %p113_p7 = scmp.eq.s32.totalorder %s6829_s16, 3  ;;  %p119_p8 = scmp.eq.s32.totalorder %s5130_s17, 3 }
   0xf   : > { %s7815_s22 = scalar_select %p6847_p6, 1, 0 }
  0x10   : > { %p5744_p9 = scmp.lt.s32.totalorder %s6776_s15, 4  ;;  %p6853_p10 = por %p113_p7, %p36_p0 }
  0x11   : > { %p6857_p11 = por %p119_p8, %p42_p3  ;;  %s6862_s25 = sand.u32 1, %s6772_s14  }
  0x12   : > { %s7816_s23 = scalar_select %p6853_p10, 1, 0 }
  0x13   : > { %s7817_s24 = scalar_select %p6857_p11, 1, 0 }
  0x14   : > { %s5720_s26 = smul.u32 288, %s6862_s25  ;;  %p6866_p12 = pnand %p5744_p9, %p38_p5 }
  0x15   : > { %s5745_s27 = smul.u32 4608, %s6776_s15  ;;  %s143_s7 = scalar_lea.sflag [#allocation3], %s6862_s25 }
  0x16   : > { %s146_s5 = scalar_lea.vmem [#allocation2], %s5720_s26  ;;  %p6654_p1 = pneg %p6866_p12 }
  0x17   : > { %s6873_s4 = scalar_lea.hbm %s7809_s0, %s5745_s27  ;;  %s154_s6 = sshll.u32 %s146_s5, 4  ;;  %s6875_s6 = int_to_ptr.vmem [resolvable:$true] %s154_s6 }
  0x18   : > { %s6652_s8 = scalar_lea.hbm %s6873_s4, 4608  ;;  %s6657_s11 = scalar_lea.hbm %s7809_s0, 18432 }
  0x19   : > { %p6653_p0 = scmp.ne.s32.totalorder %s6873_s4, %s6652_s8  ;;  %p6658_p4 = scmp.lt.s32.totalorder %s6873_s4, %s7809_s0 }
  0x1a   : > { %p6659_p5 = scmp.lt.s32.totalorder %s6657_s11, %s6652_s8 }
  0x1b   : > { %p6655_p2 = pnand %p6654_p1, %p6653_p0 }
  0x1c   : > { %p6660_p7 = por %p6659_p5, %p6658_p4 }
  0x1d   : > { %p6656_p3 = pneg %p6655_p2 }
  0x1f   : > { %p6661_p8 = pnand %p6660_p7, %p6656_p3 }
  0x21   : > { %6664 = shalt.err (!%p6661_p8)
}
  0x22   : > { %s6665_s20 = scalar_lea.vmem %s6875_s6, 4608  ;;  %s6778_s26 = smov [#allocation2]  }
  0x23   : > { %p6666_p9 = scmp.ne.s32.totalorder %s6875_s6, %s6665_s20  ;;  %s6670_s27 = sshll.u32 %s6778_s26, 4  ;;  %s6671_s27 = int_to_ptr.vmem [resolvable:$false] %s6670_s27 }
  0x24   : > { %s6672_s29 = scalar_lea.vmem %s6671_s27, 9216  ;;  %p6673_p13 = scmp.lt.s32.totalorder %s6875_s6, %s6671_s27 }
  0x25   : > { %p6668_p0 = pnand %p6666_p9, %p6654_p1  ;;  %p6674_p11 = scmp.lt.s32.totalorder %s6672_s29, %s6665_s20 }
  0x27   : > { %p6669_p2 = pneg %p6668_p0  ;;  %p6675_p10 = por %p6674_p11, %p6673_p13 }
  0x29   : > { %p6676_p4 = pnand %p6675_p10, %p6669_p2 }
  0x2b   : > { %6679 = shalt.err (!%p6676_p4)
}
  0x2c   : > { %s6779_s30 = smov 768   ;;  %s6780_s5 = smov 48  }
  0x2d   : > { %5736 = dma.hbm_to_vmem [thread:$0]  (!%p6866_p12), %s6873_s4, 4608, %s6875_s6, %s143_s7, %s6779_s30, %s6779_s30, %s6780_s5  }
  0x2e   : > { %p184_p3 = scmp.lt.s32.totalorder %s6776_s15, 5  ;;  %s5722_s8 = smul.u32 4608, %s6862_s25 }
  0x2f   : > { %p7819_p11 = scmp.ge.s32.totalorder %s6776_s15, 1  ;;  %s5746_s10 = smul.u32 73728, %s6776_s15 }
  0x30   : > { %s168_s20 = scalar_lea.vmem [#allocation5], %s5722_s8  ;;  %s165_s4 = scalar_lea.sflag [#allocation6], %s6862_s25 }
  0x31   : > { %p6909_p10 = pnand %p7819_p11, %p184_p3  ;;  %s6917_s19 = scalar_lea.hbm %s7810_s1, %s5746_s10 }
  0x32   : > { %s176_s26 = sshll.u32 %s168_s20, 4  ;;  %s6680_s6 = scalar_lea.hbm %s6917_s19, 73728  ;;  %s6919_s26 = int_to_ptr.vmem [resolvable:$true] %s176_s26 }
  0x33   : > { %p6681_p13 = scmp.ne.s32.totalorder %s6917_s19, %s6680_s6  ;;  %s6685_s29 = scalar_lea.hbm %s7810_s1, 294912 }
  0x34   : > { %p6686_p8 = scmp.lt.s32.totalorder %s6917_s19, %s7810_s1  ;;  %p6687_p9 = scmp.lt.s32.totalorder %s6685_s29, %s6680_s6 }
  0x35   : > { %p6683_p5 = pnand %p6681_p13, %p6654_p1 }
  0x36   : > { %p6688_p0 = por %p6687_p9, %p6686_p8 }
  0x37   : > { %p6684_p7 = pneg %p6683_p5 }
  0x39   : > { %p6689_p2 = pnand %p6688_p0, %p6684_p7 }
  0x3b   : > { %6692 = shalt.err (!%p6689_p2)
}
  0x3c   : > { %s6693_s8 = scalar_lea.vmem %s6919_s26, 73728  ;;  %s6781_s10 = smov [#allocation5]  }
  0x3d   : > { %p6694_p4 = scmp.ne.s32.totalorder %s6919_s26, %s6693_s8  ;;  %s6698_s11 = sshll.u32 %s6781_s10, 4  ;;  %s6699_s11 = int_to_ptr.vmem [resolvable:$false] %s6698_s11 }
  0x3e   : > { %s6700_s17 = scalar_lea.vmem %s6699_s11, 147456  ;;  %p6701_p13 = scmp.lt.s32.totalorder %s6919_s26, %s6699_s11 }
  0x3f   : > { %p6696_p3 = pnand %p6694_p4, %p6654_p1  ;;  %p6702_p5 = scmp.lt.s32.totalorder %s6700_s17, %s6693_s8 }
  0x41   : > { %p6697_p11 = pneg %p6696_p3  ;;  %p6703_p6 = por %p6702_p5, %p6701_p13 }
  0x43   : > { %p6704_p8 = pnand %p6703_p6, %p6697_p11 }
  0x45   : > { %6707 = shalt.err (!%p6704_p8)
}
  0x46   : > { %s6782_s20 = smov 256   ;;  %s6783_s6 = smov 16  }
  0x47   : > { %5739 = dma.hbm_to_vmem [thread:$0]  (!%p6866_p12), %s6917_s19, 73728, %s6919_s26, %s165_s4, %s6782_s20, %s6782_s20, %s6783_s6  }
  0x48   : > { %188 = sbr.rel (%p6909_p10) target bundleno = 878 (0x36e), region = 32  ;;  %s6949_s7 = sand.u32 (!%p6909_p10), 1, %s6768_s13  }
  0x49   : > { %s5724_s27 = smul.u32 (!%p6909_p10), 288, %s6949_s7  ;;  %s191_s29 = scalar_lea.sflag (!%p6909_p10), [#allocation3], %s6949_s7 }
  0x4a   : > { %p7821_p6 = scmp.ne.s32.totalorder (!%p6909_p10), %s7815_s22, 0 }
  0x4b   : > { %s6953_s30 = scalar_lea.vmem (!%p6909_p10), [#allocation2], %s5724_s27 }
  0x4d   : > { %6751 = dma.done.wait (%p7821_p6), %s191_s29, 4608  }
  0x4e   : > { %6753 = vsyncadd (%p7821_p6), %s191_s29, 4294962688  ;;  %s5725_s25 = smul.u32 4608, %s6949_s7  ;;  %s200_s28 = scalar_lea.sflag [#allocation6], %s6949_s7 }
  0x50   : > { %s6961_s9 = scalar_lea.vmem [#allocation5], %s5725_s25 }
  0x51   : > { %6755 = dma.done.wait (%p7821_p6), %s200_s28, 73728  }
  0x52   : > { %6757 = vsyncadd (%p7821_p6), %s200_s28, 4294893568  ;;  %v5787_v0 = vld [vmem:[%s6961_s9 + $0xe4] ss:$16 sps:$4 sm:$0xff]   ;;  %v5791_v2 = vld [vmem:[%s6961_s9 + $0xe0] ss:$16 sps:$4 sm:$0xff]   ;;  %vm1227_vm0 = vcmask 1041409  }
  0x53   : > { %v5789_v1 = vld [vmem:[%s6961_s9 + $0x2e4] ss:$16 sps:$4 sm:$0xff]   ;;  %2206 = vmatprep.subr.bf16.mxu0 %v5787_v0  ;;  %v5792_v3 = vld [vmem:[%s6961_s9 + $0x2e0] ss:$16 sps:$4 sm:$0xff]   ;;  %v235_v48 = vld [vmem:[%s6953_s30 + $0x8] sm:$0xff]  ;;  %s5136_s22 = smul.u32 12, %s6829_s16 }
  0x54   : > { %2247 = vmatprep.subr.bf16.mxu1 %v5789_v1  ;;  %v5793_v4 = vld [vmem:[%s6961_s9 + $0xc4] ss:$16 sps:$4 sm:$0xff]   ;;  %2207 = vmatpush1.bf16.msra.mxu0 %v5791_v2  ;;  %v5797_v6 = vld [vmem:[%s6961_s9 + $0xc0] ss:$16 sps:$4 sm:$0xff]   ;;  %v241_v51 = vld [vmem:[%s6953_s30 + $0x38] sm:$0xff]  ;;  %v276_v52 = vrot.slane %v235_v48, 4 }
  0x55   : > { %2248 = vmatpush1.bf16.msra.mxu1 %v5792_v3  ;;  %v5795_v5 = vld [vmem:[%s6961_s9 + $0x2c4] ss:$16 sps:$4 sm:$0xff]   ;;  %2208 = vmatprep.subr.bf16.mxu0 %v5793_v4  ;;  %v5798_v7 = vld [vmem:[%s6961_s9 + $0x2c0] ss:$16 sps:$4 sm:$0xff]   ;;  %v237_v53 = vld [vmem:[%s6953_s30 + $0x18] sm:$0xff]  ;;  %v312_v55 = vrot.slane %v241_v51, 4  ;;  %s7279_s4 = scalar_lea.vmem %s7811_s2, %s5136_s22 }
  0x56   : > { %2249 = vmatprep.subr.bf16.mxu1 %v5795_v5  ;;  %v5799_v8 = vld [vmem:[%s6961_s9 + $0xa4] ss:$16 sps:$4 sm:$0xff]   ;;  %v5803_v10 = vld [vmem:[%s6961_s9 + $0xa0] ss:$16 sps:$4 sm:$0xff]   ;;  %v243_v54 = vld [vmem:[%s6953_s30 + $0x48] sm:$0xff]  ;;  %v288_v56 = vrot.slane %v237_v53, 4  ;;  %v277_v61 = vadd.f32 %v276_v52, %v235_v48 }
  0x57   : > { %v5801_v9 = vld [vmem:[%s6961_s9 + $0x2a4] ss:$16 sps:$4 sm:$0xff]   ;;  %v5804_v11 = vld [vmem:[%s6961_s9 + $0x2a0] ss:$16 sps:$4 sm:$0xff]   ;;  %v324_v57 = vrot.slane %v243_v54, 4  ;;  %v313_v3 = vadd.f32 %v312_v55, %v241_v51  ;;  %s5726_s5 = smul.u32 24, %s6949_s7 }
  0x58   : > { %2209 = vmatpush1.bf16.msra.mxu0 %v5797_v6  ;;  %v5805_v12 = vld [vmem:[%s6961_s9 + $0x84] ss:$16 sps:$4 sm:$0xff]   ;;  %v5809_v14 = vld [vmem:[%s6961_s9 + $0x80] ss:$16 sps:$4 sm:$0xff]   ;;  %v289_v4 = vadd.f32 %v288_v56, %v237_v53  ;;  %s5719_s11 = smul.u32 384, %s6829_s16  ;;  %s5018_s27 = scalar_lea.sflag [#allocation4], %s6949_s7 }
  0x59   : > { %2250 = vmatpush1.bf16.msra.mxu1 %v5798_v7  ;;  %2210 = vmatprep.subr.bf16.mxu0 %v5799_v8  ;;  %v5807_v13 = vld [vmem:[%s6961_s9 + $0x284] ss:$16 sps:$4 sm:$0xff]   ;;  %v5810_v15 = vld [vmem:[%s6961_s9 + $0x280] ss:$16 sps:$4 sm:$0xff]   ;;  %v325_v5 = vadd.f32 %v324_v57, %v243_v54  ;;  %s7510_s8 = scalar_lea.vmem [#allocation7], %s5726_s5  ;;  %p7822_p1 = scmp.ne.s32.totalorder %s7816_s23, 0 }
  0x5a   : > { %2251 = vmatprep.subr.bf16.mxu1 %v5801_v9  ;;  %v5811_v16 = vld [vmem:[%s6961_s9 + $0x64] ss:$16 sps:$4 sm:$0xff]   ;;  %v5815_v18 = vld [vmem:[%s6961_s9 + $0x60] ss:$16 sps:$4 sm:$0xff]   ;;  %v278_v9 = vrot.slane %v277_v61, 2  ;;  %s5032_s10 = sshll.u32 %s7510_s8, 4  ;;  %s7766_s6 = scalar_lea.hbm %s7812_s3, %s5719_s11  ;;  %s7759_s10 = int_to_ptr.vmem [resolvable:$true] %s5032_s10 }
  0x5b   : > { %v5813_v17 = vld [vmem:[%s6961_s9 + $0x264] ss:$16 sps:$4 sm:$0xff]   ;;  %v5816_v19 = vld [vmem:[%s6961_s9 + $0x260] ss:$16 sps:$4 sm:$0xff]   ;;  %s6708_s29 = scalar_lea.vmem %s7759_s10, 384  ;;  %s6785_s16 = smov [#allocation7]  }
  0x5c   : > { %2211 = vmatpush1.bf16.msra.mxu0 %v5803_v10  ;;  %v5817_v20 = vld [vmem:[%s6961_s9 + $0x44] ss:$16 sps:$4 sm:$0xff]   ;;  %v5821_v22 = vld [vmem:[%s6961_s9 + $0x40] ss:$16 sps:$4 sm:$0xff]   ;;  %p6709_p12 = scmp.ne.s32.totalorder %s7759_s10, %s6708_s29 }
  0x5d   : > { %2252 = vmatpush1.bf16.msra.mxu1 %v5804_v11  ;;  %2212 = vmatprep.subr.bf16.mxu0 %v5805_v12  ;;  %v5819_v21 = vld [vmem:[%s6961_s9 + $0x244] ss:$16 sps:$4 sm:$0xff]   ;;  %v5822_v23 = vld [vmem:[%s6961_s9 + $0x240] ss:$16 sps:$4 sm:$0xff]  }
  0x5e   : > { %2253 = vmatprep.subr.bf16.mxu1 %v5807_v13  ;;  %v5823_v24 = vld [vmem:[%s6961_s9 + $0x24] ss:$16 sps:$4 sm:$0xff]   ;;  %v5827_v26 = vld [vmem:[%s6961_s9 + $0x20] ss:$16 sps:$4 sm:$0xff]   ;;  %v314_v13 = vrot.slane %v313_v3, 2  ;;  %p6710_p10 = pnand %p6709_p12, %p7822_p1 }
  0x5f   : > { %v5825_v25 = vld [vmem:[%s6961_s9 + $0x224] ss:$16 sps:$4 sm:$0xff]   ;;  %v5828_v27 = vld [vmem:[%s6961_s9 + $0x220] ss:$16 sps:$4 sm:$0xff]  }
  0x60   : > { %2213 = vmatpush1.bf16.msra.mxu0 %v5809_v14  ;;  %v5829_v28 = vld [vmem:[%s6961_s9 + $0x4] ss:$16 sps:$4 sm:$0xff]   ;;  %v5833_v30 = vld [vmem:[%s6961_s9] ss:$16 sps:$4 sm:$0xff]   ;;  %v290_v14 = vrot.slane %v289_v4, 2  ;;  %p6711_p7 = pneg %p6710_p10 }
  0x61   : > { %2254 = vmatpush1.bf16.msra.mxu1 %v5810_v15  ;;  %2214 = vmatprep.subr.bf16.mxu0 %v5811_v16  ;;  %v5831_v29 = vld [vmem:[%s6961_s9 + $0x204] ss:$16 sps:$4 sm:$0xff]   ;;  %v5834_v31 = vld [vmem:[%s6961_s9 + $0x200] ss:$16 sps:$4 sm:$0xff]   ;;  %v326_v15 = vrot.slane %v325_v5, 2 }
  0x62   : > { %2255 = vmatprep.subr.bf16.mxu1 %v5813_v17  ;;  %v5835_v32 = vld [vmem:[%s6961_s9 + $0x1e4] ss:$16 sps:$4 sm:$0xff]   ;;  %v5839_v34 = vld [vmem:[%s6961_s9 + $0x1e0] ss:$16 sps:$4 sm:$0xff]  }
  0x63   : > { %v5837_v33 = vld [vmem:[%s6961_s9 + $0x3e4] ss:$16 sps:$4 sm:$0xff]   ;;  %v5840_v35 = vld [vmem:[%s6961_s9 + $0x3e0] ss:$16 sps:$4 sm:$0xff]  }
  0x64   : > { %2215 = vmatpush1.bf16.msra.mxu0 %v5815_v18  ;;  %v5841_v36 = vld [vmem:[%s6961_s9 + $0x1c4] ss:$16 sps:$4 sm:$0xff]   ;;  %v5845_v38 = vld [vmem:[%s6961_s9 + $0x1c0] ss:$16 sps:$4 sm:$0xff]   ;;  %v279_v18 = vadd.f32 %v278_v9, %v277_v61 }
  0x65   : > { %2256 = vmatpush1.bf16.msra.mxu1 %v5816_v19  ;;  %2216 = vmatprep.subr.bf16.mxu0 %v5817_v20  ;;  %v5843_v37 = vld [vmem:[%s6961_s9 + $0x3c4] ss:$16 sps:$4 sm:$0xff]   ;;  %v5846_v39 = vld [vmem:[%s6961_s9 + $0x3c0] ss:$16 sps:$4 sm:$0xff]  }
  0x66   : > { %2257 = vmatprep.subr.bf16.mxu1 %v5819_v21  ;;  %v5847_v40 = vld [vmem:[%s6961_s9 + $0x1a4] ss:$16 sps:$4 sm:$0xff]   ;;  %v5851_v42 = vld [vmem:[%s6961_s9 + $0x1a0] ss:$16 sps:$4 sm:$0xff]  }
  0x67   : > { %v5849_v41 = vld [vmem:[%s6961_s9 + $0x3a4] ss:$16 sps:$4 sm:$0xff]   ;;  %v5852_v43 = vld [vmem:[%s6961_s9 + $0x3a0] ss:$16 sps:$4 sm:$0xff]  }
  0x68   : > { %2217 = vmatpush1.bf16.msra.mxu0 %v5821_v22  ;;  %v5853_v44 = vld [vmem:[%s6961_s9 + $0x184] ss:$16 sps:$4 sm:$0xff]   ;;  %v5857_v46 = vld [vmem:[%s6961_s9 + $0x180] ss:$16 sps:$4 sm:$0xff]   ;;  %v315_v22 = vadd.f32 %v314_v13, %v313_v3 }
  0x69   : > { %2258 = vmatpush1.bf16.msra.mxu1 %v5822_v23  ;;  %2218 = vmatprep.subr.bf16.mxu0 %v5823_v24  ;;  %v5855_v45 = vld [vmem:[%s6961_s9 + $0x384] ss:$16 sps:$4 sm:$0xff]   ;;  %v5858_v47 = vld [vmem:[%s6961_s9 + $0x380] ss:$16 sps:$4 sm:$0xff]   ;;  %v291_v23 = vadd.f32 %v290_v14, %v289_v4  ;;  %v327_v24 = vadd.f32 %v326_v15, %v325_v5 }
  0x6a   : > { %2259 = vmatprep.subr.bf16.mxu1 %v5825_v25  ;;  %v5859_v49 = vld [vmem:[%s6961_s9 + $0x164] ss:$16 sps:$4 sm:$0xff]   ;;  %v5863_v2 = vld [vmem:[%s6961_s9 + $0x160] ss:$16 sps:$4 sm:$0xff]  }
  0x6b   : > { %v5861_v50 = vld [vmem:[%s6961_s9 + $0x364] ss:$16 sps:$4 sm:$0xff]   ;;  %v5864_v7 = vld [vmem:[%s6961_s9 + $0x360] ss:$16 sps:$4 sm:$0xff]  }
  0x6c   : > { %2219 = vmatpush1.bf16.msra.mxu0 %v5827_v26  ;;  %v234_v58 = vld [vmem:[%s6953_s30] sm:$0xff]  ;;  %v240_v59 = vld [vmem:[%s6953_s30 + $0x30] sm:$0xff] }
  0x6d   : > { %2260 = vmatpush1.bf16.msra.mxu1 %v5828_v27  ;;  %2220 = vmatprep.subr.bf16.mxu0 %v5829_v28  ;;  %v236_v60 = vld [vmem:[%s6953_s30 + $0x10] sm:$0xff]  ;;  %v270_v62 = vrot.slane %v234_v58, 4  ;;  %v306_v63 = vrot.slane %v240_v59, 4  ;;  %v242_v0 = vld [vmem:[%s6953_s30 + $0x40] sm:$0xff]  ;;  %v280_v28 = vrot.slane %v279_v18, 1 }
  0x6e   : > { %2261 = vmatprep.subr.bf16.mxu1 %v5831_v29  ;;  %v282_v1 = vrot.slane %v236_v60, 4  ;;  %v318_v6 = vrot.slane %v242_v0, 4  ;;  %v5865_v8 = vld [vmem:[%s6961_s9 + $0x144] ss:$16 sps:$4 sm:$0xff]   ;;  %v5869_v26 = vld [vmem:[%s6961_s9 + $0x140] ss:$16 sps:$4 sm:$0xff]  }
  0x6f   : > { %v271_v10 = vadd.f32 %v270_v62, %v234_v58  ;;  %v307_v11 = vadd.f32 %v306_v63, %v240_v59  ;;  %v5867_v17 = vld [vmem:[%s6961_s9 + $0x344] ss:$16 sps:$4 sm:$0xff]   ;;  %v5870_v27 = vld [vmem:[%s6961_s9 + $0x340] ss:$16 sps:$4 sm:$0xff]  }
  0x70   : > { %2221 = vmatpush1.bf16.msra.mxu0 %v5833_v30  ;;  %v283_v12 = vadd.f32 %v282_v1, %v236_v60  ;;  %v319_v16 = vadd.f32 %v318_v6, %v242_v0  ;;  %v5877_v52 = vld [vmem:[%s6961_s9 + $0x104] ss:$16 sps:$4 sm:$0xff]  }
  0x71   : > { %2262 = vmatpush1.bf16.msra.mxu1 %v5834_v31  ;;  %2222 = vmatprep.subr.bf16.mxu0 %v5835_v32  ;;  %v272_v19 = vrot.slane %v271_v10, 2  ;;  %v308_v20 = vrot.slane %v307_v11, 2  ;;  %v5871_v32 = vld [vmem:[%s6961_s9 + $0x124] ss:$16 sps:$4 sm:$0xff]  }
  0x72   : > { %2263 = vmatprep.subr.bf16.mxu1 %v5837_v33  ;;  %v284_v21 = vrot.slane %v283_v12, 2  ;;  %v320_v25 = vrot.slane %v319_v16, 2  ;;  %v316_v33 = vrot.slane %v315_v22, 1  ;;  %v5879_v57 = vld [vmem:[%s6961_s9 + $0x304] ss:$16 sps:$4 sm:$0xff]  }
  0x73   : > { %v273_v29 = vadd.f32 %v272_v19, %v271_v10  ;;  %v309_v30 = vadd.f32 %v308_v20, %v307_v11  ;;  %v5888_v19 = vld [vmem:[%s6961_s9 + $0xec] ss:$16 sps:$4 sm:$0xff]  }
  0x74   : > { %2223 = vmatpush2.bf16.msra.mxu0 %v5839_v34  ;;  %v285_v31 = vadd.f32 %v284_v21, %v283_v12  ;;  %v292_v34 = vrot.slane %v291_v23, 1 }
  0x75   : > { %2264 = vmatpush2.bf16.msra.mxu1 %v5840_v35  ;;  %2224 = vmatprep.subr.bf16.mxu0 %v5841_v36  ;;  %v328_v35 = vrot.slane %v327_v24, 1  ;;  %v321_v36 = vadd.f32 %v320_v25, %v319_v16 }
  0x76   : > { %2265 = vmatprep.subr.bf16.mxu1 %v5843_v37  ;;  %v5873_v37 = vld [vmem:[%s6961_s9 + $0x324] ss:$16 sps:$4 sm:$0xff]  }
  0x78   : > { %2225 = vmatpush2.bf16.msra.mxu0 %v5845_v38  ;;  %v281_v38 = vadd.f32 %v280_v28, %v279_v18  ;;  %v5885_v18 = vld [vmem:[%s6961_s9 + $0x4e4] ss:$16 sps:$4 sm:$0xff]  }
  0x79   : > { %2266 = vmatpush2.bf16.msra.mxu1 %v5846_v39  ;;  %2226 = vmatprep.subr.bf16.mxu0 %v5847_v40  ;;  %v274_v39 = vrot.slane %v273_v29, 1  ;;  %v310_v40 = vrot.slane %v309_v30, 1  ;;  %v5891_v28 = vld [vmem:[%s6961_s9 + $0x4c4] ss:$16 sps:$4 sm:$0xff]  }
  0x7a   : > { %2267 = vmatprep.subr.bf16.mxu1 %v5849_v41  ;;  %v286_v41 = vrot.slane %v285_v31, 1  ;;  %v487_v48 = vmul.f32 0.125, %v281_v38  ;;  %v5901_v38 = vld [vmem:[%s6961_s9 + $0x480] ss:$16 sps:$4 sm:$0xff]  }
  0x7c   : > { %2227 = vmatpush2.bf16.msra.mxu0 %v5851_v42  ;;  %v317_v42 = vadd.f32 %v316_v33, %v315_v22  ;;  %v287_v51 = vadd.f32 %v286_v41, %v285_v31  ;;  %v523_v58 = vpack.c.bf16 %v487_v48, %v487_v48  ;;  %v5892_v31 = vld [vmem:[%s6961_s9 + $0xc8] ss:$16 sps:$4 sm:$0xff]   ;;  %v5900_v33 = vld [vmem:[%s6961_s9 + $0xac] ss:$16 sps:$4 sm:$0xff]   ;;  %v5921_v48 = vld [vmem:[%s6961_s9 + $0x424] ss:$16 sps:$4 sm:$0xff]  }
  0x7d   : > { %2268 = vmatpush2.bf16.msra.mxu1 %v5852_v43  ;;  %2228 = vmatprep.subr.bf16.mxu0 %v5853_v44  ;;  %v293_v43 = vadd.f32 %v292_v34, %v291_v23  ;;  %v329_v44 = vadd.f32 %v328_v35, %v327_v24  ;;  %v5883_v23 = vld [vmem:[%s6961_s9 + $0x4e0] ss:$16 sps:$4 sm:$0xff]   ;;  %v5898_v35 = vld [vmem:[%s6961_s9 + $0xa8] ss:$16 sps:$4 sm:$0xff]   ;;  %v5912_v41 = vld [vmem:[%s6961_s9 + $0x6c] ss:$16 sps:$4 sm:$0xff]  }
  0x7e   : > { %2269 = vmatprep.subr.bf16.mxu1 %v5855_v45  ;;  %v322_v45 = vrot.slane %v321_v36, 1  ;;  %v493_v53 = vmul.f32 0.125, %v317_v42  ;;  %v488_v61 = vmul.f32 0.125, %v287_v51  ;;  %v1216_v3 = vunpack.c.l.b16 %v523_v58  ;;  %v5895_v34 = vld [vmem:[%s6961_s9 + $0x4a0] ss:$16 sps:$4 sm:$0xff]  }
  0x7f   : > { %v489_v54 = vmul.f32 0.125, %v293_v43  ;;  %v495_v55 = vmul.f32 0.125, %v329_v44  ;;  %v5907_v42 = vld [vmem:[%s6961_s9 + $0x460] ss:$16 sps:$4 sm:$0xff]   ;;  %v5910_v43 = vld [vmem:[%s6961_s9 + $0x68] ss:$16 sps:$4 sm:$0xff]  }
  0x80   : > { %2229 = vmatpush2.bf16.msra.mxu0 %v5857_v46  ;;  %v5875_v46 = vld [vmem:[%s6961_s9 + $0x120] ss:$16 sps:$4 sm:$0xff]   ;;  %v323_v56 = vadd.f32 %v322_v45, %v321_v36  ;;  %v529_v62 = vpack.c.bf16 %v493_v53, %v493_v53  ;;  %v524_v6 = vpack.c.bf16 %v488_v61, %v488_v61  ;;  %v5903_v36 = vld [vmem:[%s6961_s9 + $0x484] ss:$16 sps:$4 sm:$0xff]   ;;  %v5918_v45 = vld [vmem:[%s6961_s9 + $0x4c] ss:$16 sps:$4 sm:$0xff]  }
  0x81   : > { %2270 = vmatpush2.bf16.msra.mxu1 %v5858_v47  ;;  %2230 = vmatprep.subr.bf16.mxu0 %v5859_v49  ;;  %v5876_v47 = vld [vmem:[%s6961_s9 + $0x320] ss:$16 sps:$4 sm:$0xff]   ;;  %v275_v49 = vadd.f32 %v274_v39, %v273_v29  ;;  %v525_v63 = vpack.c.bf16 %v489_v54, %v489_v54  ;;  %v531_v0 = vpack.c.bf16 %v495_v55, %v495_v55  ;;  %v5894_v29 = vld [vmem:[%s6961_s9 + $0xcc] ss:$16 sps:$4 sm:$0xff]   ;;  %v5904_v39 = vld [vmem:[%s6961_s9 + $0x88] ss:$16 sps:$4 sm:$0xff]  }
  0x82   : > { %2271 = vmatprep.subr.bf16.mxu1 %v5861_v50  ;;  %v311_v50 = vadd.f32 %v310_v40, %v309_v30  ;;  %v494_v1 = vmul.f32 0.125, %v323_v56  ;;  %v1217_v14 = vunpack.c.l.b16 %v524_v6  ;;  %v5889_v30 = vld [vmem:[%s6961_s9 + $0x4c0] ss:$16 sps:$4 sm:$0xff]   ;;  %v5909_v40 = vld [vmem:[%s6961_s9 + $0x464] ss:$16 sps:$4 sm:$0xff]   ;;  %v239_v54 = vld [vmem:[%s6953_s30 + $0x28] sm:$0xff] }
  0x83   : > { %v486_v59 = vmul.f32 0.125, %v275_v49  ;;  %v1218_v9 = vunpack.c.l.b16 %v525_v63  ;;  %v1224_v10 = vunpack.c.l.b16 %v531_v0  ;;  %v5915_v44 = vld [vmem:[%s6961_s9 + $0x444] ss:$16 sps:$4 sm:$0xff]   ;;  %v5924_v49 = vld [vmem:[%s6961_s9 + $0x2c] ss:$16 sps:$4 sm:$0xff]   ;;  %v300_v56 = vrot.slane %v239_v54, 4 }
  0x84   : > { %2231 = vmatpush2.bf16.msra.mxu0 %v5863_v2  ;;  %v492_v60 = vmul.f32 0.125, %v311_v50  ;;  %v5881_v2 = vld [vmem:[%s6961_s9 + $0x100] ss:$16 sps:$4 sm:$0xff]   ;;  %v530_v11 = vpack.c.bf16 %v494_v1, %v494_v1  ;;  %v5922_v51 = vld [vmem:[%s6961_s9 + $0x28] ss:$16 sps:$4 sm:$0xff]  }
  0x85   : > { %2272 = vmatpush2.bf16.msra.mxu1 %v5864_v7  ;;  %2232 = vmatprep.subr.bf16.mxu0 %v5865_v8  ;;  %v522_v4 = vpack.c.bf16 %v486_v59, %v486_v59  ;;  %v5882_v7 = vld [vmem:[%s6961_s9 + $0x300] ss:$16 sps:$4 sm:$0xff]   ;;  %v1222_v8 = vunpack.c.l.b16 %v529_v62  ;;  %v1231_v16 = vsel %vm1227_vm0, %v1224_v10, %v1218_v9  ;;  %v5930_v53 = vld [vmem:[%s6961_s9 + $0xc] ss:$16 sps:$4 sm:$0xff]   ;;  %v5928_v63 = vld [vmem:[%s6961_s9 + $0x8] ss:$16 sps:$4 sm:$0xff]   ;;  %v301_v0 = vadd.f32 %v300_v56, %v239_v54 }
  0x86   : > { %2273 = vmatprep.subr.bf16.mxu1 %v5867_v17  ;;  %v528_v5 = vpack.c.bf16 %v492_v60, %v492_v60  ;;  %v1223_v17 = vunpack.c.l.b16 %v530_v11  ;;  %v7043_v21 = vpack.c.b16 %v1231_v16, %v1231_v16  ;;  %v5919_v50 = vld [vmem:[%s6961_s9 + $0x420] ss:$16 sps:$4 sm:$0xff]   ;;  %v245_v55 = vld [vmem:[%s6953_s30 + $0x58] sm:$0xff]  ;;  %v5933_v1 = vld [vmem:[%s6961_s9 + $0x5e4] ss:$16 sps:$4 sm:$0xff]  }
  0x87   : > { %v1215_v12 = vunpack.c.l.b16 %v522_v4  ;;  %v1229_v15 = vsel %vm1227_vm0, %v1222_v8, %v1216_v3  ;;  %v244_v58 = vld [vmem:[%s6953_s30 + $0x50] sm:$0xff]  ;;  %v336_v59 = vrot.slane %v245_v55, 4  ;;  %v5934_v9 = vld [vmem:[%s6961_s9 + $0x1e8] ss:$16 sps:$4 sm:$0xff]   ;;  %v5966_v54 = vld [vmem:[%s6961_s9 + $0x14c] ss:$16 sps:$4 sm:$0xff]  }
  0x88   : > { %2233 = vmatpush2.bf16.msra.mxu0 %v5869_v26  ;;  %v1221_v13 = vunpack.c.l.b16 %v528_v5  ;;  %v1235_v20 = vpack.c.b16 %v1229_v15, %v1229_v15  ;;  %v1230_v25 = vsel %vm1227_vm0, %v1223_v17, %v1217_v14  ;;  %v5886_v26 = vld [vmem:[%s6961_s9 + $0xe8] ss:$16 sps:$4 sm:$0xff]   ;;  %2279 = vmatprep.mubr.bf16.mxu1 %v7043_v21  ;;  %v330_v61 = vrot.slane %v244_v58, 4  ;;  %v5925_v62 = vld [vmem:[%s6961_s9 + $0x400] ss:$16 sps:$4 sm:$0xff]  }
  0x89   : > { %2274 = vmatpush2.bf16.msra.mxu1 %v5870_v27  ;;  %2234 = vmatprep.subr.bf16.mxu0 %v5871_v32  ;;  %v7052_v27 = vpack.c.b16 %v1230_v25, %v1230_v25  ;;  %v5897_v32 = vld [vmem:[%s6961_s9 + $0x4a4] ss:$16 sps:$4 sm:$0xff]   ;;  %v337_v3 = vadd.f32 %v336_v59, %v245_v55  ;;  %v5931_v6 = vld [vmem:[%s6961_s9 + $0x5e0] ss:$16 sps:$4 sm:$0xff]   ;;  %v5942_v14 = vld [vmem:[%s6961_s9 + $0x1cc] ss:$16 sps:$4 sm:$0xff]  }
  0x8a   : > { %2275 = vmatprep.subr.bf16.mxu1 %v5873_v37  ;;  %v1228_v22 = vsel %vm1227_vm0, %v1221_v13, %v1215_v12  ;;  %2238 = vmatprep.mubr.bf16.mxu0 %v1235_v20  ;;  %v5906_v37 = vld [vmem:[%s6961_s9 + $0x8c] ss:$16 sps:$4 sm:$0xff]   ;;  %v331_v5 = vadd.f32 %v330_v61, %v244_v58  ;;  %v5939_v13 = vld [vmem:[%s6961_s9 + $0x5c4] ss:$16 sps:$4 sm:$0xff]   ;;  %v5961_v55 = vld [vmem:[%s6961_s9 + $0x540] ss:$16 sps:$4 sm:$0xff]  }
  0x8b   : > { %v7047_v24 = vpack.c.b16 %v1228_v22, %v1228_v22  ;;  %v338_v8 = vrot.slane %v337_v3, 2  ;;  %v5945_v25 = vld [vmem:[%s6961_s9 + $0x5a4] ss:$16 sps:$4 sm:$0xff]   ;;  %v5964_v56 = vld [vmem:[%s6961_s9 + $0x148] ss:$16 sps:$4 sm:$0xff]  }
  0x8c   : > { %2235 = vmatpush2.bf16.msra.mxu0 %v5875_v46  ;;  %v5913_v46 = vld [vmem:[%s6961_s9 + $0x440] ss:$16 sps:$4 sm:$0xff]   ;;  %v332_v12 = vrot.slane %v331_v5, 2  ;;  %v5969_v59 = vld [vmem:[%s6961_s9 + $0x524] ss:$16 sps:$4 sm:$0xff]  }
  0x8d   : > { %2276 = vmatpush2.bf16.msra.mxu1 %v5876_v47  ;;  %2236 = vmatprep.subr.bf16.mxu0 %v5877_v52  ;;  %v5916_v47 = vld [vmem:[%s6961_s9 + $0x48] ss:$16 sps:$4 sm:$0xff]   ;;  %v5927_v52 = vld [vmem:[%s6961_s9 + $0x404] ss:$16 sps:$4 sm:$0xff]   ;;  %v339_v15 = vadd.f32 %v338_v8, %v337_v3  ;;  %v5967_v61 = vld [vmem:[%s6961_s9 + $0x520] ss:$16 sps:$4 sm:$0xff]  }
  0x8e   : > { %2277 = vmatprep.subr.bf16.mxu1 %v5879_v57  ;;  %v238_v57 = vld [vmem:[%s6953_s30 + $0x20] sm:$0xff] }
  0x8f   : > { %v294_v60 = vrot.slane %v238_v57, 4  ;;  %v340_v17 = vrot.slane %v339_v15, 1  ;;  %v5973_v3 = vld [vmem:[%s6961_s9 + $0x500] ss:$16 sps:$4 sm:$0xff]  }
  0x90   : > { %2237 = vmatpush2.bf16.msra.mxu0 %v5881_v2  ;;  %v5936_v2 = vld [vmem:[%s6961_s9 + $0x1ec] ss:$16 sps:$4 sm:$0xff]  }
  0x91   : > { %2278 = vmatpush2.bf16.msra.mxu1 %v5882_v7  ;;  %2288 = vmatprep.subr.bf16.mxu0 %v5885_v18  ;;  %v295_v4 = vadd.f32 %v294_v60, %v238_v57  ;;  %v302_v7 = vrot.slane %v301_v0, 2  ;;  %v5937_v18 = vld [vmem:[%s6961_s9 + $0x5c0] ss:$16 sps:$4 sm:$0xff]   ;;  %v5972_v60 = vld [vmem:[%s6961_s9 + $0x12c] ss:$16 sps:$4 sm:$0xff]  }
  0x92   : > { %2329 = vmatprep.subr.bf16.mxu1 %v5888_v19  ;;  %v5940_v19 = vld [vmem:[%s6961_s9 + $0x1c8] ss:$16 sps:$4 sm:$0xff]  }
  0x93   : > { %2239 = vmatmul.mubr.bf16.vlgmr.msra.gmra.mxu0 %v7047_v24  ;;  %v303_v10 = vadd.f32 %v302_v7, %v301_v0  ;;  %v296_v11 = vrot.slane %v295_v4, 2  ;;  %v5984_v7 = vld [vmem:[%s6961_s9 + $0x4ec] ss:$16 sps:$4 sm:$0xff]  }
  0x94   : > { %2280 = vmatmul.mubr.bf16.vlgmr.msra.gmra.mxu1 %v7052_v27  ;;  %2289 = vmatpush1.bf16.msra.mxu0 %v5883_v23  ;;  %v333_v23 = vadd.f32 %v332_v12, %v331_v5  ;;  %v5990_v12 = vld [vmem:[%s6961_s9 + $0x4cc] ss:$16 sps:$4 sm:$0xff]  }
  0x95   : > { %2330 = vmatpush1.bf16.msra.mxu1 %v5886_v26  ;;  %2290 = vmatprep.subr.bf16.mxu0 %v5891_v28  ;;  %v304_v16 = vrot.slane %v303_v10, 1  ;;  %v297_v22 = vadd.f32 %v296_v11, %v295_v4  ;;  %v5948_v26 = vld [vmem:[%s6961_s9 + $0x1ac] ss:$16 sps:$4 sm:$0xff]   ;;  %v341_v28 = vadd.f32 %v340_v17, %v339_v15  ;;  %v5976_v4 = vld [vmem:[%s6961_s9 + $0x108] ss:$16 sps:$4 sm:$0xff]  }
  0x96   : > { %2331 = vmatprep.subr.bf16.mxu1 %v5894_v29  ;;  %2361 = vmatprep.mubr.bf16.mxu1 %v1235_v20  ;;  %v5943_v29 = vld [vmem:[%s6961_s9 + $0x5a0] ss:$16 sps:$4 sm:$0xff]   ;;  %v5987_v11 = vld [vmem:[%s6961_s9 + $0x2cc] ss:$16 sps:$4 sm:$0xff]   ;;  %v5991_v17 = vld [vmem:[%s6961_s9 + $0x2a8] ss:$16 sps:$4 sm:$0xff]  }
  0x97   : > { %v305_v20 = vadd.f32 %v304_v16, %v303_v10  ;;  %v5982_v10 = vld [vmem:[%s6961_s9 + $0x4e8] ss:$16 sps:$4 sm:$0xff]   ;;  %v5993_v15 = vld [vmem:[%s6961_s9 + $0x2ac] ss:$16 sps:$4 sm:$0xff]  }
  0x98   : > { %2291 = vmatpush1.bf16.msra.mxu0 %v5889_v30  ;;  %v5996_v16 = vld [vmem:[%s6961_s9 + $0x4ac] ss:$16 sps:$4 sm:$0xff]  }
  0x99   : > { %2332 = vmatpush1.bf16.msra.mxu1 %v5892_v31  ;;  %2292 = vmatprep.subr.bf16.mxu0 %v5897_v32  ;;  %v491_v30 = vmul.f32 0.125, %v305_v20  ;;  %v497_v31 = vmul.f32 0.125, %v341_v28  ;;  %v5946_v32 = vld [vmem:[%s6961_s9 + $0x1a8] ss:$16 sps:$4 sm:$0xff]   ;;  %v6011_v28 = vld [vmem:[%s6961_s9 + $0x24c] ss:$16 sps:$4 sm:$0xff]  }
  0x9a   : > { %2333 = vmatprep.subr.bf16.mxu1 %v5900_v33  ;;  %v5997_v20 = vld [vmem:[%s6961_s9 + $0x288] ss:$16 sps:$4 sm:$0xff]  }
  0x9b   : > { %v527_v33 = vpack.c.bf16 %v491_v30, %v491_v30  ;;  %v6009_v30 = vld [vmem:[%s6961_s9 + $0x248] ss:$16 sps:$4 sm:$0xff]  }
  0x9c   : > { %2293 = vmatpush1.bf16.msra.mxu0 %v5895_v34  ;;  %v298_v34 = vrot.slane %v297_v22, 1 }
  0x9d   : > { %2334 = vmatpush1.bf16.msra.mxu1 %v5898_v35  ;;  %2294 = vmatprep.subr.bf16.mxu0 %v5903_v36  ;;  %v334_v35 = vrot.slane %v333_v23, 1  ;;  %v5951_v36 = vld [vmem:[%s6961_s9 + $0x584] ss:$16 sps:$4 sm:$0xff]  }
  0x9e   : > { %2335 = vmatprep.subr.bf16.mxu1 %v5906_v37  ;;  %v5954_v37 = vld [vmem:[%s6961_s9 + $0x18c] ss:$16 sps:$4 sm:$0xff]  }
  0xa0   : > { %2295 = vmatpush1.bf16.msra.mxu0 %v5901_v38  ;;  %v533_v38 = vpack.c.bf16 %v497_v31, %v497_v31  ;;  %v6012_v31 = vld [vmem:[%s6961_s9 + $0x448] ss:$16 sps:$4 sm:$0xff]  }
  0xa1   : > { %2336 = vmatpush1.bf16.msra.mxu1 %v5904_v39  ;;  %2296 = vmatprep.subr.bf16.mxu0 %v5909_v40  ;;  %v1220_v39 = vunpack.c.l.b16 %v527_v33  ;;  %v5949_v40 = vld [vmem:[%s6961_s9 + $0x580] ss:$16 sps:$4 sm:$0xff]   ;;  %v6020_v33 = vld [vmem:[%s6961_s9 + $0x42c] ss:$16 sps:$4 sm:$0xff]  }
  0xa2   : > { %2337 = vmatprep.subr.bf16.mxu1 %v5912_v41  ;;  %v1226_v41 = vunpack.c.l.b16 %v533_v38  ;;  %v6021_v38 = vld [vmem:[%s6961_s9 + $0x208] ss:$16 sps:$4 sm:$0xff]  }
  0xa4   : > { %2297 = vmatpush1.bf16.msra.mxu0 %v5907_v42  ;;  %v5952_v42 = vld [vmem:[%s6961_s9 + $0x188] ss:$16 sps:$4 sm:$0xff]  }
  0xa5   : > { %2338 = vmatpush1.bf16.msra.mxu1 %v5910_v43  ;;  %2298 = vmatprep.subr.bf16.mxu0 %v5915_v44  ;;  %v299_v43 = vadd.f32 %v298_v34, %v297_v22  ;;  %v335_v44 = vadd.f32 %v334_v35, %v333_v23  ;;  %v6005_v22 = vld [vmem:[%s6961_s9 + $0x26c] ss:$16 sps:$4 sm:$0xff]   ;;  %v6015_v34 = vld [vmem:[%s6961_s9 + $0x228] ss:$16 sps:$4 sm:$0xff]  }
  0xa6   : > { %2339 = vmatprep.subr.bf16.mxu1 %v5918_v45  ;;  %v5957_v45 = vld [vmem:[%s6961_s9 + $0x564] ss:$16 sps:$4 sm:$0xff]   ;;  %v6008_v23 = vld [vmem:[%s6961_s9 + $0x46c] ss:$16 sps:$4 sm:$0xff]   ;;  %v6018_v35 = vld [vmem:[%s6961_s9 + $0x428] ss:$16 sps:$4 sm:$0xff]  }
  0xa8   : > { %2299 = vmatpush1.bf16.msra.mxu0 %v5913_v46  ;;  %v5960_v46 = vld [vmem:[%s6961_s9 + $0x16c] ss:$16 sps:$4 sm:$0xff]  }
  0xa9   : > { %2340 = vmatpush1.bf16.msra.mxu1 %v5916_v47  ;;  %2300 = vmatprep.subr.bf16.mxu0 %v5921_v48  ;;  %v1233_v47 = vsel %vm1227_vm0, %v1226_v41, %v1220_v39  ;;  %v6024_v39 = vld [vmem:[%s6961_s9 + $0x408] ss:$16 sps:$4 sm:$0xff]   ;;  %v6032_v41 = vld [vmem:[%s6961_s9 + $0x5ec] ss:$16 sps:$4 sm:$0xff]  }
  0xaa   : > { %2341 = vmatprep.subr.bf16.mxu1 %v5924_v49  ;;  %v1239_v48 = vpack.c.b16 %v1233_v47, %v1233_v47  ;;  %v5955_v49 = vld [vmem:[%s6961_s9 + $0x560] ss:$16 sps:$4 sm:$0xff]   ;;  %v6036_v47 = vld [vmem:[%s6961_s9 + $0x5c8] ss:$16 sps:$4 sm:$0xff]  }
  0xac   : > { %2301 = vmatpush1.bf16.msra.mxu0 %v5919_v50  ;;  %v5958_v50 = vld [vmem:[%s6961_s9 + $0x168] ss:$16 sps:$4 sm:$0xff]   ;;  %2320 = vmatprep.mubr.bf16.mxu0 %v1239_v48 }
  0xad   : > { %2342 = vmatpush1.bf16.msra.mxu1 %v5922_v51  ;;  %2302 = vmatprep.subr.bf16.mxu0 %v5927_v52  ;;  %v490_v51 = vmul.f32 0.125, %v299_v43  ;;  %v496_v52 = vmul.f32 0.125, %v335_v44  ;;  %v6030_v43 = vld [vmem:[%s6961_s9 + $0x5e8] ss:$16 sps:$4 sm:$0xff]   ;;  %v6035_v44 = vld [vmem:[%s6961_s9 + $0x3cc] ss:$16 sps:$4 sm:$0xff]  }
  0xae   : > { %2343 = vmatprep.subr.bf16.mxu1 %v5930_v53  ;;  %v5963_v53 = vld [vmem:[%s6961_s9 + $0x544] ss:$16 sps:$4 sm:$0xff]  }
  0xaf   : > { %v526_v57 = vpack.c.bf16 %v490_v51, %v490_v51  ;;  %v532_v58 = vpack.c.bf16 %v496_v52, %v496_v52  ;;  %v6042_v51 = vld [vmem:[%s6961_s9 + $0x5a8] ss:$16 sps:$4 sm:$0xff]   ;;  %v6047_v52 = vld [vmem:[%s6961_s9 + $0x38c] ss:$16 sps:$4 sm:$0xff]  }
  0xb0   : > { %2303 = vmatpush1.bf16.msra.mxu0 %v5925_v62  ;;  %v5970_v62 = vld [vmem:[%s6961_s9 + $0x128] ss:$16 sps:$4 sm:$0xff]  }
  0xb1   : > { %2344 = vmatpush1.bf16.msra.mxu1 %v5928_v63  ;;  %2304 = vmatprep.subr.bf16.mxu0 %v5933_v1  ;;  %v1219_v63 = vunpack.c.l.b16 %v526_v57  ;;  %v1225_v0 = vunpack.c.l.b16 %v532_v58  ;;  %v5975_v1 = vld [vmem:[%s6961_s9 + $0x504] ss:$16 sps:$4 sm:$0xff]   ;;  %v6056_v57 = vld [vmem:[%s6961_s9 + $0x56c] ss:$16 sps:$4 sm:$0xff]   ;;  %v6051_v58 = vld [vmem:[%s6961_s9 + $0x368] ss:$16 sps:$4 sm:$0xff]  }
  0xb2   : > { %2345 = vmatprep.subr.bf16.mxu1 %v5936_v2  ;;  %v5978_v2 = vld [vmem:[%s6961_s9 + $0x10c] ss:$16 sps:$4 sm:$0xff]  }
  0xb3   : > { %v1232_v5 = vsel %vm1227_vm0, %v1225_v0, %v1219_v63  ;;  %v6062_v63 = vld [vmem:[%s6961_s9 + $0x54c] ss:$16 sps:$4 sm:$0xff]  }
  0xb4   : > { %2305 = vmatpush2.bf16.msra.mxu0 %v5931_v6  ;;  %v5981_v6 = vld [vmem:[%s6961_s9 + $0x2ec] ss:$16 sps:$4 sm:$0xff]   ;;  %v7124_v8 = vpack.c.b16 %v1232_v5, %v1232_v5 }
  0xb5   : > { %2346 = vmatpush2.bf16.msra.mxu1 %v5934_v9  ;;  %2306 = vmatprep.subr.bf16.mxu0 %v5939_v13  ;;  %v5979_v9 = vld [vmem:[%s6961_s9 + $0x2e8] ss:$16 sps:$4 sm:$0xff]  }
  0xb6   : > { %2347 = vmatprep.subr.bf16.mxu1 %v5942_v14  ;;  %v5985_v13 = vld [vmem:[%s6961_s9 + $0x2c8] ss:$16 sps:$4 sm:$0xff]  }
  0xb7   : > { %v5988_v14 = vld [vmem:[%s6961_s9 + $0x4c8] ss:$16 sps:$4 sm:$0xff]  }
  0xb8   : > { %2307 = vmatpush2.bf16.msra.mxu0 %v5937_v18  ;;  %v5999_v18 = vld [vmem:[%s6961_s9 + $0x28c] ss:$16 sps:$4 sm:$0xff]  }
  0xb9   : > { %2348 = vmatpush2.bf16.msra.mxu1 %v5940_v19  ;;  %2308 = vmatprep.subr.bf16.mxu0 %v5945_v25  ;;  %v6002_v19 = vld [vmem:[%s6961_s9 + $0x48c] ss:$16 sps:$4 sm:$0xff]   ;;  %v6003_v25 = vld [vmem:[%s6961_s9 + $0x268] ss:$16 sps:$4 sm:$0xff]  }
  0xba   : > { %2349 = vmatprep.subr.bf16.mxu1 %v5948_v26  ;;  %v6006_v26 = vld [vmem:[%s6961_s9 + $0x468] ss:$16 sps:$4 sm:$0xff]  }
  0xbc   : > { %2309 = vmatpush2.bf16.msra.mxu0 %v5943_v29  ;;  %v6014_v29 = vld [vmem:[%s6961_s9 + $0x44c] ss:$16 sps:$4 sm:$0xff]  }
  0xbd   : > { %2350 = vmatpush2.bf16.msra.mxu1 %v5946_v32  ;;  %2310 = vmatprep.subr.bf16.mxu0 %v5951_v36  ;;  %v6017_v32 = vld [vmem:[%s6961_s9 + $0x22c] ss:$16 sps:$4 sm:$0xff]  }
  0xbe   : > { %2351 = vmatprep.subr.bf16.mxu1 %v5954_v37  ;;  %v6023_v36 = vld [vmem:[%s6961_s9 + $0x20c] ss:$16 sps:$4 sm:$0xff]  }
  0xbf   : > { %v6026_v37 = vld [vmem:[%s6961_s9 + $0x40c] ss:$16 sps:$4 sm:$0xff]  }
  0xc0   : > { %2311 = vmatpush2.bf16.msra.mxu0 %v5949_v40  ;;  %v6029_v40 = vld [vmem:[%s6961_s9 + $0x3ec] ss:$16 sps:$4 sm:$0xff]  }
  0xc1   : > { %2352 = vmatpush2.bf16.msra.mxu1 %v5952_v42  ;;  %2312 = vmatprep.subr.bf16.mxu0 %v5957_v45  ;;  %v6027_v42 = vld [vmem:[%s6961_s9 + $0x3e8] ss:$16 sps:$4 sm:$0xff]   ;;  %v6038_v45 = vld [vmem:[%s6961_s9 + $0x5cc] ss:$16 sps:$4 sm:$0xff]  }
  0xc2   : > { %2353 = vmatprep.subr.bf16.mxu1 %v5960_v46  ;;  %v6033_v46 = vld [vmem:[%s6961_s9 + $0x3c8] ss:$16 sps:$4 sm:$0xff]  }
  0xc4   : > { %2313 = vmatpush2.bf16.msra.mxu0 %v5955_v49  ;;  %v6044_v49 = vld [vmem:[%s6961_s9 + $0x5ac] ss:$16 sps:$4 sm:$0xff]  }
  0xc5   : > { %2354 = vmatpush2.bf16.msra.mxu1 %v5958_v50  ;;  %2314 = vmatprep.subr.bf16.mxu0 %v5963_v53  ;;  %v6039_v50 = vld [vmem:[%s6961_s9 + $0x3a8] ss:$16 sps:$4 sm:$0xff]   ;;  %v6050_v53 = vld [vmem:[%s6961_s9 + $0x58c] ss:$16 sps:$4 sm:$0xff]  }
  0xc6   : > { %2355 = vmatprep.subr.bf16.mxu1 %v5966_v54  ;;  %v6045_v54 = vld [vmem:[%s6961_s9 + $0x388] ss:$16 sps:$4 sm:$0xff]  }
  0xc8   : > { %2315 = vmatpush2.bf16.msra.mxu0 %v5961_v55  ;;  %v6048_v55 = vld [vmem:[%s6961_s9 + $0x588] ss:$16 sps:$4 sm:$0xff]  }
  0xc9   : > { %2356 = vmatpush2.bf16.msra.mxu1 %v5964_v56  ;;  %2316 = vmatprep.subr.bf16.mxu0 %v5969_v59  ;;  %v6053_v56 = vld [vmem:[%s6961_s9 + $0x36c] ss:$16 sps:$4 sm:$0xff]   ;;  %v6054_v59 = vld [vmem:[%s6961_s9 + $0x568] ss:$16 sps:$4 sm:$0xff]  }
  0xca   : > { %2357 = vmatprep.subr.bf16.mxu1 %v5972_v60  ;;  %v6059_v60 = vld [vmem:[%s6961_s9 + $0x34c] ss:$16 sps:$4 sm:$0xff]  }
  0xcc   : > { %2317 = vmatpush2.bf16.msra.mxu0 %v5967_v61  ;;  %v247_v61 = vld [vmem:[%s6953_s30 + $0x68] sm:$0xff] }
  0xcd   : > { %2358 = vmatpush2.bf16.msra.mxu1 %v5970_v62  ;;  %2318 = vmatprep.subr.bf16.mxu0 %v5975_v1  ;;  %v253_v62 = vld [vmem:[%s6953_s30 + $0x98] sm:$0xff]  ;;  %v348_v0 = vrot.slane %v247_v61, 4 }
  0xce   : > { %2359 = vmatprep.subr.bf16.mxu1 %v5978_v2  ;;  %v384_v1 = vrot.slane %v253_v62, 4  ;;  %v249_v2 = vld [vmem:[%s6953_s30 + $0x78] sm:$0xff] }
  0xd0   : > { %2319 = vmatpush2.bf16.msra.mxu0 %v5973_v3  ;;  %v255_v3 = vld [vmem:[%s6953_s30 + $0xa8] sm:$0xff] }
  0xd1   : > { %2360 = vmatpush2.bf16.msra.mxu1 %v5976_v4  ;;  %2370 = vmatprep.subr.bf16.mxu0 %v5981_v6  ;;  %v360_v4 = vrot.slane %v249_v2, 4  ;;  %v396_v5 = vrot.slane %v255_v3, 4  ;;  %v349_v6 = vadd.f32 %v348_v0, %v247_v61  ;;  %v6095_v0 = vld [vmem:[%s6961_s9 + $0x684] ss:$16 sps:$4 sm:$0xff]  }
  0xd2   : > { %2411 = vmatprep.subr.bf16.mxu1 %v5984_v7  ;;  %v385_v7 = vadd.f32 %v384_v1, %v253_v62  ;;  %v6087_v62 = vld [vmem:[%s6961_s9 + $0x6a0] ss:$16 sps:$4 sm:$0xff]   ;;  %v6098_v1 = vld [vmem:[%s6961_s9 + $0x884] ss:$16 sps:$4 sm:$0xff]  }
  0xd3   : > { %2321 = vmatmul.mubr.bf16.vlgmr.msra.gmra.mxu0 %v7124_v8 }
  0xd4   : > { %2362 = vmatmul.mubr.bf16.vlgmr.msra.gmra.mxu1 %v7047_v24  ;;  %2371 = vmatpush1.bf16.msra.mxu0 %v5979_v9  ;;  %v5994_v24 = vld [vmem:[%s6961_s9 + $0x4a8] ss:$16 sps:$4 sm:$0xff]  }
  0xd5   : > { %2412 = vmatpush1.bf16.msra.mxu1 %v5982_v10  ;;  %2372 = vmatprep.subr.bf16.mxu0 %v5987_v11  ;;  %v6057_v9 = vld [vmem:[%s6961_s9 + $0x348] ss:$16 sps:$4 sm:$0xff]   ;;  %v6065_v11 = vld [vmem:[%s6961_s9 + $0x32c] ss:$16 sps:$4 sm:$0xff]  }
  0xd6   : > { %2413 = vmatprep.subr.bf16.mxu1 %v5990_v12  ;;  %2402 = vmatprep.mubr.bf16.mxu0 %v7043_v21  ;;  %v6000_v21 = vld [vmem:[%s6961_s9 + $0x488] ss:$16 sps:$4 sm:$0xff]   ;;  %v361_v12 = vadd.f32 %v360_v4, %v249_v2  ;;  %v6093_v2 = vld [vmem:[%s6961_s9 + $0x680] ss:$16 sps:$4 sm:$0xff]   ;;  %v6101_v4 = vld [vmem:[%s6961_s9 + $0x664] ss:$16 sps:$4 sm:$0xff]  }
  0xd7   : > { %2443 = vmatprep.mubr.bf16.mxu1 %v1239_v48  ;;  %v6041_v48 = vld [vmem:[%s6961_s9 + $0x3ac] ss:$16 sps:$4 sm:$0xff]   ;;  %v6060_v10 = vld [vmem:[%s6961_s9 + $0x548] ss:$16 sps:$4 sm:$0xff]  }
  0xd8   : > { %2373 = vmatpush1.bf16.msra.mxu0 %v5985_v13  ;;  %v397_v13 = vadd.f32 %v396_v5, %v255_v3  ;;  %v6096_v3 = vld [vmem:[%s6961_s9 + $0x880] ss:$16 sps:$4 sm:$0xff]   ;;  %v6104_v5 = vld [vmem:[%s6961_s9 + $0x864] ss:$16 sps:$4 sm:$0xff]  }
  0xd9   : > { %2414 = vmatpush1.bf16.msra.mxu1 %v5988_v14  ;;  %2374 = vmatprep.subr.bf16.mxu0 %v5993_v15  ;;  %v6068_v14 = vld [vmem:[%s6961_s9 + $0x52c] ss:$16 sps:$4 sm:$0xff]   ;;  %v350_v15 = vrot.slane %v349_v6, 2 }
  0xda   : > { %2415 = vmatprep.subr.bf16.mxu1 %v5996_v16  ;;  %v386_v16 = vrot.slane %v385_v7, 2 }
  0xdc   : > { %2375 = vmatpush1.bf16.msra.mxu0 %v5991_v17  ;;  %v362_v17 = vrot.slane %v361_v12, 2 }
  0xdd   : > { %2416 = vmatpush1.bf16.msra.mxu1 %v5994_v24  ;;  %2376 = vmatprep.subr.bf16.mxu0 %v5999_v18  ;;  %v398_v24 = vrot.slane %v397_v13, 2  ;;  %v6063_v18 = vld [vmem:[%s6961_s9 + $0x328] ss:$16 sps:$4 sm:$0xff]  }
  0xde   : > { %2417 = vmatprep.subr.bf16.mxu1 %v6002_v19  ;;  %v6066_v19 = vld [vmem:[%s6961_s9 + $0x528] ss:$16 sps:$4 sm:$0xff]  }
  0xe0   : > { %2377 = vmatpush1.bf16.msra.mxu0 %v5997_v20  ;;  %v351_v20 = vadd.f32 %v350_v15, %v349_v6  ;;  %v6099_v6 = vld [vmem:[%s6961_s9 + $0x660] ss:$16 sps:$4 sm:$0xff]  }
  0xe1   : > { %2418 = vmatpush1.bf16.msra.mxu1 %v6000_v21  ;;  %2378 = vmatprep.subr.bf16.mxu0 %v6005_v22  ;;  %v387_v21 = vadd.f32 %v386_v16, %v385_v7  ;;  %v6071_v22 = vld [vmem:[%s6961_s9 + $0x30c] ss:$16 sps:$4 sm:$0xff]   ;;  %v6102_v7 = vld [vmem:[%s6961_s9 + $0x860] ss:$16 sps:$4 sm:$0xff]  }
  0xe2   : > { %2419 = vmatprep.subr.bf16.mxu1 %v6008_v23  ;;  %v363_v23 = vadd.f32 %v362_v17, %v361_v12  ;;  %v6108_v12 = vld [vmem:[%s6961_s9 + $0x840] ss:$16 sps:$4 sm:$0xff]  }
  0xe3   : > { %v246_v15 = vld [vmem:[%s6953_s30 + $0x60] sm:$0xff]  ;;  %v252_v16 = vld [vmem:[%s6953_s30 + $0x90] sm:$0xff] }
  0xe4   : > { %2379 = vmatpush1.bf16.msra.mxu0 %v6003_v25  ;;  %v399_v25 = vadd.f32 %v398_v24, %v397_v13  ;;  %v6113_v13 = vld [vmem:[%s6961_s9 + $0x624] ss:$16 sps:$4 sm:$0xff]  }
  0xe5   : > { %2420 = vmatpush1.bf16.msra.mxu1 %v6006_v26  ;;  %2380 = vmatprep.subr.bf16.mxu0 %v6011_v28  ;;  %v6074_v26 = vld [vmem:[%s6961_s9 + $0x50c] ss:$16 sps:$4 sm:$0xff]   ;;  %v352_v28 = vrot.slane %v351_v20, 1  ;;  %v248_v17 = vld [vmem:[%s6953_s30 + $0x70] sm:$0xff]  ;;  %v254_v24 = vld [vmem:[%s6953_s30 + $0xa0] sm:$0xff] }
  0xe6   : > { %2421 = vmatprep.subr.bf16.mxu1 %v6014_v29  ;;  %v388_v29 = vrot.slane %v387_v21, 1 }
  0xe8   : > { %2381 = vmatpush1.bf16.msra.mxu0 %v6009_v30  ;;  %v364_v30 = vrot.slane %v363_v23, 1 }
  0xe9   : > { %2422 = vmatpush1.bf16.msra.mxu1 %v6012_v31  ;;  %2382 = vmatprep.subr.bf16.mxu0 %v6017_v32  ;;  %v400_v31 = vrot.slane %v399_v25, 1  ;;  %v6069_v32 = vld [vmem:[%s6961_s9 + $0x308] ss:$16 sps:$4 sm:$0xff]  }
  0xea   : > { %2423 = vmatprep.subr.bf16.mxu1 %v6020_v33  ;;  %v353_v33 = vadd.f32 %v352_v28, %v351_v20  ;;  %v342_v20 = vrot.slane %v246_v15, 4  ;;  %v6117_v28 = vld [vmem:[%s6961_s9 + $0x600] ss:$16 sps:$4 sm:$0xff]  }
  0xec   : > { %2383 = vmatpush1.bf16.msra.mxu0 %v6015_v34  ;;  %v389_v34 = vadd.f32 %v388_v29, %v387_v21  ;;  %v6119_v21 = vld [vmem:[%s6961_s9 + $0x604] ss:$16 sps:$4 sm:$0xff]   ;;  %v343_v29 = vadd.f32 %v342_v20, %v246_v15 }
  0xed   : > { %2424 = vmatpush1.bf16.msra.mxu1 %v6018_v35  ;;  %2384 = vmatprep.subr.bf16.mxu0 %v6023_v36  ;;  %v6072_v35 = vld [vmem:[%s6961_s9 + $0x508] ss:$16 sps:$4 sm:$0xff]   ;;  %v365_v36 = vadd.f32 %v364_v30, %v363_v23  ;;  %v354_v23 = vrot.slane %v248_v17, 4  ;;  %v6120_v30 = vld [vmem:[%s6961_s9 + $0x800] ss:$16 sps:$4 sm:$0xff]  }
  0xee   : > { %2425 = vmatprep.subr.bf16.mxu1 %v6026_v37  ;;  %v401_v37 = vadd.f32 %v400_v31, %v399_v25  ;;  %v390_v25 = vrot.slane %v254_v24, 4  ;;  %v6125_v31 = vld [vmem:[%s6961_s9 + $0x7e4] ss:$16 sps:$4 sm:$0xff]  }
  0xf0   : > { %2385 = vmatpush1.bf16.msra.mxu0 %v6021_v38  ;;  %v6077_v38 = vld [vmem:[%s6961_s9 + $0x6e4] ss:$16 sps:$4 sm:$0xff]  }
  0xf1   : > { %2426 = vmatpush1.bf16.msra.mxu1 %v6024_v39  ;;  %2386 = vmatprep.subr.bf16.mxu0 %v6029_v40  ;;  %v6080_v39 = vld [vmem:[%s6961_s9 + $0x8e4] ss:$16 sps:$4 sm:$0xff]   ;;  %v499_v40 = vmul.f32 0.125, %v353_v33  ;;  %v355_v33 = vadd.f32 %v354_v23, %v248_v17  ;;  %v6147_v17 = vld [vmem:[%s6961_s9 + $0x760] ss:$16 sps:$4 sm:$0xff]  }
  0xf2   : > { %2427 = vmatprep.subr.bf16.mxu1 %v6032_v41  ;;  %v505_v41 = vmul.f32 0.125, %v389_v34  ;;  %v391_v34 = vadd.f32 %v390_v25, %v254_v24  ;;  %v6150_v24 = vld [vmem:[%s6961_s9 + $0x960] ss:$16 sps:$4 sm:$0xff]  }
  0xf4   : > { %2387 = vmatpush2.bf16.msra.mxu0 %v6027_v42  ;;  %v501_v42 = vmul.f32 0.125, %v365_v36  ;;  %v6123_v36 = vld [vmem:[%s6961_s9 + $0x7e0] ss:$16 sps:$4 sm:$0xff]  }
  0xf5   : > { %2428 = vmatpush2.bf16.msra.mxu1 %v6030_v43  ;;  %2388 = vmatprep.subr.bf16.mxu0 %v6035_v44  ;;  %v507_v43 = vmul.f32 0.125, %v401_v37  ;;  %v535_v44 = vpack.c.bf16 %v499_v40, %v499_v40  ;;  %v6126_v37 = vld [vmem:[%s6961_s9 + $0x9e0] ss:$16 sps:$4 sm:$0xff]   ;;  %v344_v40 = vrot.slane %v343_v29, 2 }
  0xf6   : > { %2429 = vmatprep.subr.bf16.mxu1 %v6038_v45  ;;  %v541_v45 = vpack.c.bf16 %v505_v41, %v505_v41  ;;  %v251_v41 = vld [vmem:[%s6953_s30 + $0x88] sm:$0xff] }
  0xf8   : > { %2389 = vmatpush2.bf16.msra.mxu0 %v6033_v46  ;;  %v6075_v46 = vld [vmem:[%s6961_s9 + $0x6e0] ss:$16 sps:$4 sm:$0xff]  }
  0xf9   : > { %2430 = vmatpush2.bf16.msra.mxu1 %v6036_v47  ;;  %2390 = vmatprep.subr.bf16.mxu0 %v6041_v48  ;;  %v6078_v47 = vld [vmem:[%s6961_s9 + $0x8e0] ss:$16 sps:$4 sm:$0xff]   ;;  %v6083_v48 = vld [vmem:[%s6961_s9 + $0x6c4] ss:$16 sps:$4 sm:$0xff]  }
  0xfa   : > { %2431 = vmatprep.subr.bf16.mxu1 %v6044_v49  ;;  %v537_v49 = vpack.c.bf16 %v501_v42, %v501_v42 }
  0xfc   : > { %2391 = vmatpush2.bf16.msra.mxu0 %v6039_v50  ;;  %v543_v50 = vpack.c.bf16 %v507_v43, %v507_v43  ;;  %v356_v43 = vrot.slane %v355_v33, 2 }
  0xfd   : > { %2432 = vmatpush2.bf16.msra.mxu1 %v6042_v51  ;;  %2392 = vmatprep.subr.bf16.mxu0 %v6047_v52  ;;  %v6086_v51 = vld [vmem:[%s6961_s9 + $0x8c4] ss:$16 sps:$4 sm:$0xff]   ;;  %v2465_v52 = vunpack.c.l.b16 %v535_v44  ;;  %v392_v44 = vrot.slane %v391_v34, 2 }
  0xfe   : > { %2433 = vmatprep.subr.bf16.mxu1 %v6050_v53  ;;  %v2471_v53 = vunpack.c.l.b16 %v541_v45  ;;  %v257_v45 = vld [vmem:[%s6953_s30 + $0xb8] sm:$0xff] }
 0x100   : > { %2393 = vmatpush2.bf16.msra.mxu0 %v6045_v54  ;;  %v2467_v54 = vunpack.c.l.b16 %v537_v49  ;;  %v6129_v49 = vld [vmem:[%s6961_s9 + $0x7c0] ss:$16 sps:$4 sm:$0xff]  }
 0x101   : > { %2434 = vmatpush2.bf16.msra.mxu1 %v6048_v55  ;;  %2394 = vmatprep.subr.bf16.mxu0 %v6053_v56  ;;  %v2473_v55 = vunpack.c.l.b16 %v543_v50  ;;  %v6081_v56 = vld [vmem:[%s6961_s9 + $0x6c0] ss:$16 sps:$4 sm:$0xff]  }
 0x102   : > { %2435 = vmatprep.subr.bf16.mxu1 %v6056_v57  ;;  %v2477_v57 = vsel %vm1227_vm0, %v2471_v53, %v2465_v52  ;;  %v6132_v50 = vld [vmem:[%s6961_s9 + $0x9c0] ss:$16 sps:$4 sm:$0xff]   ;;  %v6137_v53 = vld [vmem:[%s6961_s9 + $0x7a4] ss:$16 sps:$4 sm:$0xff]  }
 0x103   : > { %v2479_v61 = vsel %vm1227_vm0, %v2473_v55, %v2467_v54  ;;  %v6140_v54 = vld [vmem:[%s6961_s9 + $0x9a4] ss:$16 sps:$4 sm:$0xff]  }
 0x104   : > { %2395 = vmatpush2.bf16.msra.mxu0 %v6051_v58  ;;  %v6084_v58 = vld [vmem:[%s6961_s9 + $0x8c0] ss:$16 sps:$4 sm:$0xff]  }
 0x105   : > { %2436 = vmatpush2.bf16.msra.mxu1 %v6054_v59  ;;  %2396 = vmatprep.subr.bf16.mxu0 %v6059_v60  ;;  %v6089_v59 = vld [vmem:[%s6961_s9 + $0x6a4] ss:$16 sps:$4 sm:$0xff]   ;;  %v7207_v60 = vpack.c.b16 %v2477_v57, %v2477_v57  ;;  %v393_v57 = vadd.f32 %v392_v44, %v391_v34 }
 0x106   : > { %2437 = vmatprep.subr.bf16.mxu1 %v6062_v63  ;;  %v6090_v63 = vld [vmem:[%s6961_s9 + $0x8a0] ss:$16 sps:$4 sm:$0xff]   ;;  %v6161_v34 = vld [vmem:[%s6961_s9 + $0x724] ss:$16 sps:$4 sm:$0xff]  }
 0x107   : > { %v6167_v44 = vld [vmem:[%s6961_s9 + $0x704] ss:$16 sps:$4 sm:$0xff]  }
 0x108   : > { %2397 = vmatpush2.bf16.msra.mxu0 %v6057_v9  ;;  %v6107_v9 = vld [vmem:[%s6961_s9 + $0x644] ss:$16 sps:$4 sm:$0xff]  }
 0x109   : > { %2438 = vmatpush2.bf16.msra.mxu1 %v6060_v10  ;;  %2398 = vmatprep.subr.bf16.mxu0 %v6065_v11  ;;  %v6110_v10 = vld [vmem:[%s6961_s9 + $0x844] ss:$16 sps:$4 sm:$0xff]   ;;  %v6105_v11 = vld [vmem:[%s6961_s9 + $0x640] ss:$16 sps:$4 sm:$0xff]  }
 0x10a   : > { %2439 = vmatprep.subr.bf16.mxu1 %v6068_v14  ;;  %v6116_v14 = vld [vmem:[%s6961_s9 + $0x824] ss:$16 sps:$4 sm:$0xff]  }
 0x10c   : > { %2399 = vmatpush2.bf16.msra.mxu0 %v6063_v18  ;;  %v6111_v18 = vld [vmem:[%s6961_s9 + $0x620] ss:$16 sps:$4 sm:$0xff]  }
 0x10d   : > { %2440 = vmatpush2.bf16.msra.mxu1 %v6066_v19  ;;  %2400 = vmatprep.subr.bf16.mxu0 %v6071_v22  ;;  %v6114_v19 = vld [vmem:[%s6961_s9 + $0x820] ss:$16 sps:$4 sm:$0xff]   ;;  %v378_v22 = vrot.slane %v252_v16, 4 }
 0x10e   : > { %2441 = vmatprep.subr.bf16.mxu1 %v6074_v26  ;;  %v6122_v26 = vld [vmem:[%s6961_s9 + $0x804] ss:$16 sps:$4 sm:$0xff]  }
 0x110   : > { %2401 = vmatpush2.bf16.msra.mxu0 %v6069_v32  ;;  %v379_v32 = vadd.f32 %v378_v22, %v252_v16 }
 0x111   : > { %2442 = vmatpush2.bf16.msra.mxu1 %v6072_v35  ;;  %3454 = vmatprep.subr.bf16.mxu0 %v6077_v38  ;;  %v6128_v35 = vld [vmem:[%s6961_s9 + $0x9e4] ss:$16 sps:$4 sm:$0xff]  }
 0x112   : > { %3495 = vmatprep.subr.bf16.mxu1 %v6080_v39  ;;  %v6131_v38 = vld [vmem:[%s6961_s9 + $0x7c4] ss:$16 sps:$4 sm:$0xff]   ;;  %v380_v42 = vrot.slane %v379_v32, 2 }
 0x113   : > { %2403 = vmatmul.mubr.bf16.vlgmr.msra.gmra.mxu0 %v7052_v27  ;;  %v6092_v27 = vld [vmem:[%s6961_s9 + $0x8a4] ss:$16 sps:$4 sm:$0xff]  }
 0x114   : > { %2444 = vmatmul.mubr.bf16.vlgmr.msra.gmra.mxu1 %v7124_v8  ;;  %3455 = vmatpush1.bf16.msra.mxu0 %v6075_v46  ;;  %v7211_v8 = vpack.c.b16 %v2479_v61, %v2479_v61  ;;  %v6134_v39 = vld [vmem:[%s6961_s9 + $0x9c4] ss:$16 sps:$4 sm:$0xff]   ;;  %v372_v46 = vrot.slane %v251_v41, 4  ;;  %v381_v55 = vadd.f32 %v380_v42, %v379_v32  ;;  %v6135_v61 = vld [vmem:[%s6961_s9 + $0x7a0] ss:$16 sps:$4 sm:$0xff]  }
 0x115   : > { %3496 = vmatpush1.bf16.msra.mxu1 %v6078_v47  ;;  %3456 = vmatprep.subr.bf16.mxu0 %v6083_v48  ;;  %v408_v47 = vrot.slane %v257_v45, 4 }
 0x116   : > { %3497 = vmatprep.subr.bf16.mxu1 %v6086_v51  ;;  %3486 = vmatprep.mubr.bf16.mxu0 %v7207_v60  ;;  %v373_v48 = vadd.f32 %v372_v46, %v251_v41  ;;  %v345_v51 = vadd.f32 %v344_v40, %v343_v29  ;;  %v1143_v29 = vlaneseq }
 0x117   : > { %3527 = vmatprep.mubr.bf16.mxu1 %v7211_v8  ;;  %v409_v52 = vadd.f32 %v408_v47, %v257_v45 }
 0x118   : > { %3457 = vmatpush1.bf16.msra.mxu0 %v6081_v56  ;;  %v357_v56 = vadd.f32 %v356_v43, %v355_v33  ;;  %v6156_v33 = vld [vmem:[%s6961_s9 + $0x940] ss:$16 sps:$4 sm:$0xff]   ;;  %v7271_v40 = vshrl.u32 %v1143_v29, 7  ;;  %v6192_v29 = vld [vmem:[%s6961_s9 + $0x688] ss:$16 sps:$4 sm:$0xff]  }
 0x119   : > { %3498 = vmatpush1.bf16.msra.mxu1 %v6084_v58  ;;  %3458 = vmatprep.subr.bf16.mxu0 %v6089_v59  ;;  %v374_v58 = vrot.slane %v373_v48, 2  ;;  %v410_v59 = vrot.slane %v409_v52, 2  ;;  %v6162_v43 = vld [vmem:[%s6961_s9 + $0x920] ss:$16 sps:$4 sm:$0xff]  }
 0x11a   : > { %3499 = vmatprep.subr.bf16.mxu1 %v6092_v27  ;;  %v6138_v27 = vld [vmem:[%s6961_s9 + $0x9a0] ss:$16 sps:$4 sm:$0xff]  }
 0x11c   : > { %3459 = vmatpush1.bf16.msra.mxu0 %v6087_v62  ;;  %v6143_v62 = vld [vmem:[%s6961_s9 + $0x784] ss:$16 sps:$4 sm:$0xff]  }
 0x11d   : > { %3500 = vmatpush1.bf16.msra.mxu1 %v6090_v63  ;;  %3460 = vmatprep.subr.bf16.mxu0 %v6095_v0  ;;  %v346_v63 = vrot.slane %v345_v51, 1  ;;  %v375_v0 = vadd.f32 %v374_v58, %v373_v48  ;;  %v6173_v58 = vld [vmem:[%s6961_s9 + $0xae4] ss:$16 sps:$4 sm:$0xff]  }
 0x11e   : > { %3501 = vmatprep.subr.bf16.mxu1 %v6098_v1  ;;  %v411_v1 = vadd.f32 %v410_v59, %v409_v52  ;;  %v6176_v59 = vld [vmem:[%s6961_s9 + $0x6ec] ss:$16 sps:$4 sm:$0xff]  }
 0x120   : > { %3461 = vmatpush1.bf16.msra.mxu0 %v6093_v2  ;;  %v6146_v2 = vld [vmem:[%s6961_s9 + $0x984] ss:$16 sps:$4 sm:$0xff]  }
 0x121   : > { %3502 = vmatpush1.bf16.msra.mxu1 %v6096_v3  ;;  %3462 = vmatprep.subr.bf16.mxu0 %v6101_v4  ;;  %v382_v3 = vrot.slane %v381_v55, 1  ;;  %v358_v4 = vrot.slane %v357_v56, 1 }
 0x122   : > { %3503 = vmatprep.subr.bf16.mxu1 %v6104_v5  ;;  %v394_v5 = vrot.slane %v393_v57, 1 }
 0x123   : > { %v359_v15 = vadd.f32 %v358_v4, %v357_v56  ;;  %v6182_v4 = vld [vmem:[%s6961_s9 + $0x6cc] ss:$16 sps:$4 sm:$0xff]  }
 0x124   : > { %3463 = vmatpush1.bf16.msra.mxu0 %v6099_v6  ;;  %v6141_v6 = vld [vmem:[%s6961_s9 + $0x780] ss:$16 sps:$4 sm:$0xff]   ;;  %v395_v16 = vadd.f32 %v394_v5, %v393_v57 }
 0x125   : > { %3504 = vmatpush1.bf16.msra.mxu1 %v6102_v7  ;;  %3464 = vmatprep.subr.bf16.mxu0 %v6107_v9  ;;  %v6144_v7 = vld [vmem:[%s6961_s9 + $0x980] ss:$16 sps:$4 sm:$0xff]   ;;  %v347_v9 = vadd.f32 %v346_v63, %v345_v51  ;;  %v500_v23 = vmul.f32 0.125, %v359_v15 }
 0x126   : > { %3505 = vmatprep.subr.bf16.mxu1 %v6110_v10  ;;  %v376_v10 = vrot.slane %v375_v0, 1  ;;  %v506_v25 = vmul.f32 0.125, %v395_v16  ;;  %v6168_v51 = vld [vmem:[%s6961_s9 + $0x900] ss:$16 sps:$4 sm:$0xff]   ;;  %v6188_v16 = vld [vmem:[%s6961_s9 + $0x6ac] ss:$16 sps:$4 sm:$0xff]  }
 0x127   : > { %v6171_v63 = vld [vmem:[%s6961_s9 + $0xae0] ss:$16 sps:$4 sm:$0xff]  }
 0x128   : > { %3465 = vmatpush1.bf16.msra.mxu0 %v6105_v11  ;;  %v412_v11 = vrot.slane %v411_v1, 1 }
 0x129   : > { %3506 = vmatpush1.bf16.msra.mxu1 %v6108_v12  ;;  %3466 = vmatprep.subr.bf16.mxu0 %v6113_v13  ;;  %v6149_v12 = vld [vmem:[%s6961_s9 + $0x764] ss:$16 sps:$4 sm:$0xff]  }
 0x12a   : > { %3507 = vmatprep.subr.bf16.mxu1 %v6116_v14  ;;  %v6152_v13 = vld [vmem:[%s6961_s9 + $0x964] ss:$16 sps:$4 sm:$0xff]   ;;  %v383_v14 = vadd.f32 %v382_v3, %v381_v55  ;;  %v413_v20 = vadd.f32 %v412_v11, %v411_v1  ;;  %v7285_v55 = vsub.s32 0, %v7271_v40 }
 0x12b   : > { %v6179_v3 = vld [vmem:[%s6961_s9 + $0xac4] ss:$16 sps:$4 sm:$0xff]  }
 0x12c   : > { %3467 = vmatpush1.bf16.msra.mxu0 %v6111_v18  ;;  %v498_v18 = vmul.f32 0.125, %v347_v9  ;;  %v504_v22 = vmul.f32 0.125, %v383_v14  ;;  %v509_v32 = vmul.f32 0.125, %v413_v20  ;;  %v6183_v20 = vld [vmem:[%s6961_s9 + $0xaa0] ss:$16 sps:$4 sm:$0xff]  }
 0x12d   : > { %3508 = vmatpush1.bf16.msra.mxu1 %v6114_v19  ;;  %3468 = vmatprep.subr.bf16.mxu0 %v6119_v21  ;;  %v377_v19 = vadd.f32 %v376_v10, %v375_v0  ;;  %v6155_v21 = vld [vmem:[%s6961_s9 + $0x744] ss:$16 sps:$4 sm:$0xff]   ;;  %v6177_v10 = vld [vmem:[%s6961_s9 + $0xac0] ss:$16 sps:$4 sm:$0xff]  }
 0x12e   : > { %3509 = vmatprep.subr.bf16.mxu1 %v6122_v26  ;;  %v6158_v26 = vld [vmem:[%s6961_s9 + $0x944] ss:$16 sps:$4 sm:$0xff]   ;;  %v545_v42 = vpack.c.bf16 %v509_v32, %v509_v32  ;;  %v6195_v32 = vld [vmem:[%s6961_s9 + $0xa60] ss:$16 sps:$4 sm:$0xff]  }
 0x130   : > { %3469 = vmatpush1.bf16.msra.mxu0 %v6117_v28  ;;  %v6153_v28 = vld [vmem:[%s6961_s9 + $0x740] ss:$16 sps:$4 sm:$0xff]  }
 0x131   : > { %3510 = vmatpush1.bf16.msra.mxu1 %v6120_v30  ;;  %3470 = vmatprep.subr.bf16.mxu0 %v6125_v31  ;;  %v534_v30 = vpack.c.bf16 %v498_v18, %v498_v18  ;;  %v503_v31 = vmul.f32 0.125, %v377_v19 }
 0x132   : > { %3511 = vmatprep.subr.bf16.mxu1 %v6128_v35  ;;  %v540_v35 = vpack.c.bf16 %v504_v22, %v504_v22  ;;  %v6186_v22 = vld [vmem:[%s6961_s9 + $0x6a8] ss:$16 sps:$4 sm:$0xff]  }
 0x133   : > { %v539_v41 = vpack.c.bf16 %v503_v31, %v503_v31  ;;  %v2464_v45 = vunpack.c.l.b16 %v534_v30  ;;  %v6197_v30 = vld [vmem:[%s6961_s9 + $0xa64] ss:$16 sps:$4 sm:$0xff]   ;;  %v6200_v31 = vld [vmem:[%s6961_s9 + $0x66c] ss:$16 sps:$4 sm:$0xff]  }
 0x134   : > { %3471 = vmatpush2.bf16.msra.mxu0 %v6123_v36  ;;  %v536_v36 = vpack.c.bf16 %v500_v23, %v500_v23  ;;  %v2470_v46 = vunpack.c.l.b16 %v540_v35  ;;  %v6191_v23 = vld [vmem:[%s6961_s9 + $0xa84] ss:$16 sps:$4 sm:$0xff]   ;;  %v6206_v35 = vld [vmem:[%s6961_s9 + $0x64c] ss:$16 sps:$4 sm:$0xff]  }
 0x135   : > { %3512 = vmatpush2.bf16.msra.mxu1 %v6126_v37  ;;  %3472 = vmatprep.subr.bf16.mxu0 %v6131_v38  ;;  %v542_v37 = vpack.c.bf16 %v506_v25, %v506_v25  ;;  %v6164_v38 = vld [vmem:[%s6961_s9 + $0x924] ss:$16 sps:$4 sm:$0xff]   ;;  %v2469_v52 = vunpack.c.l.b16 %v539_v41 }
 0x136   : > { %3513 = vmatprep.subr.bf16.mxu1 %v6134_v39  ;;  %v6159_v39 = vld [vmem:[%s6961_s9 + $0x720] ss:$16 sps:$4 sm:$0xff]   ;;  %v2466_v47 = vunpack.c.l.b16 %v536_v36  ;;  %v2476_v56 = vsel %vm1227_vm0, %v2470_v46, %v2464_v45  ;;  %v6215_v45 = vld [vmem:[%s6961_s9 + $0xa04] ss:$16 sps:$4 sm:$0xff]  }
 0x137   : > { %v2472_v48 = vunpack.c.l.b16 %v542_v37  ;;  %v6201_v36 = vld [vmem:[%s6961_s9 + $0xa40] ss:$16 sps:$4 sm:$0xff]   ;;  %v6204_v37 = vld [vmem:[%s6961_s9 + $0x648] ss:$16 sps:$4 sm:$0xff]  }
 0x138   : > { %3473 = vmatpush2.bf16.msra.mxu0 %v6129_v49  ;;  %v6170_v49 = vld [vmem:[%s6961_s9 + $0x904] ss:$16 sps:$4 sm:$0xff]  }
 0x139   : > { %3514 = vmatpush2.bf16.msra.mxu1 %v6132_v50  ;;  %3474 = vmatprep.subr.bf16.mxu0 %v6137_v53  ;;  %v6165_v50 = vld [vmem:[%s6961_s9 + $0x700] ss:$16 sps:$4 sm:$0xff]   ;;  %v2475_v53 = vunpack.c.l.b16 %v545_v42  ;;  %v2478_v57 = vsel %vm1227_vm0, %v2472_v48, %v2466_v47  ;;  %v6218_v48 = vld [vmem:[%s6961_s9 + $0x60c] ss:$16 sps:$4 sm:$0xff]  }
 0x13a   : > { %3515 = vmatprep.subr.bf16.mxu1 %v6140_v54  ;;  %v1137_v54 = vld [vmem:[%s7279_s4] sm:$0xf]  ;;  %v256_v42 = vld [vmem:[%s6953_s30 + $0xb0] sm:$0xff] }
 0x13b   : > { %v2481_v0 = vsel %vm1227_vm0, %v2475_v53, %v2469_v52  ;;  %v1146_v1 = vrot.slane %v1137_v54, %v7285_v55  ;;  %v250_v41 = vld [vmem:[%s6953_s30 + $0x80] sm:$0xff]  ;;  %v402_v47 = vrot.slane %v256_v42, 4 }
 0x13c   : > { %3475 = vmatpush2.bf16.msra.mxu0 %v6135_v61  ;;  %v7292_v61 = vsub.s32 1, %v7271_v40  ;;  %v366_v46 = vrot.slane %v250_v41, 4 }
 0x13d   : > { %3516 = vmatpush2.bf16.msra.mxu1 %v6138_v27  ;;  %3476 = vmatprep.subr.bf16.mxu0 %v6143_v62  ;;  %v7294_v27 = vpack.c.b16 %v2476_v56, %v2476_v56  ;;  %v7296_v62 = vpack.c.b16 %v2478_v57, %v2478_v57  ;;  %v403_v53 = vadd.f32 %v402_v47, %v256_v42  ;;  %v6219_v56 = vld [vmem:[%s6961_s9 + $0xbe0] ss:$16 sps:$4 sm:$0xff]   ;;  %v6222_v57 = vld [vmem:[%s6961_s9 + $0x7e8] ss:$16 sps:$4 sm:$0xff]  }
 0x13e   : > { %3517 = vmatprep.subr.bf16.mxu1 %v6146_v2  ;;  %v6174_v2 = vld [vmem:[%s6961_s9 + $0x6e8] ss:$16 sps:$4 sm:$0xff]   ;;  %v1150_v5 = vrot.slane %v1137_v54, %v7292_v61  ;;  %v367_v52 = vadd.f32 %v366_v46, %v250_v41  ;;  %v6224_v54 = vld [vmem:[%s6961_s9 + $0x7ec] ss:$16 sps:$4 sm:$0xff]   ;;  %v6261_v42 = vld [vmem:[%s6961_s9 + $0xb00] ss:$16 sps:$4 sm:$0xff]  }
 0x13f   : > { %v6266_v41 = vld [vmem:[%s6961_s9 + $0x70c] ss:$16 sps:$4 sm:$0xff]   ;;  %v6267_v47 = vld [vmem:[%s6961_s9 + $0x8e8] ss:$16 sps:$4 sm:$0xff]  }
 0x140   : > { %3477 = vmatpush2.bf16.msra.mxu0 %v6141_v6  ;;  %v7305_v6 = vpack.c.b16 %v2481_v0, %v2481_v0  ;;  %v6230_v0 = vld [vmem:[%s6961_s9 + $0x7cc] ss:$16 sps:$4 sm:$0xff]  }
 0x141   : > { %3518 = vmatpush2.bf16.msra.mxu1 %v6144_v7  ;;  %3478 = vmatprep.subr.bf16.mxu0 %v6149_v12  ;;  %v6180_v12 = vld [vmem:[%s6961_s9 + $0x6c8] ss:$16 sps:$4 sm:$0xff]   ;;  %v6272_v46 = vld [vmem:[%s6961_s9 + $0xaec] ss:$16 sps:$4 sm:$0xff]  }
 0x142   : > { %3519 = vmatprep.subr.bf16.mxu1 %v6152_v13  ;;  %v6185_v13 = vld [vmem:[%s6961_s9 + $0xaa4] ss:$16 sps:$4 sm:$0xff]  }
 0x144   : > { %3479 = vmatpush2.bf16.msra.mxu0 %v6147_v17 }
 0x145   : > { %3520 = vmatpush2.bf16.msra.mxu1 %v6150_v24  ;;  %3480 = vmatprep.subr.bf16.mxu0 %v6155_v21 }
 0x146   : > { %3521 = vmatprep.subr.bf16.mxu1 %v6158_v26 }
 0x148   : > { %3481 = vmatpush2.bf16.msra.mxu0 %v6153_v28  ;;  %v6189_v28 = vld [vmem:[%s6961_s9 + $0xa80] ss:$16 sps:$4 sm:$0xff]  }
 0x149   : > { %3522 = vmatpush2.bf16.msra.mxu1 %v6156_v33  ;;  %3482 = vmatprep.subr.bf16.mxu0 %v6161_v34  ;;  %v6198_v33 = vld [vmem:[%s6961_s9 + $0x668] ss:$16 sps:$4 sm:$0xff]   ;;  %v6203_v34 = vld [vmem:[%s6961_s9 + $0xa44] ss:$16 sps:$4 sm:$0xff]  }
 0x14a   : > { %3523 = vmatprep.subr.bf16.mxu1 %v6164_v38  ;;  %v6209_v38 = vld [vmem:[%s6961_s9 + $0xa24] ss:$16 sps:$4 sm:$0xff]  }
 0x14c   : > { %3483 = vmatpush2.bf16.msra.mxu0 %v6159_v39  ;;  %v6212_v39 = vld [vmem:[%s6961_s9 + $0x62c] ss:$16 sps:$4 sm:$0xff]  }
 0x14d   : > { %3524 = vmatpush2.bf16.msra.mxu1 %v6162_v43  ;;  %3484 = vmatprep.subr.bf16.mxu0 %v6167_v44  ;;  %v6207_v43 = vld [vmem:[%s6961_s9 + $0xa20] ss:$16 sps:$4 sm:$0xff]   ;;  %v6210_v44 = vld [vmem:[%s6961_s9 + $0x628] ss:$16 sps:$4 sm:$0xff]  }
 0x14e   : > { %3525 = vmatprep.subr.bf16.mxu1 %v6170_v49  ;;  %v6213_v49 = vld [vmem:[%s6961_s9 + $0xa00] ss:$16 sps:$4 sm:$0xff]  }
 0x150   : > { %3485 = vmatpush2.bf16.msra.mxu0 %v6165_v50  ;;  %v6216_v50 = vld [vmem:[%s6961_s9 + $0x608] ss:$16 sps:$4 sm:$0xff]  }
 0x151   : > { %3526 = vmatpush2.bf16.msra.mxu1 %v6168_v51  ;;  %3536 = vmatprep.subr.bf16.mxu0 %v6173_v58  ;;  %v6221_v51 = vld [vmem:[%s6961_s9 + $0xbe4] ss:$16 sps:$4 sm:$0xff]  }
 0x152   : > { %3577 = vmatprep.subr.bf16.mxu1 %v6176_v59  ;;  %v6227_v58 = vld [vmem:[%s6961_s9 + $0xbc4] ss:$16 sps:$4 sm:$0xff]   ;;  %v368_v59 = vrot.slane %v367_v52, 2 }
 0x153   : > { %v2240_v7 = vpop.f32.mrf.mxu0  ;;  %3487 = vmatmul.mubr.bf16.vlgmr.msra.gmra.mxu0 %v7294_v27 }
 0x154   : > { %v2281_v9 = vpop.f32.mrf.mxu1  ;;  %3528 = vmatmul.mubr.bf16.vlgmr.msra.gmra.mxu1 %v7296_v62  ;;  %v2241_v11 = vadd.f32 %v2240_v7, %v1146_v1  ;;  %3537 = vmatpush1.bf16.msra.mxu0 %v6171_v63  ;;  %v404_v63 = vrot.slane %v403_v53, 2  ;;  %v6225_v1 = vld [vmem:[%s6961_s9 + $0xbc0] ss:$16 sps:$4 sm:$0xff]   ;;  %v6236_v7 = vld [vmem:[%s6961_s9 + $0x7ac] ss:$16 sps:$4 sm:$0xff]  }
 0x155   : > { %3578 = vmatpush1.bf16.msra.mxu1 %v6174_v2  ;;  %v2242_v14 = vpop.f32.mrf.mxu0  ;;  %3538 = vmatprep.subr.bf16.mxu0 %v6179_v3  ;;  %v6228_v2 = vld [vmem:[%s6961_s9 + $0x7c8] ss:$16 sps:$4 sm:$0xff]   ;;  %v6233_v3 = vld [vmem:[%s6961_s9 + $0xba4] ss:$16 sps:$4 sm:$0xff]  }
 0x156   : > { %v2283_v15 = vpop.f32.mrf.mxu1  ;;  %3579 = vmatprep.subr.bf16.mxu1 %v6182_v4  ;;  %v7313_v17 = vadd.f32 %v2281_v9, %v2241_v11  ;;  %v2243_v24 = vadd.f32 %v2242_v14, %v1150_v5  ;;  %3568 = vmatprep.mubr.bf16.mxu0 %v7305_v6  ;;  %v369_v4 = vadd.f32 %v368_v59, %v367_v52  ;;  %v6231_v9 = vld [vmem:[%s6961_s9 + $0xba0] ss:$16 sps:$4 sm:$0xff]   ;;  %v6242_v14 = vld [vmem:[%s6961_s9 + $0x78c] ss:$16 sps:$4 sm:$0xff]   ;;  %v6273_v52 = vld [vmem:[%s6961_s9 + $0x8c8] ss:$16 sps:$4 sm:$0xff]  }
 0x157   : > { %3609 = vmatprep.mubr.bf16.mxu1 %v7207_v60  ;;  %v2244_v18 = vpop.f32.mrf.mxu0  ;;  %v6194_v60 = vld [vmem:[%s6961_s9 + $0x68c] ss:$16 sps:$4 sm:$0xff]   ;;  %v405_v5 = vadd.f32 %v404_v63, %v403_v53  ;;  %v6276_v53 = vld [vmem:[%s6961_s9 + $0xac8] ss:$16 sps:$4 sm:$0xff]  }
 0x158   : > { %v2285_v19 = vpop.f32.mrf.mxu1  ;;  %v7318_v21 = vadd.f32 %v2283_v15, %v2243_v24  ;;  %3539 = vmatpush1.bf16.msra.mxu0 %v6177_v10  ;;  %v6234_v10 = vld [vmem:[%s6961_s9 + $0x7a8] ss:$16 sps:$4 sm:$0xff]   ;;  %v370_v11 = vrot.slane %v369_v4, 1  ;;  %v6237_v15 = vld [vmem:[%s6961_s9 + $0xb80] ss:$16 sps:$4 sm:$0xff]  }
 0x159   : > { %3580 = vmatpush1.bf16.msra.mxu1 %v6180_v12  ;;  %v2245_v25 = vpop.f32.mrf.mxu0  ;;  %3540 = vmatprep.subr.bf16.mxu0 %v6185_v13  ;;  %v406_v12 = vrot.slane %v405_v5, 1  ;;  %v6239_v13 = vld [vmem:[%s6961_s9 + $0xb84] ss:$16 sps:$4 sm:$0xff]   ;;  %v6281_v63 = vld [vmem:[%s6961_s9 + $0x8ac] ss:$16 sps:$4 sm:$0xff]  }
 0x15a   : > { %v2286_v26 = vpop.f32.mrf.mxu1  ;;  %3581 = vmatprep.subr.bf16.mxu1 %v6188_v16  ;;  %v6240_v16 = vld [vmem:[%s6961_s9 + $0x788] ss:$16 sps:$4 sm:$0xff]   ;;  %v371_v24 = vadd.f32 %v370_v11, %v369_v4  ;;  %v6245_v19 = vld [vmem:[%s6961_s9 + $0xb64] ss:$16 sps:$4 sm:$0xff]   ;;  %v6296_v11 = vld [vmem:[%s6961_s9 + $0xa6c] ss:$16 sps:$4 sm:$0xff]  }
 0x15b   : > { %v407_v18 = vadd.f32 %v406_v12, %v405_v5  ;;  %v6291_v12 = vld [vmem:[%s6961_s9 + $0x868] ss:$16 sps:$4 sm:$0xff]  }
 0x15c   : > { %3541 = vmatpush1.bf16.msra.mxu0 %v6183_v20  ;;  %v6248_v20 = vld [vmem:[%s6961_s9 + $0x76c] ss:$16 sps:$4 sm:$0xff]   ;;  %v502_v25 = vmul.f32 0.125, %v371_v24  ;;  %v6300_v24 = vld [vmem:[%s6961_s9 + $0xa48] ss:$16 sps:$4 sm:$0xff]  }
 0x15d   : > { %3582 = vmatpush1.bf16.msra.mxu1 %v6186_v22  ;;  %3542 = vmatprep.subr.bf16.mxu0 %v6191_v23  ;;  %v6243_v22 = vld [vmem:[%s6961_s9 + $0xb60] ss:$16 sps:$4 sm:$0xff]   ;;  %v6246_v23 = vld [vmem:[%s6961_s9 + $0x768] ss:$16 sps:$4 sm:$0xff]   ;;  %v508_v26 = vmul.f32 0.125, %v407_v18 }
 0x15e   : > { %3583 = vmatprep.subr.bf16.mxu1 %v6194_v60  ;;  %v6251_v60 = vld [vmem:[%s6961_s9 + $0xb44] ss:$16 sps:$4 sm:$0xff]   ;;  %v6305_v18 = vld [vmem:[%s6961_s9 + $0x82c] ss:$16 sps:$4 sm:$0xff]  }
 0x160   : > { %3543 = vmatpush1.bf16.msra.mxu0 %v6189_v28  ;;  %v6254_v28 = vld [vmem:[%s6961_s9 + $0x74c] ss:$16 sps:$4 sm:$0xff]  }
 0x161   : > { %3584 = vmatpush1.bf16.msra.mxu1 %v6192_v29  ;;  %3544 = vmatprep.subr.bf16.mxu0 %v6197_v30  ;;  %v6249_v29 = vld [vmem:[%s6961_s9 + $0xb40] ss:$16 sps:$4 sm:$0xff]   ;;  %v6252_v30 = vld [vmem:[%s6961_s9 + $0x748] ss:$16 sps:$4 sm:$0xff]  }
 0x162   : > { %3585 = vmatprep.subr.bf16.mxu1 %v6200_v31  ;;  %v538_v31 = vpack.c.bf16 %v502_v25, %v502_v25  ;;  %v265_v25 = vld [vmem:[%s6953_s30 + $0xf8] sm:$0xff] }
 0x164   : > { %3545 = vmatpush1.bf16.msra.mxu0 %v6195_v32  ;;  %v544_v32 = vpack.c.bf16 %v508_v26, %v508_v26  ;;  %v261_v26 = vld [vmem:[%s6953_s30 + $0xd8] sm:$0xff] }
 0x165   : > { %3586 = vmatpush1.bf16.msra.mxu1 %v6198_v33  ;;  %3546 = vmatprep.subr.bf16.mxu0 %v6203_v34  ;;  %v6257_v33 = vld [vmem:[%s6961_s9 + $0xb24] ss:$16 sps:$4 sm:$0xff]   ;;  %v6260_v34 = vld [vmem:[%s6961_s9 + $0x72c] ss:$16 sps:$4 sm:$0xff]  }
 0x166   : > { %3587 = vmatprep.subr.bf16.mxu1 %v6206_v35  ;;  %v6255_v35 = vld [vmem:[%s6961_s9 + $0xb20] ss:$16 sps:$4 sm:$0xff]  }
 0x168   : > { %3547 = vmatpush1.bf16.msra.mxu0 %v6201_v36  ;;  %v6258_v36 = vld [vmem:[%s6961_s9 + $0x728] ss:$16 sps:$4 sm:$0xff]  }
 0x169   : > { %3588 = vmatpush1.bf16.msra.mxu1 %v6204_v37  ;;  %3548 = vmatprep.subr.bf16.mxu0 %v6209_v38  ;;  %v2468_v37 = vunpack.c.l.b16 %v538_v31  ;;  %v2474_v38 = vunpack.c.l.b16 %v544_v32  ;;  %v456_v31 = vrot.slane %v265_v25, 4  ;;  %v432_v32 = vrot.slane %v261_v26, 4 }
 0x16a   : > { %3589 = vmatprep.subr.bf16.mxu1 %v6212_v39  ;;  %v6263_v39 = vld [vmem:[%s6961_s9 + $0xb04] ss:$16 sps:$4 sm:$0xff]  }
 0x16c   : > { %3549 = vmatpush1.bf16.msra.mxu0 %v6207_v43  ;;  %v6264_v43 = vld [vmem:[%s6961_s9 + $0x708] ss:$16 sps:$4 sm:$0xff]  }
 0x16d   : > { %3590 = vmatpush1.bf16.msra.mxu1 %v6210_v44  ;;  %3550 = vmatprep.subr.bf16.mxu0 %v6215_v45  ;;  %v2480_v44 = vsel %vm1227_vm0, %v2474_v38, %v2468_v37  ;;  %v6269_v45 = vld [vmem:[%s6961_s9 + $0x8ec] ss:$16 sps:$4 sm:$0xff]  }
 0x16e   : > { %3591 = vmatprep.subr.bf16.mxu1 %v6218_v48  ;;  %v7379_v48 = vpack.c.b16 %v2480_v44, %v2480_v44  ;;  %v6320_v37 = vld [vmem:[%s6961_s9 + $0xbec] ss:$16 sps:$4 sm:$0xff]   ;;  %v6318_v44 = vld [vmem:[%s6961_s9 + $0xbe8] ss:$16 sps:$4 sm:$0xff]  }
 0x170   : > { %3551 = vmatpush1.bf16.msra.mxu0 %v6213_v49  ;;  %v6270_v49 = vld [vmem:[%s6961_s9 + $0xae8] ss:$16 sps:$4 sm:$0xff]  }
 0x171   : > { %3592 = vmatpush1.bf16.msra.mxu1 %v6216_v50  ;;  %3552 = vmatprep.subr.bf16.mxu0 %v6221_v51  ;;  %v6275_v50 = vld [vmem:[%s6961_s9 + $0x8cc] ss:$16 sps:$4 sm:$0xff]  }
 0x172   : > { %3593 = vmatprep.subr.bf16.mxu1 %v6224_v54  ;;  %v6278_v51 = vld [vmem:[%s6961_s9 + $0xacc] ss:$16 sps:$4 sm:$0xff]  }
 0x174   : > { %3553 = vmatpush2.bf16.msra.mxu0 %v6219_v56 }
 0x175   : > { %3594 = vmatpush2.bf16.msra.mxu1 %v6222_v57  ;;  %3554 = vmatprep.subr.bf16.mxu0 %v6227_v58 }
 0x176   : > { %3595 = vmatprep.subr.bf16.mxu1 %v6230_v0  ;;  %v6284_v0 = vld [vmem:[%s6961_s9 + $0xaac] ss:$16 sps:$4 sm:$0xff]  }
 0x178   : > { %3555 = vmatpush2.bf16.msra.mxu0 %v6225_v1 }
 0x179   : > { %3596 = vmatpush2.bf16.msra.mxu1 %v6228_v2  ;;  %3556 = vmatprep.subr.bf16.mxu0 %v6233_v3  ;;  %v6279_v2 = vld [vmem:[%s6961_s9 + $0x8a8] ss:$16 sps:$4 sm:$0xff]  }
 0x17a   : > { %3597 = vmatprep.subr.bf16.mxu1 %v6236_v7  ;;  %v6282_v3 = vld [vmem:[%s6961_s9 + $0xaa8] ss:$16 sps:$4 sm:$0xff]   ;;  %v6287_v7 = vld [vmem:[%s6961_s9 + $0x88c] ss:$16 sps:$4 sm:$0xff]  }
 0x17c   : > { %3557 = vmatpush2.bf16.msra.mxu0 %v6231_v9  ;;  %v6288_v9 = vld [vmem:[%s6961_s9 + $0xa88] ss:$16 sps:$4 sm:$0xff]  }
 0x17d   : > { %3598 = vmatpush2.bf16.msra.mxu1 %v6234_v10  ;;  %3558 = vmatprep.subr.bf16.mxu0 %v6239_v13  ;;  %v6293_v10 = vld [vmem:[%s6961_s9 + $0x86c] ss:$16 sps:$4 sm:$0xff]   ;;  %v6294_v13 = vld [vmem:[%s6961_s9 + $0xa68] ss:$16 sps:$4 sm:$0xff]  }
 0x17e   : > { %3599 = vmatprep.subr.bf16.mxu1 %v6242_v14  ;;  %v6299_v14 = vld [vmem:[%s6961_s9 + $0x84c] ss:$16 sps:$4 sm:$0xff]  }
 0x180   : > { %3559 = vmatpush2.bf16.msra.mxu0 %v6237_v15  ;;  %v6302_v15 = vld [vmem:[%s6961_s9 + $0xa4c] ss:$16 sps:$4 sm:$0xff]  }
 0x181   : > { %3600 = vmatpush2.bf16.msra.mxu1 %v6240_v16  ;;  %3560 = vmatprep.subr.bf16.mxu0 %v6245_v19  ;;  %v6297_v16 = vld [vmem:[%s6961_s9 + $0x848] ss:$16 sps:$4 sm:$0xff]   ;;  %v6308_v19 = vld [vmem:[%s6961_s9 + $0xa2c] ss:$16 sps:$4 sm:$0xff]  }
 0x182   : > { %3601 = vmatprep.subr.bf16.mxu1 %v6248_v20  ;;  %v259_v20 = vld [vmem:[%s6953_s30 + $0xc8] sm:$0xff] }
 0x184   : > { %3561 = vmatpush2.bf16.msra.mxu0 %v6243_v22  ;;  %v6303_v22 = vld [vmem:[%s6961_s9 + $0x828] ss:$16 sps:$4 sm:$0xff]  }
 0x185   : > { %3602 = vmatpush2.bf16.msra.mxu1 %v6246_v23  ;;  %3562 = vmatprep.subr.bf16.mxu0 %v6251_v60  ;;  %v6306_v23 = vld [vmem:[%s6961_s9 + $0xa28] ss:$16 sps:$4 sm:$0xff]  }
 0x186   : > { %3603 = vmatprep.subr.bf16.mxu1 %v6254_v28  ;;  %v267_v60 = vld [vmem:[%s6953_s30 + $0x108] sm:$0xff] }
 0x187   : > { %v6311_v28 = vld [vmem:[%s6961_s9 + $0x80c] ss:$16 sps:$4 sm:$0xff]  }
 0x188   : > { %3563 = vmatpush2.bf16.msra.mxu0 %v6249_v29  ;;  %v6314_v29 = vld [vmem:[%s6961_s9 + $0xa0c] ss:$16 sps:$4 sm:$0xff]  }
 0x189   : > { %3604 = vmatpush2.bf16.msra.mxu1 %v6252_v30  ;;  %3564 = vmatprep.subr.bf16.mxu0 %v6257_v33  ;;  %v420_v30 = vrot.slane %v259_v20, 4  ;;  %v468_v33 = vrot.slane %v267_v60, 4 }
 0x18a   : > { %3605 = vmatprep.subr.bf16.mxu1 %v6260_v34  ;;  %v6309_v34 = vld [vmem:[%s6961_s9 + $0x808] ss:$16 sps:$4 sm:$0xff]  }
 0x18b   : > { %v421_v38 = vadd.f32 %v420_v30, %v259_v20  ;;  %v6347_v20 = vld [vmem:[%s6961_s9 + $0x94c] ss:$16 sps:$4 sm:$0xff]  }
 0x18c   : > { %3565 = vmatpush2.bf16.msra.mxu0 %v6255_v35  ;;  %v6312_v35 = vld [vmem:[%s6961_s9 + $0xa08] ss:$16 sps:$4 sm:$0xff]   ;;  %v6353_v30 = vld [vmem:[%s6961_s9 + $0x92c] ss:$16 sps:$4 sm:$0xff]  }
 0x18d   : > { %3606 = vmatpush2.bf16.msra.mxu1 %v6258_v36  ;;  %3566 = vmatprep.subr.bf16.mxu0 %v6263_v39  ;;  %v6317_v36 = vld [vmem:[%s6961_s9 + $0x9ec] ss:$16 sps:$4 sm:$0xff]   ;;  %v457_v39 = vadd.f32 %v456_v31, %v265_v25 }
 0x18e   : > { %3607 = vmatprep.subr.bf16.mxu1 %v6266_v41  ;;  %v433_v41 = vadd.f32 %v432_v32, %v261_v26  ;;  %v6356_v31 = vld [vmem:[%s6961_s9 + $0xb2c] ss:$16 sps:$4 sm:$0xff]  }
 0x190   : > { %3567 = vmatpush2.bf16.msra.mxu0 %v6261_v42  ;;  %v469_v42 = vadd.f32 %v468_v33, %v267_v60 }
 0x191   : > { %3608 = vmatpush2.bf16.msra.mxu1 %v6264_v43  ;;  %3618 = vmatprep.subr.bf16.mxu0 %v6269_v45  ;;  %v6315_v43 = vld [vmem:[%s6961_s9 + $0x9e8] ss:$16 sps:$4 sm:$0xff]   ;;  %v6323_v45 = vld [vmem:[%s6961_s9 + $0x9cc] ss:$16 sps:$4 sm:$0xff]  }
 0x192   : > { %3659 = vmatprep.subr.bf16.mxu1 %v6272_v46  ;;  %v6326_v46 = vld [vmem:[%s6961_s9 + $0xbcc] ss:$16 sps:$4 sm:$0xff]  }
 0x193   : > { %v2322_v54 = vpop.f32.mrf.mxu0  ;;  %3569 = vmatmul.mubr.bf16.vlgmr.msra.gmra.mxu0 %v7379_v48 }
 0x194   : > { %v7386_v56 = vpop.f32.mrf.mxu1  ;;  %3610 = vmatmul.mubr.bf16.vlgmr.msra.gmra.mxu1 %v7294_v27  ;;  %v7391_v57 = vadd.f32 %v2322_v54, %v7313_v17  ;;  %3619 = vmatpush1.bf16.msra.mxu0 %v6267_v47  ;;  %v422_v47 = vrot.slane %v421_v38, 2  ;;  %v6329_v54 = vld [vmem:[%s6961_s9 + $0x9ac] ss:$16 sps:$4 sm:$0xff]  }
 0x195   : > { %3660 = vmatpush1.bf16.msra.mxu1 %v6270_v49  ;;  %v2324_v58 = vpop.f32.mrf.mxu0  ;;  %3620 = vmatprep.subr.bf16.mxu0 %v6275_v50  ;;  %v458_v49 = vrot.slane %v457_v39, 2  ;;  %v434_v50 = vrot.slane %v433_v41, 2 }
 0x196   : > { %v7393_v59 = vpop.f32.mrf.mxu1  ;;  %3661 = vmatprep.subr.bf16.mxu1 %v6278_v51  ;;  %v7398_v1 = vadd.f32 %v2324_v58, %v7318_v21  ;;  %3650 = vmatprep.mubr.bf16.mxu0 %v7211_v8  ;;  %v6290_v8 = vld [vmem:[%s6961_s9 + $0xa8c] ss:$16 sps:$4 sm:$0xff]   ;;  %v470_v51 = vrot.slane %v469_v42, 2 }
 0x197   : > { %3691 = vmatprep.mubr.bf16.mxu1 %v7305_v6  ;;  %v2326_v27 = vpop.f32.mrf.mxu0  ;;  %v6285_v6 = vld [vmem:[%s6961_s9 + $0x888] ss:$16 sps:$4 sm:$0xff]   ;;  %v6332_v58 = vld [vmem:[%s6961_s9 + $0xbac] ss:$16 sps:$4 sm:$0xff]  }
 0x198   : > { %v2367_v17 = vpop.f32.mrf.mxu1  ;;  %v4960_v4 = vcombine.low %v7391_v57, %v7398_v1  ;;  %3621 = vmatpush1.bf16.msra.mxu0 %v6273_v52  ;;  %v6321_v52 = vld [vmem:[%s6961_s9 + $0x9c8] ss:$16 sps:$4 sm:$0xff]   ;;  %v6387_v57 = vld [vmem:[%s6961_s9 + $0xc60] ss:$16 sps:$4 sm:$0xff]  }
 0x199   : > { %3662 = vmatpush1.bf16.msra.mxu1 %v6276_v53  ;;  %v2327_v5 = vpop.f32.mrf.mxu0  ;;  %3622 = vmatprep.subr.bf16.mxu0 %v6281_v63  ;;  %v6324_v53 = vld [vmem:[%s6961_s9 + $0xbc8] ss:$16 sps:$4 sm:$0xff]   ;;  %v423_v63 = vadd.f32 %v422_v47, %v421_v38  ;;  %v6359_v38 = vld [vmem:[%s6961_s9 + $0x90c] ss:$16 sps:$4 sm:$0xff]   ;;  %v6390_v1 = vld [vmem:[%s6961_s9 + $0xe60] ss:$16 sps:$4 sm:$0xff]  }
 0x19a   : > { %v2368_v21 = vpop.f32.mrf.mxu1  ;;  %3663 = vmatprep.subr.bf16.mxu1 %v6284_v0  ;;  %v459_v0 = vadd.f32 %v458_v49, %v457_v39  ;;  %v6327_v27 = vld [vmem:[%s6961_s9 + $0x9a8] ss:$16 sps:$4 sm:$0xff]   ;;  %v6335_v5 = vld [vmem:[%s6961_s9 + $0x98c] ss:$16 sps:$4 sm:$0xff]  }
 0x19b   : > { %v6330_v17 = vld [vmem:[%s6961_s9 + $0xba8] ss:$16 sps:$4 sm:$0xff]   ;;  %v6338_v21 = vld [vmem:[%s6961_s9 + $0xb8c] ss:$16 sps:$4 sm:$0xff]  }
 0x19c   : > { %3623 = vmatpush1.bf16.msra.mxu0 %v6279_v2  ;;  %v435_v2 = vadd.f32 %v434_v50, %v433_v41  ;;  %v6362_v39 = vld [vmem:[%s6961_s9 + $0xb0c] ss:$16 sps:$4 sm:$0xff]   ;;  %v7461_v41 = vsub.s32 2, %v7271_v40  ;;  %v6357_v47 = vld [vmem:[%s6961_s9 + $0x908] ss:$16 sps:$4 sm:$0xff]  }
 0x19d   : > { %3664 = vmatpush1.bf16.msra.mxu1 %v6282_v3  ;;  %3624 = vmatprep.subr.bf16.mxu0 %v6287_v7  ;;  %v471_v3 = vadd.f32 %v470_v51, %v469_v42  ;;  %v424_v7 = vrot.slane %v423_v63, 1  ;;  %v6360_v49 = vld [vmem:[%s6961_s9 + $0xb08] ss:$16 sps:$4 sm:$0xff]   ;;  %v6365_v50 = vld [vmem:[%s6961_s9 + $0xce4] ss:$16 sps:$4 sm:$0xff]  }
 0x19e   : > { %3665 = vmatprep.subr.bf16.mxu1 %v6290_v8  ;;  %v460_v8 = vrot.slane %v459_v0, 1  ;;  %v6368_v51 = vld [vmem:[%s6961_s9 + $0xee4] ss:$16 sps:$4 sm:$0xff]  }
 0x1a0   : > { %3625 = vmatpush1.bf16.msra.mxu0 %v6285_v6  ;;  %v436_v6 = vrot.slane %v435_v2, 1 }
 0x1a1   : > { %3666 = vmatpush1.bf16.msra.mxu1 %v6288_v9  ;;  %3626 = vmatprep.subr.bf16.mxu0 %v6293_v10  ;;  %v472_v9 = vrot.slane %v471_v3, 1  ;;  %v6333_v10 = vld [vmem:[%s6961_s9 + $0x988] ss:$16 sps:$4 sm:$0xff]  }
 0x1a2   : > { %3667 = vmatprep.subr.bf16.mxu1 %v6296_v11  ;;  %v6336_v11 = vld [vmem:[%s6961_s9 + $0xb88] ss:$16 sps:$4 sm:$0xff]  }
 0x1a4   : > { %3627 = vmatpush1.bf16.msra.mxu0 %v6291_v12  ;;  %v6341_v12 = vld [vmem:[%s6961_s9 + $0x96c] ss:$16 sps:$4 sm:$0xff]  }
 0x1a5   : > { %3668 = vmatpush1.bf16.msra.mxu1 %v6294_v13  ;;  %3628 = vmatprep.subr.bf16.mxu0 %v6299_v14  ;;  %v6344_v13 = vld [vmem:[%s6961_s9 + $0xb6c] ss:$16 sps:$4 sm:$0xff]   ;;  %v425_v14 = vadd.f32 %v424_v7, %v423_v63  ;;  %v6784_v63 = vmov 1983009808  }
 0x1a6   : > { %3669 = vmatprep.subr.bf16.mxu1 %v6302_v15  ;;  %v461_v15 = vadd.f32 %v460_v8, %v459_v0  ;;  %v4963_v0 = vunpack.c.l.s4 %v6784_v63  ;;  %v269_v63 = vld [vmem:[%s6953_s30 + $0x118] sm:$0xff] }
 0x1a8   : > { %3629 = vmatpush1.bf16.msra.mxu0 %v6297_v16  ;;  %v437_v16 = vadd.f32 %v436_v6, %v435_v2  ;;  %v517_v25 = vmul.f32 0.125, %v461_v15 }
 0x1a9   : > { %3670 = vmatpush1.bf16.msra.mxu1 %v6300_v24  ;;  %3630 = vmatprep.subr.bf16.mxu0 %v6305_v18  ;;  %v473_v24 = vadd.f32 %v472_v9, %v471_v3  ;;  %v6339_v18 = vld [vmem:[%s6961_s9 + $0x968] ss:$16 sps:$4 sm:$0xff]   ;;  %v6363_v3 = vld [vmem:[%s6961_s9 + $0xce0] ss:$16 sps:$4 sm:$0xff]  }
 0x1aa   : > { %3671 = vmatprep.subr.bf16.mxu1 %v6308_v19  ;;  %v6342_v19 = vld [vmem:[%s6961_s9 + $0xb68] ss:$16 sps:$4 sm:$0xff]   ;;  %v513_v26 = vmul.f32 0.125, %v437_v16  ;;  %v553_v33 = vpack.c.bf16 %v517_v25, %v517_v25  ;;  %v6377_v16 = vld [vmem:[%s6961_s9 + $0xca4] ss:$16 sps:$4 sm:$0xff]  }
 0x1ab   : > { %v519_v60 = vmul.f32 0.125, %v473_v24  ;;  %v6380_v24 = vld [vmem:[%s6961_s9 + $0xea4] ss:$16 sps:$4 sm:$0xff]  }
 0x1ac   : > { %3631 = vmatpush1.bf16.msra.mxu0 %v6303_v22  ;;  %v6350_v22 = vld [vmem:[%s6961_s9 + $0xb4c] ss:$16 sps:$4 sm:$0xff]  }
 0x1ad   : > { %3672 = vmatpush1.bf16.msra.mxu1 %v6306_v23  ;;  %3632 = vmatprep.subr.bf16.mxu0 %v6311_v28  ;;  %v511_v23 = vmul.f32 0.125, %v425_v14  ;;  %v6345_v28 = vld [vmem:[%s6961_s9 + $0x948] ss:$16 sps:$4 sm:$0xff]  }
 0x1ae   : > { %3673 = vmatprep.subr.bf16.mxu1 %v6314_v29  ;;  %v6348_v29 = vld [vmem:[%s6961_s9 + $0xb48] ss:$16 sps:$4 sm:$0xff]  }
 0x1af   : > { %v547_v32 = vpack.c.bf16 %v511_v23, %v511_v23  ;;  %v6378_v23 = vld [vmem:[%s6961_s9 + $0xea0] ss:$16 sps:$4 sm:$0xff]  }
 0x1b0   : > { %3633 = vmatpush1.bf16.msra.mxu0 %v6309_v34  ;;  %v549_v34 = vpack.c.bf16 %v513_v26, %v513_v26 }
 0x1b1   : > { %3674 = vmatpush1.bf16.msra.mxu1 %v6312_v35  ;;  %3634 = vmatprep.subr.bf16.mxu0 %v6317_v36  ;;  %v555_v35 = vpack.c.bf16 %v519_v60, %v519_v60  ;;  %v6351_v36 = vld [vmem:[%s6961_s9 + $0x928] ss:$16 sps:$4 sm:$0xff]   ;;  %v3713_v42 = vunpack.c.l.b16 %v547_v32  ;;  %v6383_v60 = vld [vmem:[%s6961_s9 + $0xc84] ss:$16 sps:$4 sm:$0xff]   ;;  %v6384_v32 = vld [vmem:[%s6961_s9 + $0xe80] ss:$16 sps:$4 sm:$0xff]  }
 0x1b2   : > { %3675 = vmatprep.subr.bf16.mxu1 %v6320_v37  ;;  %v6354_v37 = vld [vmem:[%s6961_s9 + $0xb28] ss:$16 sps:$4 sm:$0xff]  }
 0x1b4   : > { %3635 = vmatpush2.bf16.msra.mxu0 %v6315_v43  ;;  %v3719_v43 = vunpack.c.l.b16 %v553_v33  ;;  %v6389_v33 = vld [vmem:[%s6961_s9 + $0xc64] ss:$16 sps:$4 sm:$0xff]  }
 0x1b5   : > { %3676 = vmatpush2.bf16.msra.mxu1 %v6318_v44  ;;  %3636 = vmatprep.subr.bf16.mxu0 %v6323_v45  ;;  %v3715_v44 = vunpack.c.l.b16 %v549_v34  ;;  %v3721_v45 = vunpack.c.l.b16 %v555_v35  ;;  %v6392_v34 = vld [vmem:[%s6961_s9 + $0xe64] ss:$16 sps:$4 sm:$0xff]  }
 0x1b6   : > { %3677 = vmatprep.subr.bf16.mxu1 %v6326_v46  ;;  %v7464_v46 = vsub.s32 3, %v7271_v40 }
 0x1b8   : > { %3637 = vmatpush2.bf16.msra.mxu0 %v6321_v52  ;;  %v6651_v52 = vld [vmem:[%s7279_s4] sm:$0xf] }
 0x1b9   : > { %3678 = vmatpush2.bf16.msra.mxu1 %v6324_v53  ;;  %3638 = vmatprep.subr.bf16.mxu0 %v6329_v54  ;;  %v1154_v53 = vrot.slane %v6651_v52, %v7461_v41  ;;  %v3725_v54 = vsel %vm1227_vm0, %v3719_v43, %v3713_v42  ;;  %v1158_v2 = vrot.slane %v6651_v52, %v7464_v46  ;;  %v6404_v42 = vld [vmem:[%s6961_s9 + $0xe24] ss:$16 sps:$4 sm:$0xff]  }
 0x1ba   : > { %3679 = vmatprep.subr.bf16.mxu1 %v6332_v58  ;;  %v3727_v58 = vsel %vm1227_vm0, %v3721_v45, %v3715_v44  ;;  %v7480_v7 = vpack.c.b16 %v3725_v54, %v3725_v54  ;;  %v258_v43 = vld [vmem:[%s6953_s30 + $0xc0] sm:$0xff]  ;;  %v264_v44 = vld [vmem:[%s6953_s30 + $0xf0] sm:$0xff] }
 0x1bb   : > { %v7482_v8 = vpack.c.b16 %v3727_v58, %v3727_v58  ;;  %v260_v45 = vld [vmem:[%s6953_s30 + $0xd0] sm:$0xff]  ;;  %v450_v52 = vrot.slane %v264_v44, 4  ;;  %v263_v58 = vld [vmem:[%s6953_s30 + $0xe8] sm:$0xff] }
 0x1bc   : > { %3639 = vmatpush2.bf16.msra.mxu0 %v6327_v27  ;;  %v6366_v27 = vld [vmem:[%s6961_s9 + $0xee0] ss:$16 sps:$4 sm:$0xff]  }
 0x1bd   : > { %3680 = vmatpush2.bf16.msra.mxu1 %v6330_v17  ;;  %3640 = vmatprep.subr.bf16.mxu0 %v6335_v5  ;;  %v6371_v17 = vld [vmem:[%s6961_s9 + $0xcc4] ss:$16 sps:$4 sm:$0xff]  }
 0x1be   : > { %3681 = vmatprep.subr.bf16.mxu1 %v6338_v21  ;;  %v6374_v5 = vld [vmem:[%s6961_s9 + $0xec4] ss:$16 sps:$4 sm:$0xff]   ;;  %v2364_v21 = vadd.f32 %v7386_v56, %v1154_v53  ;;  %v6372_v56 = vld [vmem:[%s6961_s9 + $0xec0] ss:$16 sps:$4 sm:$0xff]   ;;  %v426_v53 = vrot.slane %v260_v45, 4 }
 0x1c0   : > { %3641 = vmatpush2.bf16.msra.mxu0 %v6333_v10  ;;  %v4964_v10 = vunpack.c.0.s8 %v4963_v0  ;;  %v6407_v0 = vld [vmem:[%s6961_s9 + $0xc04] ss:$16 sps:$4 sm:$0xff]  }
 0x1c1   : > { %3682 = vmatpush2.bf16.msra.mxu1 %v6336_v11  ;;  %3642 = vmatprep.subr.bf16.mxu0 %v6341_v12  ;;  %v2366_v11 = vadd.f32 %v7393_v59, %v1158_v2  ;;  %v6410_v2 = vld [vmem:[%s6961_s9 + $0xe04] ss:$16 sps:$4 sm:$0xff]  }
 0x1c2   : > { %3683 = vmatprep.subr.bf16.mxu1 %v6344_v13  ;;  %v6369_v13 = vld [vmem:[%s6961_s9 + $0xcc0] ss:$16 sps:$4 sm:$0xff]  }
 0x1c4   : > { %3643 = vmatpush2.bf16.msra.mxu0 %v6339_v18  ;;  %v7494_v18 = vsub.s32 %v4964_v10, %v7271_v40 }
 0x1c5   : > { %3684 = vmatpush2.bf16.msra.mxu1 %v6342_v19  ;;  %3644 = vmatprep.subr.bf16.mxu0 %v6347_v20 }
 0x1c6   : > { %3685 = vmatprep.subr.bf16.mxu1 %v6350_v22  ;;  %v6375_v22 = vld [vmem:[%s6961_s9 + $0xca0] ss:$16 sps:$4 sm:$0xff]   ;;  %v4968_v40 = vrot.slane %v4960_v4, %v7494_v18  ;;  %v6395_v4 = vld [vmem:[%s6961_s9 + $0xc44] ss:$16 sps:$4 sm:$0xff]  }
 0x1c8   : > { %3645 = vmatpush2.bf16.msra.mxu0 %v6345_v28  ;;  %v6386_v28 = vld [vmem:[%s6961_s9 + $0xe84] ss:$16 sps:$4 sm:$0xff]  }
 0x1c9   : > { %3686 = vmatpush2.bf16.msra.mxu1 %v6348_v29  ;;  %3646 = vmatprep.subr.bf16.mxu0 %v6353_v30 }
 0x1ca   : > { %3687 = vmatprep.subr.bf16.mxu1 %v6356_v31  ;;  %v6381_v31 = vld [vmem:[%s6961_s9 + $0xc80] ss:$16 sps:$4 sm:$0xff]  }
 0x1cc   : > { %3647 = vmatpush2.bf16.msra.mxu0 %v6351_v36  ;;  %v6398_v36 = vld [vmem:[%s6961_s9 + $0xe44] ss:$16 sps:$4 sm:$0xff]  }
 0x1cd   : > { %3688 = vmatpush2.bf16.msra.mxu1 %v6354_v37  ;;  %3648 = vmatprep.subr.bf16.mxu0 %v6359_v38  ;;  %v6393_v37 = vld [vmem:[%s6961_s9 + $0xc40] ss:$16 sps:$4 sm:$0xff]  }
 0x1ce   : > { %3689 = vmatprep.subr.bf16.mxu1 %v6362_v39  ;;  %v6396_v38 = vld [vmem:[%s6961_s9 + $0xe40] ss:$16 sps:$4 sm:$0xff]   ;;  %v6401_v39 = vld [vmem:[%s6961_s9 + $0xc24] ss:$16 sps:$4 sm:$0xff]  }
 0x1d0   : > { %3649 = vmatpush2.bf16.msra.mxu0 %v6357_v47  ;;  %v266_v47 = vld [vmem:[%s6953_s30 + $0x100] sm:$0xff] }
 0x1d1   : > { %3690 = vmatpush2.bf16.msra.mxu1 %v6360_v49  ;;  %4702 = vmatprep.subr.bf16.mxu0 %v6365_v50  ;;  %v6399_v49 = vld [vmem:[%s6961_s9 + $0xc20] ss:$16 sps:$4 sm:$0xff]   ;;  %v462_v54 = vrot.slane %v266_v47, 4 }
 0x1d2   : > { %4743 = vmatprep.subr.bf16.mxu1 %v6368_v51  ;;  %v6402_v50 = vld [vmem:[%s6961_s9 + $0xe20] ss:$16 sps:$4 sm:$0xff]   ;;  %v414_v51 = vrot.slane %v258_v43, 4 }
 0x1d3   : > { %v2404_v6 = vpop.f32.mrf.mxu0  ;;  %3651 = vmatmul.mubr.bf16.vlgmr.msra.gmra.mxu0 %v7296_v62  ;;  %v463_v10 = vadd.f32 %v462_v54, %v266_v47 }
 0x1d4   : > { %v2445_v9 = vpop.f32.mrf.mxu1  ;;  %3692 = vmatmul.mubr.bf16.vlgmr.msra.gmra.mxu1 %v7379_v48  ;;  %v2405_v12 = vadd.f32 %v2404_v6, %v2364_v21  ;;  %4703 = vmatpush1.bf16.msra.mxu0 %v6363_v3  ;;  %v415_v3 = vadd.f32 %v414_v51, %v258_v43  ;;  %v6408_v21 = vld [vmem:[%s6961_s9 + $0xe00] ss:$16 sps:$4 sm:$0xff]   ;;  %v451_v6 = vadd.f32 %v450_v52, %v264_v44  ;;  %v6440_v51 = vld [vmem:[%s6961_s9 + $0xf64] ss:$16 sps:$4 sm:$0xff]  }
 0x1d5   : > { %4744 = vmatpush1.bf16.msra.mxu1 %v6366_v27  ;;  %v2406_v14 = vpop.f32.mrf.mxu0  ;;  %4704 = vmatprep.subr.bf16.mxu0 %v6371_v17  ;;  %v444_v27 = vrot.slane %v263_v58, 4  ;;  %v480_v17 = vrot.slane %v269_v63, 4  ;;  %v6429_v43 = vld [vmem:[%s6961_s9 + $0xd80] ss:$16 sps:$4 sm:$0xff]  }
 0x1d6   : > { %v2447_v15 = vpop.f32.mrf.mxu1  ;;  %4745 = vmatprep.subr.bf16.mxu1 %v6374_v5  ;;  %v2407_v62 = vadd.f32 %v2406_v14, %v2366_v11  ;;  %4734 = vmatprep.mubr.bf16.mxu0 %v7480_v7  ;;  %v2446_v19 = vadd.f32 %v2445_v9, %v2405_v12  ;;  %v6405_v5 = vld [vmem:[%s6961_s9 + $0xc00] ss:$16 sps:$4 sm:$0xff]   ;;  %v427_v9 = vadd.f32 %v426_v53, %v260_v45  ;;  %v6413_v11 = vld [vmem:[%s6961_s9 + $0xde4] ss:$16 sps:$4 sm:$0xff]  }
 0x1d7   : > { %4775 = vmatprep.mubr.bf16.mxu1 %v7482_v8  ;;  %v2408_v48 = vpop.f32.mrf.mxu0  ;;  %v6416_v12 = vld [vmem:[%s6961_s9 + $0xfe4] ss:$16 sps:$4 sm:$0xff]   ;;  %v445_v14 = vadd.f32 %v444_v27, %v263_v58  ;;  %v6432_v44 = vld [vmem:[%s6961_s9 + $0xf80] ss:$16 sps:$4 sm:$0xff]  }
 0x1d8   : > { %v2449_v59 = vpop.f32.mrf.mxu1  ;;  %v2448_v20 = vadd.f32 %v2447_v15, %v2407_v62  ;;  %4705 = vmatpush1.bf16.msra.mxu0 %v6369_v13  ;;  %v6411_v13 = vld [vmem:[%s6961_s9 + $0xde0] ss:$16 sps:$4 sm:$0xff]   ;;  %v481_v15 = vadd.f32 %v480_v17, %v269_v63  ;;  %v428_v62 = vrot.slane %v427_v9, 2  ;;  %v464_v48 = vrot.slane %v463_v10, 2  ;;  %v6443_v27 = vld [vmem:[%s6961_s9 + $0xd44] ss:$16 sps:$4 sm:$0xff]  }
 0x1d9   : > { %4746 = vmatpush1.bf16.msra.mxu1 %v6372_v56  ;;  %v2409_v25 = vpop.f32.mrf.mxu0  ;;  %4706 = vmatprep.subr.bf16.mxu0 %v6377_v16  ;;  %v416_v56 = vrot.slane %v415_v3, 2  ;;  %v6414_v16 = vld [vmem:[%s6961_s9 + $0xfe0] ss:$16 sps:$4 sm:$0xff]   ;;  %v6419_v59 = vld [vmem:[%s6961_s9 + $0xdc4] ss:$16 sps:$4 sm:$0xff]  }
 0x1da   : > { %v2450_v26 = vpop.f32.mrf.mxu1  ;;  %4747 = vmatprep.subr.bf16.mxu1 %v6380_v24  ;;  %v4961_v29 = vcombine.low %v2446_v19, %v2448_v20  ;;  %v452_v24 = vrot.slane %v451_v6, 2  ;;  %v6422_v19 = vld [vmem:[%s6961_s9 + $0xfc4] ss:$16 sps:$4 sm:$0xff]   ;;  %v6417_v25 = vld [vmem:[%s6961_s9 + $0xdc0] ss:$16 sps:$4 sm:$0xff]  }
 0x1db   : > { %v417_v20 = vadd.f32 %v416_v56, %v415_v3  ;;  %v6420_v26 = vld [vmem:[%s6961_s9 + $0xfc0] ss:$16 sps:$4 sm:$0xff]   ;;  %v6446_v17 = vld [vmem:[%s6961_s9 + $0xf44] ss:$16 sps:$4 sm:$0xff]  }
 0x1dc   : > { %v4975_v30 = vrot.slane %v4961_v29, %v7494_v18  ;;  %4707 = vmatpush1.bf16.msra.mxu0 %v6375_v22  ;;  %v446_v22 = vrot.slane %v445_v14, 2  ;;  %v465_v29 = vadd.f32 %v464_v48, %v463_v10  ;;  %v6435_v52 = vld [vmem:[%s6961_s9 + $0xd60] ss:$16 sps:$4 sm:$0xff]   ;;  %v6449_v56 = vld [vmem:[%s6961_s9 + $0xd24] ss:$16 sps:$4 sm:$0xff]  }
 0x1dd   : > { %4748 = vmatpush1.bf16.msra.mxu1 %v6378_v23  ;;  %4708 = vmatprep.subr.bf16.mxu0 %v6383_v60  ;;  %v482_v23 = vrot.slane %v481_v15, 2  ;;  %v453_v60 = vadd.f32 %v452_v24, %v451_v6  ;;  %v6438_v63 = vld [vmem:[%s6961_s9 + $0xf60] ss:$16 sps:$4 sm:$0xff]  }
 0x1de   : > { %4749 = vmatprep.subr.bf16.mxu1 %v6386_v28  ;;  %v4976_v35 = vcombine.low %v4968_v40, %v4975_v30  ;;  %v429_v28 = vadd.f32 %v428_v62, %v427_v9  ;;  %v6425_v40 = vld [vmem:[%s6961_s9 + $0xda4] ss:$16 sps:$4 sm:$0xff]   ;;  %v6441_v9 = vld [vmem:[%s6961_s9 + $0xd40] ss:$16 sps:$4 sm:$0xff]  }
 0x1df   : > { %v6428_v30 = vld [vmem:[%s6961_s9 + $0xfa4] ss:$16 sps:$4 sm:$0xff]   ;;  %v6444_v10 = vld [vmem:[%s6961_s9 + $0xf40] ss:$16 sps:$4 sm:$0xff]  }
 0x1e0   : > { %5014 = vst [vmem:[%s7510_s8] sm:$0xff] %v4976_v35  ;;  %4709 = vmatpush1.bf16.msra.mxu0 %v6381_v31  ;;  %v6423_v31 = vld [vmem:[%s6961_s9 + $0xda0] ss:$16 sps:$4 sm:$0xff]  }
 0x1e1   : > { %4750 = vmatpush1.bf16.msra.mxu1 %v6384_v32  ;;  %4710 = vmatprep.subr.bf16.mxu0 %v6389_v33  ;;  %v418_v32 = vrot.slane %v417_v20, 1  ;;  %v447_v33 = vadd.f32 %v446_v22, %v445_v14  ;;  %v6426_v35 = vld [vmem:[%s6961_s9 + $0xfa0] ss:$16 sps:$4 sm:$0xff]   ;;  %v6452_v14 = vld [vmem:[%s6961_s9 + $0xf24] ss:$16 sps:$4 sm:$0xff]  }
 0x1e2   : > { %4751 = vmatprep.subr.bf16.mxu1 %v6392_v34  ;;  %v483_v34 = vadd.f32 %v482_v23, %v481_v15  ;;  %v6447_v24 = vld [vmem:[%s6961_s9 + $0xd20] ss:$16 sps:$4 sm:$0xff]   ;;  %v6455_v22 = vld [vmem:[%s6961_s9 + $0xd04] ss:$16 sps:$4 sm:$0xff]  }
 0x1e3   : > { %v6450_v62 = vld [vmem:[%s6961_s9 + $0xf20] ss:$16 sps:$4 sm:$0xff]   ;;  %v6458_v23 = vld [vmem:[%s6961_s9 + $0xf04] ss:$16 sps:$4 sm:$0xff]  }
 0x1e4   : > { %4711 = vmatpush1.bf16.msra.mxu0 %v6387_v57  ;;  %v454_v57 = vrot.slane %v453_v60, 1 }
 0x1e5   : > { %4752 = vmatpush1.bf16.msra.mxu1 %v6390_v1  ;;  %4712 = vmatprep.subr.bf16.mxu0 %v6395_v4  ;;  %v430_v1 = vrot.slane %v429_v28, 1  ;;  %v466_v4 = vrot.slane %v465_v29, 1 }
 0x1e6   : > { %4753 = vmatprep.subr.bf16.mxu1 %v6398_v36  ;;  %v6431_v36 = vld [vmem:[%s6961_s9 + $0xd84] ss:$16 sps:$4 sm:$0xff]   ;;  %v455_v45 = vadd.f32 %v454_v57, %v453_v60  ;;  %v6453_v60 = vld [vmem:[%s6961_s9 + $0xd00] ss:$16 sps:$4 sm:$0xff]  }
 0x1e7   : > { %v431_v47 = vadd.f32 %v430_v1, %v429_v28  ;;  %v6456_v28 = vld [vmem:[%s6961_s9 + $0xf00] ss:$16 sps:$4 sm:$0xff]  }
 0x1e8   : > { %4713 = vmatpush1.bf16.msra.mxu0 %v6393_v37  ;;  %v6434_v37 = vld [vmem:[%s6961_s9 + $0xf84] ss:$16 sps:$4 sm:$0xff]   ;;  %v6459_v1 = vld [vmem:[%s6961_s9 + $0x10e0] ss:$16 sps:$4 sm:$0xff]  }
 0x1e9   : > { %4754 = vmatpush1.bf16.msra.mxu1 %v6396_v38  ;;  %4714 = vmatprep.subr.bf16.mxu0 %v6401_v39  ;;  %v419_v38 = vadd.f32 %v418_v32, %v417_v20  ;;  %v448_v39 = vrot.slane %v447_v33, 1  ;;  %v6464_v32 = vld [vmem:[%s6961_s9 + $0xcec] ss:$16 sps:$4 sm:$0xff]  }
 0x1ea   : > { %4755 = vmatprep.subr.bf16.mxu1 %v6404_v42  ;;  %v484_v42 = vrot.slane %v483_v34, 1 }
 0x1eb   : > { %v510_v53 = vmul.f32 0.125, %v419_v38  ;;  %v449_v54 = vadd.f32 %v448_v39, %v447_v33 }
 0x1ec   : > { %4715 = vmatpush1.bf16.msra.mxu0 %v6399_v49  ;;  %v467_v49 = vadd.f32 %v466_v4, %v465_v29  ;;  %v485_v58 = vadd.f32 %v484_v42, %v483_v34  ;;  %v6462_v4 = vld [vmem:[%s6961_s9 + $0xce8] ss:$16 sps:$4 sm:$0xff]  }
 0x1ed   : > { %4756 = vmatpush1.bf16.msra.mxu1 %v6402_v50  ;;  %4716 = vmatprep.subr.bf16.mxu0 %v6407_v0  ;;  %v6437_v50 = vld [vmem:[%s6961_s9 + $0xd64] ss:$16 sps:$4 sm:$0xff]   ;;  %v516_v0 = vmul.f32 0.125, %v455_v45  ;;  %v6465_v45 = vld [vmem:[%s6961_s9 + $0x10c0] ss:$16 sps:$4 sm:$0xff]  }
 0x1ee   : > { %4757 = vmatprep.subr.bf16.mxu1 %v6410_v2  ;;  %v512_v2 = vmul.f32 0.125, %v431_v47  ;;  %v518_v3 = vmul.f32 0.125, %v467_v49  ;;  %v521_v6 = vmul.f32 0.125, %v485_v58  ;;  %v6468_v47 = vld [vmem:[%s6961_s9 + $0xcc8] ss:$16 sps:$4 sm:$0xff]  }
 0x1f0   : > { %4717 = vmatpush1.bf16.msra.mxu0 %v6405_v5  ;;  %v546_v5 = vpack.c.bf16 %v510_v53, %v510_v53 }
 0x1f1   : > { %4758 = vmatpush1.bf16.msra.mxu1 %v6408_v21  ;;  %4718 = vmatprep.subr.bf16.mxu0 %v6413_v11  ;;  %v515_v21 = vmul.f32 0.125, %v449_v54  ;;  %v552_v11 = vpack.c.bf16 %v516_v0, %v516_v0 }
 0x1f2   : > { %4759 = vmatprep.subr.bf16.mxu1 %v6416_v12  ;;  %v548_v12 = vpack.c.bf16 %v512_v2, %v512_v2  ;;  %v3712_v48 = vunpack.c.l.b16 %v546_v5  ;;  %v6471_v2 = vld [vmem:[%s6961_s9 + $0x10a0] ss:$16 sps:$4 sm:$0xff]   ;;  %v6479_v5 = vld [vmem:[%s6961_s9 + $0x1084] ss:$16 sps:$4 sm:$0xff]  }
 0x1f3   : > { %v551_v15 = vpack.c.bf16 %v515_v21, %v515_v21  ;;  %v6477_v21 = vld [vmem:[%s6961_s9 + $0x1080] ss:$16 sps:$4 sm:$0xff]  }
 0x1f4   : > { %4719 = vmatpush2.bf16.msra.mxu0 %v6411_v13  ;;  %v554_v13 = vpack.c.bf16 %v518_v3, %v518_v3  ;;  %v6474_v3 = vld [vmem:[%s6961_s9 + $0xca8] ss:$16 sps:$4 sm:$0xff]  }
 0x1f5   : > { %4760 = vmatpush2.bf16.msra.mxu1 %v6414_v16  ;;  %4720 = vmatprep.subr.bf16.mxu0 %v6419_v59  ;;  %v557_v16 = vpack.c.bf16 %v521_v6, %v521_v6  ;;  %v3718_v59 = vunpack.c.l.b16 %v552_v11  ;;  %v6480_v6 = vld [vmem:[%s6961_s9 + $0xc88] ss:$16 sps:$4 sm:$0xff]   ;;  %v6483_v11 = vld [vmem:[%s6961_s9 + $0x1060] ss:$16 sps:$4 sm:$0xff]  }
 0x1f6   : > { %4761 = vmatprep.subr.bf16.mxu1 %v6422_v19  ;;  %v3714_v19 = vunpack.c.l.b16 %v548_v12  ;;  %v3720_v20 = vunpack.c.l.b16 %v554_v13  ;;  %v6486_v12 = vld [vmem:[%s6961_s9 + $0xc68] ss:$16 sps:$4 sm:$0xff]   ;;  %v6491_v13 = vld [vmem:[%s6961_s9 + $0x1044] ss:$16 sps:$4 sm:$0xff]  }
 0x1f7   : > { %v3724_v29 = vsel %vm1227_vm0, %v3718_v59, %v3712_v48  ;;  %v268_v48 = vld [vmem:[%s6953_s30 + $0x110] sm:$0xff] }
 0x1f8   : > { %4721 = vmatpush2.bf16.msra.mxu0 %v6417_v25  ;;  %v3717_v25 = vunpack.c.l.b16 %v551_v15  ;;  %v7572_v33 = vpack.c.b16 %v3724_v29, %v3724_v29  ;;  %v6492_v15 = vld [vmem:[%s6961_s9 + $0xc48] ss:$16 sps:$4 sm:$0xff]   ;;  %v6495_v59 = vld [vmem:[%s6961_s9 + $0x1020] ss:$16 sps:$4 sm:$0xff]  }
 0x1f9   : > { %4762 = vmatpush2.bf16.msra.mxu1 %v6420_v26  ;;  %4722 = vmatprep.subr.bf16.mxu0 %v6425_v40  ;;  %v3723_v26 = vunpack.c.l.b16 %v557_v16  ;;  %v3726_v40 = vsel %vm1227_vm0, %v3720_v20, %v3714_v19  ;;  %v6497_v16 = vld [vmem:[%s6961_s9 + $0x1024] ss:$16 sps:$4 sm:$0xff]   ;;  %v6498_v19 = vld [vmem:[%s6961_s9 + $0xc28] ss:$16 sps:$4 sm:$0xff]  }
 0x1fa   : > { %4763 = vmatprep.subr.bf16.mxu1 %v6428_v30  ;;  %v7568_v30 = vld [vmem:[%s7279_s4 + $0x4] sm:$0xf]  ;;  %v7574_v34 = vpack.c.b16 %v3726_v40, %v3726_v40 }
 0x1fb   : > { %v1162_v57 = vrot.slane %v7568_v30, %v7285_v55  ;;  %v1166_v38 = vrot.slane %v7568_v30, %v7292_v61  ;;  %v6509_v40 = vld [vmem:[%s6961_s9 + $0x11e4] ss:$16 sps:$4 sm:$0xff]  }
 0x1fc   : > { %4723 = vmatpush2.bf16.msra.mxu0 %v6423_v31  ;;  %v6461_v31 = vld [vmem:[%s6961_s9 + $0x10e4] ss:$16 sps:$4 sm:$0xff]  }
 0x1fd   : > { %4764 = vmatpush2.bf16.msra.mxu1 %v6426_v35  ;;  %4724 = vmatprep.subr.bf16.mxu0 %v6431_v36  ;;  %v3729_v35 = vsel %vm1227_vm0, %v3723_v26, %v3717_v25  ;;  %v6467_v36 = vld [vmem:[%s6961_s9 + $0x10c4] ss:$16 sps:$4 sm:$0xff]   ;;  %v6506_v25 = vld [vmem:[%s6961_s9 + $0xc0c] ss:$16 sps:$4 sm:$0xff]   ;;  %v6501_v26 = vld [vmem:[%s6961_s9 + $0x1000] ss:$16 sps:$4 sm:$0xff]  }
 0x1fe   : > { %4765 = vmatprep.subr.bf16.mxu1 %v6434_v37  ;;  %v6470_v37 = vld [vmem:[%s6961_s9 + $0xccc] ss:$16 sps:$4 sm:$0xff]   ;;  %v7585_v39 = vpack.c.b16 %v3729_v35, %v3729_v35  ;;  %v6510_v35 = vld [vmem:[%s6961_s9 + $0xde8] ss:$16 sps:$4 sm:$0xff]  }
 0x200   : > { %4725 = vmatpush2.bf16.msra.mxu0 %v6429_v43 }
 0x201   : > { %4766 = vmatpush2.bf16.msra.mxu1 %v6432_v44  ;;  %4726 = vmatprep.subr.bf16.mxu0 %v6437_v50 }
 0x202   : > { %4767 = vmatprep.subr.bf16.mxu1 %v6440_v51  ;;  %v6473_v51 = vld [vmem:[%s6961_s9 + $0x10a4] ss:$16 sps:$4 sm:$0xff]  }
 0x204   : > { %4727 = vmatpush2.bf16.msra.mxu0 %v6435_v52  ;;  %v6476_v52 = vld [vmem:[%s6961_s9 + $0xcac] ss:$16 sps:$4 sm:$0xff]  }
 0x205   : > { %4768 = vmatpush2.bf16.msra.mxu1 %v6438_v63  ;;  %4728 = vmatprep.subr.bf16.mxu0 %v6443_v27 }
 0x206   : > { %4769 = vmatprep.subr.bf16.mxu1 %v6446_v17 }
 0x208   : > { %4729 = vmatpush2.bf16.msra.mxu0 %v6441_v9  ;;  %v6485_v9 = vld [vmem:[%s6961_s9 + $0x1064] ss:$16 sps:$4 sm:$0xff]  }
 0x209   : > { %4770 = vmatpush2.bf16.msra.mxu1 %v6444_v10  ;;  %4730 = vmatprep.subr.bf16.mxu0 %v6449_v56  ;;  %v6488_v10 = vld [vmem:[%s6961_s9 + $0xc6c] ss:$16 sps:$4 sm:$0xff]  }
 0x20a   : > { %4771 = vmatprep.subr.bf16.mxu1 %v6452_v14  ;;  %v6494_v56 = vld [vmem:[%s6961_s9 + $0xc4c] ss:$16 sps:$4 sm:$0xff]   ;;  %v6489_v14 = vld [vmem:[%s6961_s9 + $0x1040] ss:$16 sps:$4 sm:$0xff]  }
 0x20c   : > { %4731 = vmatpush2.bf16.msra.mxu0 %v6447_v24  ;;  %v6500_v24 = vld [vmem:[%s6961_s9 + $0xc2c] ss:$16 sps:$4 sm:$0xff]  }
 0x20d   : > { %4772 = vmatpush2.bf16.msra.mxu1 %v6450_v62  ;;  %4732 = vmatprep.subr.bf16.mxu0 %v6455_v22  ;;  %v262_v62 = vld [vmem:[%s6953_s30 + $0xe0] sm:$0xff]  ;;  %v474_v22 = vrot.slane %v268_v48, 4  ;;  %s6712_s30 = sshll.u32 %s6785_s16, 4  ;;  %s6713_s30 = int_to_ptr.vmem [resolvable:$false] %s6712_s30 }
 0x20e   : > { %4773 = vmatprep.subr.bf16.mxu1 %v6458_v23  ;;  %v438_v20 = vrot.slane %v262_v62, 4  ;;  %v6503_v23 = vld [vmem:[%s6961_s9 + $0x1004] ss:$16 sps:$4 sm:$0xff]   ;;  %s6714_s25 = scalar_lea.vmem %s6713_s30, 768  ;;  %p6715_p9 = scmp.lt.s32.totalorder %s7759_s10, %s6713_s30 }
 0x20f   : > { %v475_v29 = vadd.f32 %v474_v22, %v268_v48  ;;  %v6552_v22 = vld [vmem:[%s6961_s9 + $0xd08] ss:$16 sps:$4 sm:$0xff]   ;;  %p6716_p0 = scmp.lt.s32.totalorder %s6714_s25, %s6708_s29 }
 0x210   : > { %4733 = vmatpush2.bf16.msra.mxu0 %v6453_v60  ;;  %v6504_v60 = vld [vmem:[%s6961_s9 + $0xc08] ss:$16 sps:$4 sm:$0xff]  }
 0x211   : > { %4774 = vmatpush2.bf16.msra.mxu1 %v6456_v28  ;;  %4784 = vmatprep.subr.bf16.mxu0 %v6461_v31  ;;  %v439_v28 = vadd.f32 %v438_v20, %v262_v62  ;;  %v6512_v31 = vld [vmem:[%s6961_s9 + $0xdec] ss:$16 sps:$4 sm:$0xff]   ;;  %v6549_v20 = vld [vmem:[%s6961_s9 + $0x1100] ss:$16 sps:$4 sm:$0xff]   ;;  %p6717_p2 = por %p6716_p0, %p6715_p9 }
 0x212   : > { %4825 = vmatprep.subr.bf16.mxu1 %v6464_v32  ;;  %v6507_v32 = vld [vmem:[%s6961_s9 + $0x11e0] ss:$16 sps:$4 sm:$0xff]  }
 0x213   : > { %v3488_v42 = vpop.f32.mrf.mxu0  ;;  %4735 = vmatmul.mubr.bf16.vlgmr.msra.gmra.mxu0 %v7572_v33  ;;  %p6718_p4 = pnand %p6717_p2, %p6711_p7 }
 0x214   : > { %v3529_v43 = vpop.f32.mrf.mxu1  ;;  %4776 = vmatmul.mubr.bf16.vlgmr.msra.gmra.mxu1 %v7574_v34  ;;  %v3489_v44 = vadd.f32 %v3488_v42, %v1162_v57  ;;  %4785 = vmatpush1.bf16.msra.mxu0 %v6459_v1  ;;  %v440_v57 = vrot.slane %v439_v28, 2  ;;  %v476_v1 = vrot.slane %v475_v29, 2 }
 0x215   : > { %4826 = vmatpush1.bf16.msra.mxu1 %v6462_v4  ;;  %v3490_v49 = vpop.f32.mrf.mxu0  ;;  %4786 = vmatprep.subr.bf16.mxu0 %v6467_v36  ;;  %v6515_v4 = vld [vmem:[%s6961_s9 + $0x11c4] ss:$16 sps:$4 sm:$0xff]   ;;  %v6518_v36 = vld [vmem:[%s6961_s9 + $0xdcc] ss:$16 sps:$4 sm:$0xff]  }
 0x216   : > { %v3531_v50 = vpop.f32.mrf.mxu1  ;;  %4827 = vmatprep.subr.bf16.mxu1 %v6470_v37  ;;  %v7593_v53 = vadd.f32 %v3529_v43, %v3489_v44  ;;  %v3491_v54 = vadd.f32 %v3490_v49, %v1166_v38  ;;  %4816 = vmatprep.mubr.bf16.mxu0 %v7585_v39  ;;  %v6513_v37 = vld [vmem:[%s6961_s9 + $0x11c0] ss:$16 sps:$4 sm:$0xff]   ;;  %v6516_v38 = vld [vmem:[%s6961_s9 + $0xdc8] ss:$16 sps:$4 sm:$0xff]   ;;  %v441_v42 = vadd.f32 %v440_v57, %v439_v28  ;;  %v6521_v44 = vld [vmem:[%s6961_s9 + $0x11a4] ss:$16 sps:$4 sm:$0xff]  }
 0x217   : > { %4857 = vmatprep.mubr.bf16.mxu1 %v7480_v7  ;;  %v3492_v58 = vpop.f32.mrf.mxu0  ;;  %v6482_v7 = vld [vmem:[%s6961_s9 + $0xc8c] ss:$16 sps:$4 sm:$0xff]   ;;  %v477_v43 = vadd.f32 %v476_v1, %v475_v29  ;;  %v6522_v49 = vld [vmem:[%s6961_s9 + $0xda8] ss:$16 sps:$4 sm:$0xff]  }
 0x218   : > { %v3533_v63 = vpop.f32.mrf.mxu1  ;;  %v7597_v0 = vadd.f32 %v3531_v50, %v3491_v54  ;;  %4787 = vmatpush1.bf16.msra.mxu0 %v6465_v45  ;;  %v6524_v45 = vld [vmem:[%s6961_s9 + $0xdac] ss:$16 sps:$4 sm:$0xff]   ;;  %v442_v50 = vrot.slane %v441_v42, 1  ;;  %v6525_v58 = vld [vmem:[%s6961_s9 + $0x1180] ss:$16 sps:$4 sm:$0xff]  }
 0x219   : > { %4828 = vmatpush1.bf16.msra.mxu1 %v6468_v47  ;;  %v3493_v27 = vpop.f32.mrf.mxu0  ;;  %4788 = vmatprep.subr.bf16.mxu0 %v6473_v51  ;;  %v6519_v47 = vld [vmem:[%s6961_s9 + $0x11a0] ss:$16 sps:$4 sm:$0xff]   ;;  %v478_v51 = vrot.slane %v477_v43, 1  ;;  %v6530_v54 = vld [vmem:[%s6961_s9 + $0xd8c] ss:$16 sps:$4 sm:$0xff]  }
 0x21a   : > { %v3534_v17 = vpop.f32.mrf.mxu1  ;;  %4829 = vmatprep.subr.bf16.mxu1 %v6476_v52  ;;  %v6527_v52 = vld [vmem:[%s6961_s9 + $0x1184] ss:$16 sps:$4 sm:$0xff]   ;;  %v6528_v63 = vld [vmem:[%s6961_s9 + $0xd88] ss:$16 sps:$4 sm:$0xff]  }
 0x21b   : > { %v6533_v27 = vld [vmem:[%s6961_s9 + $0x1164] ss:$16 sps:$4 sm:$0xff]   ;;  %v6536_v17 = vld [vmem:[%s6961_s9 + $0xd6c] ss:$16 sps:$4 sm:$0xff]   ;;  %v6555_v28 = vld [vmem:[%s6961_s9 + $0xee8] ss:$16 sps:$4 sm:$0xff]  }
 0x21c   : > { %4789 = vmatpush1.bf16.msra.mxu0 %v6471_v2  ;;  %v443_v2 = vadd.f32 %v442_v50, %v441_v42  ;;  %v6558_v29 = vld [vmem:[%s6961_s9 + $0x10e8] ss:$16 sps:$4 sm:$0xff]   ;;  %v6572_v42 = vld [vmem:[%s6961_s9 + $0x10ac] ss:$16 sps:$4 sm:$0xff]  }
 0x21d   : > { %4830 = vmatpush1.bf16.msra.mxu1 %v6474_v3  ;;  %4790 = vmatprep.subr.bf16.mxu0 %v6479_v5  ;;  %v479_v3 = vadd.f32 %v478_v51, %v477_v43  ;;  %v6531_v5 = vld [vmem:[%s6961_s9 + $0x1160] ss:$16 sps:$4 sm:$0xff]   ;;  %v6561_v1 = vld [vmem:[%s6961_s9 + $0xec8] ss:$16 sps:$4 sm:$0xff]  }
 0x21e   : > { %4831 = vmatprep.subr.bf16.mxu1 %v6482_v7  ;;  %v6534_v7 = vld [vmem:[%s6961_s9 + $0xd68] ss:$16 sps:$4 sm:$0xff]  }
 0x21f   : > { %v6573_v50 = vld [vmem:[%s6961_s9 + $0xe88] ss:$16 sps:$4 sm:$0xff]  }
 0x220   : > { %4791 = vmatpush1.bf16.msra.mxu0 %v6477_v21  ;;  %v514_v21 = vmul.f32 0.125, %v443_v2  ;;  %v6576_v51 = vld [vmem:[%s6961_s9 + $0x1088] ss:$16 sps:$4 sm:$0xff]   ;;  %v6587_v2 = vld [vmem:[%s6961_s9 + $0xe4c] ss:$16 sps:$4 sm:$0xff]  }
 0x221   : > { %4832 = vmatpush1.bf16.msra.mxu1 %v6480_v6  ;;  %4792 = vmatprep.subr.bf16.mxu0 %v6485_v9  ;;  %v520_v6 = vmul.f32 0.125, %v479_v3  ;;  %v6539_v9 = vld [vmem:[%s6961_s9 + $0x1144] ss:$16 sps:$4 sm:$0xff]   ;;  %v6590_v3 = vld [vmem:[%s6961_s9 + $0x104c] ss:$16 sps:$4 sm:$0xff]  }
 0x222   : > { %4833 = vmatprep.subr.bf16.mxu1 %v6488_v10  ;;  %v6542_v10 = vld [vmem:[%s6961_s9 + $0xd4c] ss:$16 sps:$4 sm:$0xff]  }
 0x224   : > { %4793 = vmatpush1.bf16.msra.mxu0 %v6483_v11  ;;  %v6537_v11 = vld [vmem:[%s6961_s9 + $0x1140] ss:$16 sps:$4 sm:$0xff]  }
 0x225   : > { %4834 = vmatpush1.bf16.msra.mxu1 %v6486_v12  ;;  %4794 = vmatprep.subr.bf16.mxu0 %v6491_v13  ;;  %v6540_v12 = vld [vmem:[%s6961_s9 + $0xd48] ss:$16 sps:$4 sm:$0xff]   ;;  %v550_v13 = vpack.c.bf16 %v514_v21, %v514_v21 }
 0x226   : > { %4835 = vmatprep.subr.bf16.mxu1 %v6494_v56  ;;  %v556_v56 = vpack.c.bf16 %v520_v6, %v520_v6  ;;  %v6591_v21 = vld [vmem:[%s6961_s9 + $0xe28] ss:$16 sps:$4 sm:$0xff]  }
 0x227   : > { %v3716_v62 = vunpack.c.l.b16 %v550_v13  ;;  %v6594_v6 = vld [vmem:[%s6961_s9 + $0x1028] ss:$16 sps:$4 sm:$0xff]   ;;  %v6605_v13 = vld [vmem:[%s6961_s9 + $0xfec] ss:$16 sps:$4 sm:$0xff]  }
 0x228   : > { %4795 = vmatpush1.bf16.msra.mxu0 %v6489_v14  ;;  %v6545_v14 = vld [vmem:[%s6961_s9 + $0x1124] ss:$16 sps:$4 sm:$0xff]   ;;  %v3722_v48 = vunpack.c.l.b16 %v556_v56  ;;  %v6608_v56 = vld [vmem:[%s6961_s9 + $0x11ec] ss:$16 sps:$4 sm:$0xff]  }
 0x229   : > { %4836 = vmatpush1.bf16.msra.mxu1 %v6492_v15  ;;  %4796 = vmatprep.subr.bf16.mxu0 %v6497_v16  ;;  %v6548_v15 = vld [vmem:[%s6961_s9 + $0xd2c] ss:$16 sps:$4 sm:$0xff]   ;;  %v6543_v16 = vld [vmem:[%s6961_s9 + $0x1120] ss:$16 sps:$4 sm:$0xff]  }
 0x22a   : > { %4837 = vmatprep.subr.bf16.mxu1 %v6500_v24  ;;  %v6546_v24 = vld [vmem:[%s6961_s9 + $0xd28] ss:$16 sps:$4 sm:$0xff]  }
 0x22c   : > { %4797 = vmatpush1.bf16.msra.mxu0 %v6495_v59  ;;  %v6551_v59 = vld [vmem:[%s6961_s9 + $0x1104] ss:$16 sps:$4 sm:$0xff]  }
 0x22d   : > { %4838 = vmatpush1.bf16.msra.mxu1 %v6498_v19  ;;  %4798 = vmatprep.subr.bf16.mxu0 %v6503_v23  ;;  %v6554_v19 = vld [vmem:[%s6961_s9 + $0xd0c] ss:$16 sps:$4 sm:$0xff]   ;;  %v3728_v23 = vsel %vm1227_vm0, %v3722_v48, %v3716_v62  ;;  %v6609_v62 = vld [vmem:[%s6961_s9 + $0xfc8] ss:$16 sps:$4 sm:$0xff]  }
 0x22e   : > { %4839 = vmatprep.subr.bf16.mxu1 %v6506_v25  ;;  %v6557_v25 = vld [vmem:[%s6961_s9 + $0xeec] ss:$16 sps:$4 sm:$0xff]   ;;  %v6612_v48 = vld [vmem:[%s6961_s9 + $0x11c8] ss:$16 sps:$4 sm:$0xff]  }
 0x230   : > { %4799 = vmatpush1.bf16.msra.mxu0 %v6501_v26  ;;  %v6560_v26 = vld [vmem:[%s6961_s9 + $0x10ec] ss:$16 sps:$4 sm:$0xff]  }
 0x231   : > { %4840 = vmatpush1.bf16.msra.mxu1 %v6504_v60  ;;  %4800 = vmatprep.subr.bf16.mxu0 %v6509_v40  ;;  %v7658_v60 = vpack.c.b16 %v3728_v23, %v3728_v23  ;;  %v6563_v40 = vld [vmem:[%s6961_s9 + $0xecc] ss:$16 sps:$4 sm:$0xff]  }
 0x232   : > { %4841 = vmatprep.subr.bf16.mxu1 %v6512_v31  ;;  %v6566_v31 = vld [vmem:[%s6961_s9 + $0x10cc] ss:$16 sps:$4 sm:$0xff]  }
 0x233   : > { %v6623_v23 = vld [vmem:[%s6961_s9 + $0xf8c] ss:$16 sps:$4 sm:$0xff]  }
 0x234   : > { %4801 = vmatpush2.bf16.msra.mxu0 %v6507_v32 }
 0x235   : > { %4842 = vmatpush2.bf16.msra.mxu1 %v6510_v35  ;;  %4802 = vmatprep.subr.bf16.mxu0 %v6515_v4  ;;  %v6564_v4 = vld [vmem:[%s6961_s9 + $0x10c8] ss:$16 sps:$4 sm:$0xff]  }
 0x236   : > { %4843 = vmatprep.subr.bf16.mxu1 %v6518_v36 }
 0x238   : > { %4803 = vmatpush2.bf16.msra.mxu0 %v6513_v37 }
 0x239   : > { %4844 = vmatpush2.bf16.msra.mxu1 %v6516_v38  ;;  %4804 = vmatprep.subr.bf16.mxu0 %v6521_v44  ;;  %v6569_v38 = vld [vmem:[%s6961_s9 + $0xeac] ss:$16 sps:$4 sm:$0xff]  }
 0x23a   : > { %4845 = vmatprep.subr.bf16.mxu1 %v6524_v45  ;;  %v6567_v45 = vld [vmem:[%s6961_s9 + $0xea8] ss:$16 sps:$4 sm:$0xff]  }
 0x23c   : > { %4805 = vmatpush2.bf16.msra.mxu0 %v6519_v47  ;;  %v6570_v47 = vld [vmem:[%s6961_s9 + $0x10a8] ss:$16 sps:$4 sm:$0xff]  }
 0x23d   : > { %4846 = vmatpush2.bf16.msra.mxu1 %v6522_v49  ;;  %4806 = vmatprep.subr.bf16.mxu0 %v6527_v52  ;;  %v6581_v52 = vld [vmem:[%s6961_s9 + $0xe6c] ss:$16 sps:$4 sm:$0xff]  }
 0x23e   : > { %4847 = vmatprep.subr.bf16.mxu1 %v6530_v54  ;;  %v6584_v54 = vld [vmem:[%s6961_s9 + $0x106c] ss:$16 sps:$4 sm:$0xff]  }
 0x240   : > { %4807 = vmatpush2.bf16.msra.mxu0 %v6525_v58  ;;  %v6579_v58 = vld [vmem:[%s6961_s9 + $0xe68] ss:$16 sps:$4 sm:$0xff]  }
 0x241   : > { %4848 = vmatpush2.bf16.msra.mxu1 %v6528_v63  ;;  %4808 = vmatprep.subr.bf16.mxu0 %v6533_v27  ;;  %v6582_v63 = vld [vmem:[%s6961_s9 + $0x1068] ss:$16 sps:$4 sm:$0xff]  }
 0x242   : > { %4849 = vmatprep.subr.bf16.mxu1 %v6536_v17  ;;  %v6585_v27 = vld [vmem:[%s6961_s9 + $0xe48] ss:$16 sps:$4 sm:$0xff]  }
 0x243   : > { %v6588_v17 = vld [vmem:[%s6961_s9 + $0x1048] ss:$16 sps:$4 sm:$0xff]  }
 0x244   : > { %4809 = vmatpush2.bf16.msra.mxu0 %v6531_v5  ;;  %v6593_v5 = vld [vmem:[%s6961_s9 + $0xe2c] ss:$16 sps:$4 sm:$0xff]  }
 0x245   : > { %4850 = vmatpush2.bf16.msra.mxu1 %v6534_v7  ;;  %4810 = vmatprep.subr.bf16.mxu0 %v6539_v9  ;;  %v6596_v7 = vld [vmem:[%s6961_s9 + $0x102c] ss:$16 sps:$4 sm:$0xff]  }
 0x246   : > { %4851 = vmatprep.subr.bf16.mxu1 %v6542_v10  ;;  %v6599_v9 = vld [vmem:[%s6961_s9 + $0xe0c] ss:$16 sps:$4 sm:$0xff]  }
 0x247   : > { %v6602_v10 = vld [vmem:[%s6961_s9 + $0x100c] ss:$16 sps:$4 sm:$0xff]  }
 0x248   : > { %4811 = vmatpush2.bf16.msra.mxu0 %v6537_v11  ;;  %v6597_v11 = vld [vmem:[%s6961_s9 + $0xe08] ss:$16 sps:$4 sm:$0xff]  }
 0x249   : > { %4852 = vmatpush2.bf16.msra.mxu1 %v6540_v12  ;;  %4812 = vmatprep.subr.bf16.mxu0 %v6545_v14  ;;  %v6600_v12 = vld [vmem:[%s6961_s9 + $0x1008] ss:$16 sps:$4 sm:$0xff]  }
 0x24a   : > { %4853 = vmatprep.subr.bf16.mxu1 %v6548_v15  ;;  %v6603_v14 = vld [vmem:[%s6961_s9 + $0xfe8] ss:$16 sps:$4 sm:$0xff]  }
 0x24b   : > { %v6606_v15 = vld [vmem:[%s6961_s9 + $0x11e8] ss:$16 sps:$4 sm:$0xff]  }
 0x24c   : > { %4813 = vmatpush2.bf16.msra.mxu0 %v6543_v16  ;;  %v6611_v16 = vld [vmem:[%s6961_s9 + $0xfcc] ss:$16 sps:$4 sm:$0xff]  }
 0x24d   : > { %4854 = vmatpush2.bf16.msra.mxu1 %v6546_v24  ;;  %4814 = vmatprep.subr.bf16.mxu0 %v6551_v59  ;;  %v6614_v24 = vld [vmem:[%s6961_s9 + $0x11cc] ss:$16 sps:$4 sm:$0xff]  }
 0x24e   : > { %4855 = vmatprep.subr.bf16.mxu1 %v6554_v19  ;;  %v6617_v59 = vld [vmem:[%s6961_s9 + $0xfac] ss:$16 sps:$4 sm:$0xff]  }
 0x24f   : > { %v6620_v19 = vld [vmem:[%s6961_s9 + $0x11ac] ss:$16 sps:$4 sm:$0xff]  }
 0x250   : > { %4815 = vmatpush2.bf16.msra.mxu0 %v6549_v20  ;;  %v6615_v20 = vld [vmem:[%s6961_s9 + $0xfa8] ss:$16 sps:$4 sm:$0xff]  }
 0x251   : > { %4856 = vmatpush2.bf16.msra.mxu1 %v6552_v22  ;;  %4866 = vmatprep.subr.bf16.mxu0 %v6557_v25  ;;  %v6618_v22 = vld [vmem:[%s6961_s9 + $0x11a8] ss:$16 sps:$4 sm:$0xff]   ;;  %v6626_v25 = vld [vmem:[%s6961_s9 + $0x118c] ss:$16 sps:$4 sm:$0xff]  }
 0x252   : > { %4907 = vmatprep.subr.bf16.mxu1 %v6560_v26  ;;  %v6621_v26 = vld [vmem:[%s6961_s9 + $0xf88] ss:$16 sps:$4 sm:$0xff]  }
 0x253   : > { %v3570_v32 = vpop.f32.mrf.mxu0  ;;  %4817 = vmatmul.mubr.bf16.vlgmr.msra.gmra.mxu0 %v7658_v60 }
 0x254   : > { %v7664_v35 = vpop.f32.mrf.mxu1  ;;  %4858 = vmatmul.mubr.bf16.vlgmr.msra.gmra.mxu1 %v7572_v33  ;;  %v7669_v57 = vadd.f32 %v3570_v32, %v7593_v53  ;;  %4867 = vmatpush1.bf16.msra.mxu0 %v6555_v28  ;;  %v6624_v28 = vld [vmem:[%s6961_s9 + $0x1188] ss:$16 sps:$4 sm:$0xff]  }
 0x255   : > { %4908 = vmatpush1.bf16.msra.mxu1 %v6558_v29  ;;  %v3572_v36 = vpop.f32.mrf.mxu0  ;;  %4868 = vmatprep.subr.bf16.mxu0 %v6563_v40  ;;  %v6629_v29 = vld [vmem:[%s6961_s9 + $0xf6c] ss:$16 sps:$4 sm:$0xff]   ;;  %v6630_v32 = vld [vmem:[%s6961_s9 + $0x1168] ss:$16 sps:$4 sm:$0xff]  }
 0x256   : > { %v7673_v37 = vpop.f32.mrf.mxu1  ;;  %4909 = vmatprep.subr.bf16.mxu1 %v6566_v31  ;;  %v7678_v33 = vadd.f32 %v3572_v36, %v7597_v0  ;;  %4898 = vmatprep.mubr.bf16.mxu0 %v7482_v8  ;;  %v6575_v8 = vld [vmem:[%s6961_s9 + $0xe8c] ss:$16 sps:$4 sm:$0xff]   ;;  %v6627_v31 = vld [vmem:[%s6961_s9 + $0xf68] ss:$16 sps:$4 sm:$0xff]  }
 0x257   : > { %4939 = vmatprep.mubr.bf16.mxu1 %v7585_v39  ;;  %v3574_v53 = vpop.f32.mrf.mxu0  ;;  %v6578_v39 = vld [vmem:[%s6961_s9 + $0x108c] ss:$16 sps:$4 sm:$0xff]   ;;  %v6633_v36 = vld [vmem:[%s6961_s9 + $0xf48] ss:$16 sps:$4 sm:$0xff]  }
 0x258   : > { %v3615_v43 = vpop.f32.mrf.mxu1  ;;  %v4977_v44 = vcombine.low %v7669_v57, %v7678_v33  ;;  %4869 = vmatpush1.bf16.msra.mxu0 %v6561_v1  ;;  %v6632_v40 = vld [vmem:[%s6961_s9 + $0x116c] ss:$16 sps:$4 sm:$0xff]  }
 0x259   : > { %4910 = vmatpush1.bf16.msra.mxu1 %v6564_v4  ;;  %v3575_v49 = vpop.f32.mrf.mxu0  ;;  %4870 = vmatprep.subr.bf16.mxu0 %v6569_v38  ;;  %v6635_v1 = vld [vmem:[%s6961_s9 + $0xf4c] ss:$16 sps:$4 sm:$0xff]   ;;  %v6636_v38 = vld [vmem:[%s6961_s9 + $0x1148] ss:$16 sps:$4 sm:$0xff]  }
 0x25a   : > { %v3616_v0 = vpop.f32.mrf.mxu1  ;;  %4911 = vmatprep.subr.bf16.mxu1 %v6572_v42  ;;  %v6638_v4 = vld [vmem:[%s6961_s9 + $0x114c] ss:$16 sps:$4 sm:$0xff]   ;;  %v6639_v43 = vld [vmem:[%s6961_s9 + $0xf28] ss:$16 sps:$4 sm:$0xff]  }
 0x25b   : > { %v6641_v42 = vld [vmem:[%s6961_s9 + $0xf2c] ss:$16 sps:$4 sm:$0xff]   ;;  %v6645_v0 = vld [vmem:[%s6961_s9 + $0xf08] ss:$16 sps:$4 sm:$0xff]  }
 0x25c   : > { %4871 = vmatpush1.bf16.msra.mxu0 %v6567_v45  ;;  %v6644_v53 = vld [vmem:[%s6961_s9 + $0x112c] ss:$16 sps:$4 sm:$0xff]   ;;  %v6642_v45 = vld [vmem:[%s6961_s9 + $0x1128] ss:$16 sps:$4 sm:$0xff]  }
 0x25d   : > { %4912 = vmatpush1.bf16.msra.mxu1 %v6570_v47  ;;  %4872 = vmatprep.subr.bf16.mxu0 %v6575_v8  ;;  %v6647_v47 = vld [vmem:[%s6961_s9 + $0xf0c] ss:$16 sps:$4 sm:$0xff]   ;;  %v6648_v8 = vld [vmem:[%s6961_s9 + $0x1108] ss:$16 sps:$4 sm:$0xff]  }
 0x25e   : > { %4913 = vmatprep.subr.bf16.mxu1 %v6578_v39  ;;  %v6650_v49 = vld [vmem:[%s6961_s9 + $0x110c] ss:$16 sps:$4 sm:$0xff]   ;;  %v1170_v39 = vrot.slane %v7568_v30, %v7461_v41 }
 0x260   : > { %4873 = vmatpush1.bf16.msra.mxu0 %v6573_v50  ;;  %v1174_v50 = vrot.slane %v7568_v30, %v7464_v46 }
 0x261   : > { %4914 = vmatpush1.bf16.msra.mxu1 %v6576_v51  ;;  %4874 = vmatprep.subr.bf16.mxu0 %v6581_v52  ;;  %v3612_v51 = vadd.f32 %v7664_v35, %v1170_v39 }
 0x262   : > { %4915 = vmatprep.subr.bf16.mxu1 %v6584_v54 }
 0x264   : > { %4875 = vmatpush1.bf16.msra.mxu0 %v6579_v58  ;;  %v3614_v58 = vadd.f32 %v7673_v37, %v1174_v50 }
 0x265   : > { %4916 = vmatpush1.bf16.msra.mxu1 %v6582_v63  ;;  %4876 = vmatprep.subr.bf16.mxu0 %v6587_v2 }
 0x266   : > { %4917 = vmatprep.subr.bf16.mxu1 %v6590_v3 }
 0x268   : > { %4877 = vmatpush1.bf16.msra.mxu0 %v6585_v27 }
 0x269   : > { %4918 = vmatpush1.bf16.msra.mxu1 %v6588_v17  ;;  %4878 = vmatprep.subr.bf16.mxu0 %v6593_v5 }
 0x26a   : > { %4919 = vmatprep.subr.bf16.mxu1 %v6596_v7 }
 0x26c   : > { %4879 = vmatpush1.bf16.msra.mxu0 %v6591_v21 }
 0x26d   : > { %4920 = vmatpush1.bf16.msra.mxu1 %v6594_v6  ;;  %4880 = vmatprep.subr.bf16.mxu0 %v6599_v9  ;;  %v1139_v9 = vld [vmem:[%s7279_s4 + $0x8] sm:$0xf] }
 0x26e   : > { %4921 = vmatprep.subr.bf16.mxu1 %v6602_v10  ;;  %v1178_v10 = vrot.slane %v1139_v9, %v7285_v55 }
 0x270   : > { %4881 = vmatpush1.bf16.msra.mxu0 %v6597_v11  ;;  %v1182_v11 = vrot.slane %v1139_v9, %v7292_v61 }
 0x271   : > { %4922 = vmatpush1.bf16.msra.mxu1 %v6600_v12  ;;  %4882 = vmatprep.subr.bf16.mxu0 %v6605_v13 }
 0x272   : > { %4923 = vmatprep.subr.bf16.mxu1 %v6608_v56 }
 0x274   : > { %4883 = vmatpush2.bf16.msra.mxu0 %v6603_v14 }
 0x275   : > { %4924 = vmatpush2.bf16.msra.mxu1 %v6606_v15  ;;  %4884 = vmatprep.subr.bf16.mxu0 %v6611_v16 }
 0x276   : > { %4925 = vmatprep.subr.bf16.mxu1 %v6614_v24 }
 0x278   : > { %4885 = vmatpush2.bf16.msra.mxu0 %v6609_v62 }
 0x279   : > { %4926 = vmatpush2.bf16.msra.mxu1 %v6612_v48  ;;  %4886 = vmatprep.subr.bf16.mxu0 %v6617_v59 }
 0x27a   : > { %4927 = vmatprep.subr.bf16.mxu1 %v6620_v19 }
 0x27c   : > { %4887 = vmatpush2.bf16.msra.mxu0 %v6615_v20 }
 0x27d   : > { %4928 = vmatpush2.bf16.msra.mxu1 %v6618_v22  ;;  %4888 = vmatprep.subr.bf16.mxu0 %v6623_v23 }
 0x27e   : > { %4929 = vmatprep.subr.bf16.mxu1 %v6626_v25 }
 0x280   : > { %4889 = vmatpush2.bf16.msra.mxu0 %v6621_v26 }
 0x281   : > { %4930 = vmatpush2.bf16.msra.mxu1 %v6624_v28  ;;  %4890 = vmatprep.subr.bf16.mxu0 %v6629_v29 }
 0x282   : > { %4931 = vmatprep.subr.bf16.mxu1 %v6632_v40  ;;  %v1186_v40 = vrot.slane %v1139_v9, %v7461_v41 }
 0x284   : > { %4891 = vmatpush2.bf16.msra.mxu0 %v6627_v31  ;;  %v1190_v31 = vrot.slane %v1139_v9, %v7464_v46 }
 0x285   : > { %4932 = vmatpush2.bf16.msra.mxu1 %v6630_v32  ;;  %4892 = vmatprep.subr.bf16.mxu0 %v6635_v1 }
 0x286   : > { %4933 = vmatprep.subr.bf16.mxu1 %v6638_v4 }
 0x288   : > { %4893 = vmatpush2.bf16.msra.mxu0 %v6633_v36 }
 0x289   : > { %4934 = vmatpush2.bf16.msra.mxu1 %v6636_v38  ;;  %4894 = vmatprep.subr.bf16.mxu0 %v6641_v42 }
 0x28a   : > { %4935 = vmatprep.subr.bf16.mxu1 %v6644_v53 }
 0x28c   : > { %4895 = vmatpush2.bf16.msra.mxu0 %v6639_v43 }
 0x28d   : > { %4936 = vmatpush2.bf16.msra.mxu1 %v6642_v45  ;;  %4896 = vmatprep.subr.bf16.mxu0 %v6647_v47 }
 0x28e   : > { %4937 = vmatprep.subr.bf16.mxu1 %v6650_v49 }
 0x290   : > { %4897 = vmatpush2.bf16.msra.mxu0 %v6645_v0 }
 0x291   : > { %4938 = vmatpush2.bf16.msra.mxu1 %v6648_v8 }
 0x293   : > { %v3652_v52 = vpop.f32.mrf.mxu0  ;;  %4899 = vmatmul.mubr.bf16.vlgmr.msra.gmra.mxu0 %v7574_v34  ;;  %v4985_v34 = vrot.slane %v4977_v44, %v7494_v18 }
 0x294   : > { %v3693_v54 = vpop.f32.mrf.mxu1  ;;  %4940 = vmatmul.mubr.bf16.vlgmr.msra.gmra.mxu1 %v7658_v60  ;;  %v3653_v63 = vadd.f32 %v3652_v52, %v3612_v51 }
 0x295   : > { %v3654_v2 = vpop.f32.mrf.mxu0 }
 0x296   : > { %v3695_v3 = vpop.f32.mrf.mxu1  ;;  %v3655_v27 = vadd.f32 %v3654_v2, %v3614_v58  ;;  %v3694_v5 = vadd.f32 %v3693_v54, %v3653_v63 }
 0x297   : > { %v3656_v17 = vpop.f32.mrf.mxu0 }
 0x298   : > { %v3697_v30 = vpop.f32.mrf.mxu1  ;;  %v3696_v7 = vadd.f32 %v3695_v3, %v3655_v27 }
 0x299   : > { %v3657_v21 = vpop.f32.mrf.mxu0 }
 0x29a   : > { %v3698_v35 = vpop.f32.mrf.mxu1  ;;  %v4978_v6 = vcombine.low %v3694_v5, %v3696_v7 }
 0x29c   : > { %v4992_v60 = vrot.slane %v4978_v6, %v7494_v18 }
 0x29e   : > { %v4993_v37 = vcombine.low %v4985_v34, %v4992_v60 }
 0x2a0   : > { %5015 = vst [vmem:[%s7510_s8 + $0x8] sm:$0xff] %v4993_v37 }
 0x2d3   : > { %v4736_v12 = vpop.f32.mrf.mxu0 }
 0x2d4   : > { %v4777_v13 = vpop.f32.mrf.mxu1  ;;  %v4737_v56 = vadd.f32 %v4736_v12, %v1178_v10 }
 0x2d5   : > { %v4738_v14 = vpop.f32.mrf.mxu0 }
 0x2d6   : > { %v4779_v15 = vpop.f32.mrf.mxu1  ;;  %v4778_v16 = vadd.f32 %v4777_v13, %v4737_v56  ;;  %v4739_v24 = vadd.f32 %v4738_v14, %v1182_v11 }
 0x2d7   : > { %v4740_v62 = vpop.f32.mrf.mxu0 }
 0x2d8   : > { %v4781_v48 = vpop.f32.mrf.mxu1  ;;  %v4780_v57 = vadd.f32 %v4779_v15, %v4739_v24 }
 0x2d9   : > { %v4741_v33 = vpop.f32.mrf.mxu0 }
 0x2da   : > { %v4782_v44 = vpop.f32.mrf.mxu1 }
 0x313   : > { %v4818_v59 = vpop.f32.mrf.mxu0 }
 0x314   : > { %v4859_v19 = vpop.f32.mrf.mxu1  ;;  %v4819_v20 = vadd.f32 %v4818_v59, %v4778_v16 }
 0x315   : > { %v4820_v22 = vpop.f32.mrf.mxu0  ;;  %v4860_v32 = vadd.f32 %v4859_v19, %v1186_v40 }
 0x316   : > { %v4861_v23 = vpop.f32.mrf.mxu1  ;;  %v4821_v55 = vadd.f32 %v4820_v22, %v4780_v57 }
 0x317   : > { %v4822_v25 = vpop.f32.mrf.mxu0  ;;  %v4862_v36 = vadd.f32 %v4861_v23, %v1190_v31 }
 0x318   : > { %v4863_v61 = vpop.f32.mrf.mxu1  ;;  %v4994_v26 = vcombine.low %v4819_v20, %v4821_v55 }
 0x319   : > { %v4823_v28 = vpop.f32.mrf.mxu0 }
 0x31a   : > { %v4864_v29 = vpop.f32.mrf.mxu1  ;;  %v5002_v39 = vrot.slane %v4994_v26, %v7494_v18 }
 0x353   : > { %v4900_v1 = vpop.f32.mrf.mxu0 }
 0x354   : > { %v4941_v4 = vpop.f32.mrf.mxu1  ;;  %v4901_v38 = vadd.f32 %v4900_v1, %v4860_v32 }
 0x355   : > { %v4902_v42 = vpop.f32.mrf.mxu0 }
 0x356   : > { %v4943_v53 = vpop.f32.mrf.mxu1  ;;  %v4903_v43 = vadd.f32 %v4902_v42, %v4862_v36  ;;  %v4942_v49 = vadd.f32 %v4941_v4, %v4901_v38 }
 0x357   : > { %v4904_v45 = vpop.f32.mrf.mxu0 }
 0x358   : > { %v4945_v47 = vpop.f32.mrf.mxu1  ;;  %v4944_v0 = vadd.f32 %v4943_v53, %v4903_v43 }
 0x359   : > { %v4905_v41 = vpop.f32.mrf.mxu0 }
 0x35a   : > { %v4946_v8 = vpop.f32.mrf.mxu1  ;;  %v4995_v46 = vcombine.low %v4942_v49, %v4944_v0 }
 0x35c   : > { %v5009_v50 = vrot.slane %v4995_v46, %v7494_v18 }
 0x35e   : > { %v5010_v51 = vcombine.low %v5002_v39, %v5009_v50 }
 0x360   : > { %5016 = vst [vmem:[%s7510_s8 + $0x10] sm:$0xff] %v5010_v51 }
 0x361   : > { %6721 = shalt.err (!%p6718_p4)
}
 0x362   : > { %s6722_s28 = scalar_lea.hbm %s7766_s6, 384  ;;  %s6726_s19 = scalar_lea.hbm %s7812_s3, 1536 }
 0x363   : > { %p6723_p3 = scmp.ne.s32.totalorder %s7766_s6, %s6722_s28  ;;  %p6727_p5 = scmp.lt.s32.totalorder %s7766_s6, %s7812_s3 }
 0x364   : > { %p6728_p8 = scmp.lt.s32.totalorder %s6726_s19, %s6722_s28 }
 0x365   : > { %p6724_p11 = pnand %p6723_p3, %p7822_p1 }
 0x366   : > { %p6729_p6 = por %p6728_p8, %p6727_p5 }
 0x367   : > { %p6725_p13 = pneg %p6724_p11 }
 0x369   : > { %p6730_p12 = pnand %p6729_p6, %p6725_p13 }
 0x36b   : > { %6733 = shalt.err (!%p6730_p12)
}
 0x36c   : > { %s6786_s5 = smov 128   ;;  %s6787_s8 = smov 8  }
 0x36d   : > { %5731 = dma.vmem_to_hbm [thread:$0]  (%p7822_p1), %s7759_s10, 384, %s7766_s6, %s5018_s27, %s6786_s5, %s6786_s5, %s6787_s8  }
 0x36e PF: > { %p5747_p10 = scmp.ge.s32.totalorder %s6776_s15, 2  ;;  %s5047_s11 = sand.u32 1, %s6764_s12  }
 0x36f   : > { %p7823_p7 = scmp.ne.s32.totalorder %s7817_s24, 0  ;;  %s5048_s17 = scalar_lea.sflag [#allocation4], %s5047_s11 }
 0x371   : > { %p5741_p9 = pnand %p5747_p10, %p7823_p7 }
 0x373   : > { %p5742_p0 = pneg %p5741_p9 }
 0x375   : > { %6759 = dma.done.wait (%p5742_p0), %s5048_s17, 384  }
 0x376   : > { %6761 = vsyncadd (%p5742_p0), %s5048_s17, 4294966912  ;;  %p19_p2 = scmp.ge.s32.totalorder %s6833_s18, 6   ;;  %s7824_s12 = smov %s6768_s13 }
 0x377   : > { %s7825_s13 = smov %s6772_s14  ;;  %s7826_s14 = smov %s6845_s21 }
 0x378   : > { %s7827_s15 = smov %s6833_s18  ;;  %21 = sbr.rel (!%p19_p2) target bundleno = 7 (0x7), region = 91 }
 0x37d   :  { %5053 = vsyncpa [#allocation3], 1 }
 0x37e   :  { %5055 = vsyncpa [#allocation3 + $0x1], 1 }
 0x37f   :  { %5056 = vsyncpa [#allocation6], 1 }
 0x380   :  { %5058 = vsyncpa [#allocation6 + $0x1], 1 }
 0x381   :  { %5059 = vsyncpa [#allocation4], 1 }
 0x382   :  { %5061 = vsyncpa [#allocation4 + $0x1], 1 }

</bundles_post_ra>
